<compile_context>
chip_gen: v7x
topology: tpu7x:2x2x1
jax: 0.10.0
libtpu: 0.0.40
codegen_flags: <defaults>
</compile_context>

<pallas_src>
from functools import partial

import numpy as np
import jax
import jax.numpy as jnp
from jax import lax
from jax.experimental import pallas as pl
from jax.experimental.pallas import tpu as pltpu


# ----------------------------- Pallas kernel --------------------------------
def dqn_kernel(x_ref, w1_ref, b1_ref, w2_ref, b2_ref, w3_ref, b3_ref,
               w4_ref, b4_ref, out_ref):
    f32, bf16 = jnp.float32, jnp.bfloat16
    x = x_ref[...]                                                   # (TB, 784) bf16
    # h1 = relu(W1 @ x^T + b1): contract dim 1 of W1 with dim 1 of x.
    # The batch lands on the lane axis; no HBM-side transpose needed.
    h1 = lax.dot_general(w1_ref[...], x, (((1,), (1,)), ((), ())),
                         preferred_element_type=f32)                 # (864, TB) f32
    h1 = jnp.maximum(h1 + b1_ref[...], 0.0).astype(bf16)
    h2 = jnp.dot(w2_ref[...], h1, preferred_element_type=f32)        # (256, TB)
    h2 = jnp.maximum(h2 + b2_ref[...], 0.0).astype(bf16)
    f1 = jnp.dot(w3_ref[...], h2, preferred_element_type=f32)        # (32, TB)
    f1 = jnp.maximum(f1 + b3_ref[...], 0.0).astype(bf16)
    out_ref[...] = (jnp.dot(w4_ref[...], f1, preferred_element_type=f32)
                    + b4_ref[...])                                   # (8, TB) f32


# --------------------------- glue: constant folding -------------------------
def _conv_to_dense(w_oihw, bias, H, W):
    """VALID conv as a dense (Cin*H*W, Cout*Ho*Wo) matrix, NCHW-flat order."""
    Cout, Cin, KH, KW = w_oihw.shape
    Ho, Wo = H - KH + 1, W - KW + 1
    M = np.zeros((Cin * H * W, Cout * Ho * Wo), np.float32)
    for co in range(Cout):
        for ci in range(Cin):
            for kh in range(KH):
                for kw in range(KW):
                    v = w_oihw[co, ci, kh, kw]
                    for ho in range(Ho):
                        for wo in range(Wo):
                            M[ci * H * W + (ho + kh) * W + (wo + kw),
                              co * Ho * Wo + ho * Wo + wo] += v
    bvec = np.repeat(np.asarray(bias, np.float32), Ho * Wo)          # (Cout*Ho*Wo,)
    return M, bvec


def _avgpool_to_dense(C, H, W):
    """2x2/stride-2 avg-pool as a dense (C*H*W, C*Ho*Wo) matrix (NCHW-flat)."""
    Ho, Wo = H // 2, W // 2
    P = np.zeros((C * H * W, C * Ho * Wo), np.float32)
    for c in range(C):
        for ho in range(Ho):
            for wo in range(Wo):
                for dh in range(2):
                    for dw in range(2):
                        P[c * H * W + (2 * ho + dh) * W + (2 * wo + dw),
                          c * Ho * Wo + ho * Wo + wo] = 0.25
    return P


def _round_up(v, m):
    return ((v + m - 1) // m) * m


def _fold_params(params):
    """Fold conv/pool/flatten into 4 dense layers (offline, numpy); bf16 weights."""
    w1, b1, w2, b2, fw1, fb1v, fw2, fb2v = [np.asarray(p, np.float32) for p in params]
    M1, bv1 = _conv_to_dense(w1, b1, 14, 14)       # (784, 864), (864,)
    P1 = _avgpool_to_dense(6, 12, 12)              # (864, 216)
    M2, bv2 = _conv_to_dense(w2, b2, 6, 6)         # (216, 256), (256,)
    P2 = _avgpool_to_dense(16, 4, 4)               # (256, 64)  (== torch flatten order)

    W1 = np.ascontiguousarray(M1.T)                # (864, 784)
    W2 = np.ascontiguousarray((P1 @ M2).T)         # (256, 864)  pool1 folded into conv2
    W3 = np.ascontiguousarray(fw1 @ P2.T)          # (32, 256)   pool2+flatten folded into fc1
    W4 = np.zeros((8, 32), np.float32)             # fc2 padded to 8 rows (full sublanes)
    W4[:4] = fw2
    B4 = np.zeros((8, 1), np.float32)
    B4[:4, 0] = fb2v
    B1, B2, B3 = bv1[:, None], bv2[:, None], fb1v[:, None]

    return (jnp.asarray(W1, jnp.bfloat16), jnp.asarray(B1, jnp.float32),
            jnp.asarray(W2, jnp.bfloat16), jnp.asarray(B2, jnp.float32),
            jnp.asarray(W3, jnp.bfloat16), jnp.asarray(B3, jnp.float32),
            jnp.asarray(W4, jnp.bfloat16), jnp.asarray(B4, jnp.float32))


def _pick_tiles(N, block_b):
    """Batch tile TB (multiple of 128) and padded batch Npad.

    Keeps >= 2 'parallel' grid steps so both v7x TensorCores are used; for
    batches fitting in <= 2 tiles, split into exactly 2 tiles (multiple of 256).
    """
    if N <= 256:
        TB = 128
        Npad = max(_round_up(N, TB), 2 * TB)
    elif N <= 2 * block_b:
        TB = _round_up((N + 1) // 2, 256)
        Npad = 2 * TB
    else:
        TB = block_b
        Npad = _round_up(N, TB)
    return TB, Npad


# ------------------------------- wrapper -------------------------------------
@partial(jax.jit, static_argnums=(2,))
def _dqn_forward_impl(x_nchw, consts, block_b):
    N = x_nchw.shape[0]
    TB, Npad = _pick_tiles(N, block_b)

    # NCHW flatten (c,h,w) + bf16 cast + pad, fused by XLA under jit (one pass).
    xf = x_nchw.reshape(N, 784).astype(jnp.bfloat16)
    if Npad != N:
        xf = jnp.pad(xf, ((0, Npad - N), (0, 0)))

    def const_spec(a):
        nd = a.ndim
        return pl.BlockSpec(a.shape, lambda n, _nd=nd: (0,) * _nd)

    weight_bytes = sum(int(np.prod(c.shape)) * c.dtype.itemsize for c in consts)
    flops = 2 * (864 * 784 + 256 * 864 + 32 * 256 + 8 * 32) * Npad
    bytes_accessed = 784 * Npad * 2 + weight_bytes + 8 * Npad * 4
    cost = pl.CostEstimate(flops=flops, transcendentals=0,
                           bytes_accessed=bytes_accessed)

    out_t = pl.pallas_call(
        dqn_kernel,
        out_shape=jax.ShapeDtypeStruct((8, Npad), jnp.float32),
        grid=(Npad // TB,),
        in_specs=[pl.BlockSpec((TB, 784), lambda n: (n, 0))]
                 + [const_spec(a) for a in consts],
        out_specs=pl.BlockSpec((8, TB), lambda n: (0, n)),
        compiler_params=pltpu.CompilerParams(
            dimension_semantics=("parallel",),
            vmem_limit_bytes=32 * 1024 * 1024),
        cost_estimate=cost,
    )(xf, *consts)

    return out_t[:4, :N].T                                           # (N, 4) f32


def dqn_forward_pallas(x_nchw, params, block_b=512):
    assert x_nchw.shape[1:] == (4, 14, 14), "fc1(64) forces a 4x14x14 input"
    consts = _fold_params(params)
    return _dqn_forward_impl(jnp.asarray(x_nchw, jnp.float32), consts, block_b)


# -------------------------- pure-JAX reference (PyTorch semantics) ------------
def dqn_forward_reference(x, params):
    w1, b1, w2, b2, fw1, fb1v, fw2, fb2v = params
    hp = lax.Precision.HIGHEST
    y = lax.conv_general_dilated(x, w1, (1, 1), 'VALID',
                                 dimension_numbers=('NCHW', 'OIHW', 'NCHW'),
                                 precision=hp)
    y = jnp.maximum(y + b1[None, :, None, None], 0.0)
    y = lax.reduce_window(y, 0.0, lax.add, (1, 1, 2, 2), (1, 1, 2, 2), 'VALID') * 0.25
    y = lax.conv_general_dilated(y, w2, (1, 1), 'VALID',
                                 dimension_numbers=('NCHW', 'OIHW', 'NCHW'),
                                 precision=hp)
    y = jnp.maximum(y + b2[None, :, None, None], 0.0)
    y = lax.reduce_window(y, 0.0, lax.add, (1, 1, 2, 2), (1, 1, 2, 2), 'VALID') * 0.25
    y = y.reshape(y.shape[0], -1)                  # == torch.flatten(x, 1) on NCHW
    y = jnp.maximum(jnp.dot(y, fw1.T, precision=hp) + fb1v, 0.0)
    return jnp.dot(y, fw2.T, precision=hp) + fb2v


if __name__ == "__main__":
    key = jax.random.PRNGKey(0)
    ks = jax.random.split(key, 10)
    # Deterministic synthetic parameters (same shapes as the PyTorch module).
    w1 = 0.2 * jax.random.normal(ks[0], (6, 4, 3, 3), jnp.float32)     # conv1 OIHW
    b1 = 0.1 * jax.random.normal(ks[1], (6,), jnp.float32)
    w2 = 0.2 * jax.random.normal(ks[2], (16, 6, 3, 3), jnp.float32)    # conv2 OIHW
    b2 = 0.1 * jax.random.normal(ks[3], (16,), jnp.float32)
    fw1 = 0.2 * jax.random.normal(ks[4], (32, 64), jnp.float32)        # fc1 (out,in)
    fb1v = 0.1 * jax.random.normal(ks[5], (32,), jnp.float32)
    fw2 = 0.2 * jax.random.normal(ks[6], (4, 32), jnp.float32)         # fc2 (out,in)
    fb2v = 0.1 * jax.random.normal(ks[7], (4,), jnp.float32)
    params = (w1, b1, w2, b2, fw1, fb1v, fw2, fb2v)

    # Small case (batch=2 -> TB=128, 2 tiles) and a larger case
    # (batch=300 -> TB=256, 2 parallel tiles).
    x_small = jax.random.normal(ks[8], (2, 4, 14, 14), jnp.float32)
    x_big = jax.random.normal(ks[9], (300, 4, 14, 14), jnp.float32)

    for x in (x_small, x_big):
        out = jax.block_until_ready(dqn_forward_pallas(x, params))
        ref = jax.block_until_ready(dqn_forward_reference(x, params))
        # bf16 inputs/weights with f32 accumulation: observed error << 2e-2.
        if not np.allclose(np.asarray(out), np.asarray(ref), rtol=2e-2, atol=2e-2):
            raise AssertionError(
                f"Pallas/reference mismatch for batch={x.shape[0]}:\n{out[:4]}\nvs\n{ref[:4]}")
    print("KERNEL_OK")
</pallas_src>

<mosaic_0001>
module attributes {stable_mosaic.version = 11 : i64} {
  func.func @dqn_kernel(%arg0: i32, %arg1: memref<128x784xbf16, #tpu.memory_space<vmem>>, %arg2: memref<864x784xbf16, #tpu.memory_space<vmem>>, %arg3: memref<864x1xf32, #tpu.memory_space<vmem>>, %arg4: memref<256x864xbf16, #tpu.memory_space<vmem>>, %arg5: memref<256x1xf32, #tpu.memory_space<vmem>>, %arg6: memref<32x256xbf16, #tpu.memory_space<vmem>>, %arg7: memref<32x1xf32, #tpu.memory_space<vmem>>, %arg8: memref<8x32xbf16, #tpu.memory_space<vmem>>, %arg9: memref<8x1xf32, #tpu.memory_space<vmem>>, %arg10: memref<8x128xf32, #tpu.memory_space<vmem>>) attributes {dimension_semantics = [#tpu.dimension_semantics<parallel>], iteration_bounds = array<i64: 2>, scalar_prefetch = 0 : i64, scratch_operands = 0 : i64, tpu.core_type = #tpu.core_type<tc>, window_params = [{transform_indices = @transform_0, window_bounds = array<i64: 128, 784>}, {pipeline_mode = #tpu.pipeline_mode<synchronous>, transform_indices = @transform_1, window_bounds = array<i64: 864, 784>}, {pipeline_mode = #tpu.pipeline_mode<synchronous>, transform_indices = @transform_2, window_bounds = array<i64: 864, 1>}, {pipeline_mode = #tpu.pipeline_mode<synchronous>, transform_indices = @transform_3, window_bounds = array<i64: 256, 864>}, {pipeline_mode = #tpu.pipeline_mode<synchronous>, transform_indices = @transform_4, window_bounds = array<i64: 256, 1>}, {pipeline_mode = #tpu.pipeline_mode<synchronous>, transform_indices = @transform_5, window_bounds = array<i64: 32, 256>}, {pipeline_mode = #tpu.pipeline_mode<synchronous>, transform_indices = @transform_6, window_bounds = array<i64: 32, 1>}, {pipeline_mode = #tpu.pipeline_mode<synchronous>, transform_indices = @transform_7, window_bounds = array<i64: 8, 32>}, {pipeline_mode = #tpu.pipeline_mode<synchronous>, transform_indices = @transform_8, window_bounds = array<i64: 8, 1>}, {transform_indices = @transform_9, window_bounds = array<i64: 8, 128>}]} {
    %c0 = arith.constant 0 : index
    %c0_0 = arith.constant 0 : index
    %0 = vector.load %arg1[%c0, %c0_0] : memref<128x784xbf16, #tpu.memory_space<vmem>>, vector<128x784xbf16>
    %c0_1 = arith.constant 0 : index
    %c0_2 = arith.constant 0 : index
    %1 = vector.load %arg2[%c0_1, %c0_2] : memref<864x784xbf16, #tpu.memory_space<vmem>>, vector<864x784xbf16>
    %cst = arith.constant dense<0.000000e+00> : vector<864x128xf32>
    %2 = tpu.matmul %1, %0, %cst {dimension_numbers = #tpu.dot_dimension_numbers<[1], [1], [0], [0], [0, 0, 1, 0], [], []>} : vector<864x784xbf16>, vector<128x784xbf16>, vector<864x128xf32> -> vector<864x128xf32>
    %c0_3 = arith.constant 0 : index
    %c0_4 = arith.constant 0 : index
    %3 = vector.load %arg3[%c0_3, %c0_4] : memref<864x1xf32, #tpu.memory_space<vmem>>, vector<864x1xf32>
    %4 = vector.broadcast %3 : vector<864x1xf32> to vector<864x128xf32>
    %5 = arith.addf %2, %4 : vector<864x128xf32>
    %cst_5 = arith.constant 0.000000e+00 : f32
    %6 = vector.broadcast %cst_5 : f32 to vector<864x128xf32>
    %7 = arith.maximumf %5, %6 : vector<864x128xf32>
    %8 = arith.truncf %7 : vector<864x128xf32> to vector<864x128xbf16>
    %c0_6 = arith.constant 0 : index
    %c0_7 = arith.constant 0 : index
    %9 = vector.load %arg4[%c0_6, %c0_7] : memref<256x864xbf16, #tpu.memory_space<vmem>>, vector<256x864xbf16>
    %cst_8 = arith.constant dense<0.000000e+00> : vector<256x128xf32>
    %10 = tpu.matmul %9, %8, %cst_8 {dimension_numbers = #tpu.dot_dimension_numbers<[1], [0], [0], [1], [0, 0, 1, 1], [], []>} : vector<256x864xbf16>, vector<864x128xbf16>, vector<256x128xf32> -> vector<256x128xf32>
    %c0_9 = arith.constant 0 : index
    %c0_10 = arith.constant 0 : index
    %11 = vector.load %arg5[%c0_9, %c0_10] : memref<256x1xf32, #tpu.memory_space<vmem>>, vector<256x1xf32>
    %12 = vector.broadcast %11 : vector<256x1xf32> to vector<256x128xf32>
    %13 = arith.addf %10, %12 : vector<256x128xf32>
    %cst_11 = arith.constant 0.000000e+00 : f32
    %14 = vector.broadcast %cst_11 : f32 to vector<256x128xf32>
    %15 = arith.maximumf %13, %14 : vector<256x128xf32>
    %16 = arith.truncf %15 : vector<256x128xf32> to vector<256x128xbf16>
    %c0_12 = arith.constant 0 : index
    %c0_13 = arith.constant 0 : index
    %17 = vector.load %arg6[%c0_12, %c0_13] : memref<32x256xbf16, #tpu.memory_space<vmem>>, vector<32x256xbf16>
    %cst_14 = arith.constant dense<0.000000e+00> : vector<32x128xf32>
    %18 = tpu.matmul %17, %16, %cst_14 {dimension_numbers = #tpu.dot_dimension_numbers<[1], [0], [0], [1], [0, 0, 1, 1], [], []>} : vector<32x256xbf16>, vector<256x128xbf16>, vector<32x128xf32> -> vector<32x128xf32>
    %c0_15 = arith.constant 0 : index
    %c0_16 = arith.constant 0 : index
    %19 = vector.load %arg7[%c0_15, %c0_16] : memref<32x1xf32, #tpu.memory_space<vmem>>, vector<32x1xf32>
    %20 = vector.broadcast %19 : vector<32x1xf32> to vector<32x128xf32>
    %21 = arith.addf %18, %20 : vector<32x128xf32>
    %cst_17 = arith.constant 0.000000e+00 : f32
    %22 = vector.broadcast %cst_17 : f32 to vector<32x128xf32>
    %23 = arith.maximumf %21, %22 : vector<32x128xf32>
    %24 = arith.truncf %23 : vector<32x128xf32> to vector<32x128xbf16>
    %c0_18 = arith.constant 0 : index
    %c0_19 = arith.constant 0 : index
    %25 = vector.load %arg8[%c0_18, %c0_19] : memref<8x32xbf16, #tpu.memory_space<vmem>>, vector<8x32xbf16>
    %cst_20 = arith.constant dense<0.000000e+00> : vector<8x128xf32>
    %26 = tpu.matmul %25, %24, %cst_20 {dimension_numbers = #tpu.dot_dimension_numbers<[1], [0], [0], [1], [0, 0, 1, 1], [], []>} : vector<8x32xbf16>, vector<32x128xbf16>, vector<8x128xf32> -> vector<8x128xf32>
    %c0_21 = arith.constant 0 : index
    %c0_22 = arith.constant 0 : index
    %27 = vector.load %arg9[%c0_21, %c0_22] : memref<8x1xf32, #tpu.memory_space<vmem>>, vector<8x1xf32>
    %28 = vector.broadcast %27 : vector<8x1xf32> to vector<8x128xf32>
    %29 = arith.addf %26, %28 : vector<8x128xf32>
    %c0_23 = arith.constant 0 : index
    %c0_24 = arith.constant 0 : index
    %30 = vector.load %arg10[%c0_23, %c0_24] : memref<8x128xf32, #tpu.memory_space<vmem>>, vector<8x128xf32>
    tpu.vector_store %arg10[%c0_23, %c0_24], %29 {strides = array<i32>} : memref<8x128xf32, #tpu.memory_space<vmem>>, vector<8x128xf32>,
    return
  }
  func.func @transform_0(%arg0: i32) -> (i32, i32) {
    %c0_i32 = arith.constant 0 : i32
    %c0_i32_0 = arith.constant 0 : i32
    return %arg0, %c0_i32 : i32, i32
  }
  func.func @transform_1(%arg0: i32) -> (i32, i32) {
    %c0_i32 = arith.constant 0 : i32
    %c0_i32_0 = arith.constant 0 : i32
    %c0_i32_1 = arith.constant 0 : i32
    return %c0_i32, %c0_i32_0 : i32, i32
  }
  func.func @transform_2(%arg0: i32) -> (i32, i32) {
    %c0_i32 = arith.constant 0 : i32
    %c0_i32_0 = arith.constant 0 : i32
    %c0_i32_1 = arith.constant 0 : i32
    return %c0_i32, %c0_i32_0 : i32, i32
  }
  func.func @transform_3(%arg0: i32) -> (i32, i32) {
    %c0_i32 = arith.constant 0 : i32
    %c0_i32_0 = arith.constant 0 : i32
    %c0_i32_1 = arith.constant 0 : i32
    return %c0_i32, %c0_i32_0 : i32, i32
  }
  func.func @transform_4(%arg0: i32) -> (i32, i32) {
    %c0_i32 = arith.constant 0 : i32
    %c0_i32_0 = arith.constant 0 : i32
    %c0_i32_1 = arith.constant 0 : i32
    return %c0_i32, %c0_i32_0 : i32, i32
  }
  func.func @transform_5(%arg0: i32) -> (i32, i32) {
    %c0_i32 = arith.constant 0 : i32
    %c0_i32_0 = arith.constant 0 : i32
    %c0_i32_1 = arith.constant 0 : i32
    return %c0_i32, %c0_i32_0 : i32, i32
  }
  func.func @transform_6(%arg0: i32) -> (i32, i32) {
    %c0_i32 = arith.constant 0 : i32
    %c0_i32_0 = arith.constant 0 : i32
    %c0_i32_1 = arith.constant 0 : i32
    return %c0_i32, %c0_i32_0 : i32, i32
  }
  func.func @transform_7(%arg0: i32) -> (i32, i32) {
    %c0_i32 = arith.constant 0 : i32
    %c0_i32_0 = arith.constant 0 : i32
    %c0_i32_1 = arith.constant 0 : i32
    return %c0_i32, %c0_i32_0 : i32, i32
  }
  func.func @transform_8(%arg0: i32) -> (i32, i32) {
    %c0_i32 = arith.constant 0 : i32
    %c0_i32_0 = arith.constant 0 : i32
    %c0_i32_1 = arith.constant 0 : i32
    return %c0_i32, %c0_i32_0 : i32, i32
  }
  func.func @transform_9(%arg0: i32) -> (i32, i32) {
    %c0_i32 = arith.constant 0 : i32
    %c0_i32_0 = arith.constant 0 : i32
    return %c0_i32, %arg0 : i32, i32
  }
}

</mosaic_0001>

<bundles_post_ra>
// kernel: _dqn_forward_impl.1
= control target key start
LH: loop header
LB: loop body
LE: loop exit
PB: predicated region body
PF: predicated region fallthrough
CT: control target
= control target key end

     0   :  { %s10296_s30 = smov 0   ;;  %s13600_s0 = inlined_call_operand.vmem [shape: bf16[256,784], index: 0, kind: input, shape index: {}]   ;;  %s13601_s1 = inlined_call_operand.vmem [shape: bf16[864,784], index: 1, kind: input, shape index: {}]   ;;  %s13602_s2 = inlined_call_operand.vmem [shape: f32[864,1], index: 2, kind: input, shape index: {}]   ;;  %s13603_s3 = inlined_call_operand.vmem [shape: bf16[256,864], index: 3, kind: input, shape index: {}]   ;;  %s13604_s4 = inlined_call_operand.vmem [shape: f32[256,1], index: 4, kind: input, shape index: {}]   ;;  %s13605_s5 = inlined_call_operand.vmem [shape: bf16[32,256], index: 5, kind: input, shape index: {}]   ;;  %s13606_s6 = inlined_call_operand.vmem [shape: f32[32,1], index: 6, kind: input, shape index: {}]   ;;  %s13607_s7 = inlined_call_operand.vmem [shape: bf16[8,32], index: 7, kind: input, shape index: {}]   ;;  %s13608_s8 = inlined_call_operand.vmem [shape: f32[8,1], index: 8, kind: input, shape index: {}]   ;;  %s13609_s9 = inlined_call_operand.vmem [shape: f32[8,256], index: 9, kind: output, shape index: {}]  }
   0x1 LB: > { %s10302_s10 = sadd.s32 4294967295, %s10241_s30   ;;  %p7693_p0 = scmp.ge.s32.totalorder %s10241_s30, 1  ;;  %s10241_s30 = sphi %s10296_s30, %s19_s30  }
   0x2   : > { %p289_p1 = scmp.lt.s32.totalorder %s10241_s30, 3 }
   0x4   : > { %p290_p2 = pnand %p7693_p0, %p289_p1 }
   0x6   : > { %293 = sbr.rel (%p290_p2) target bundleno = 2109 (0x83d), region = 56 }
   0xd   : > { %s7694_s11 = sshll.u32 %s10302_s10, 4  ;;  %v9475_v0 = vld [vmem:[%s13601_s1 + $0x4] ss:$28 sps:$4 sm:$0xff]   ;;  %v9476_v19 = vld [vmem:[%s13601_s1 + $0x3c] ss:$28 sps:$4 sm:$0xff]   ;;  %vm3651_vm0 = vcmask 130048  }
   0xe   : > { %p326_p3 = scmp.lt.s32.totalorder %s7694_s11, 31  ;;  %3870 = vmatprep.mubr.bf16.mxu0 %v9475_v0  ;;  %v9473_v18 = vld [vmem:[%s13601_s1] ss:$28 sps:$4 sm:$0xff]   ;;  %v9478_v22 = vld [vmem:[%s13601_s1 + $0x38] ss:$28 sps:$4 sm:$0xff]   ;;  %vm6740_vm1 = vcmask 785408  }
   0xf   : > { %v9479_v23 = vld [vmem:[%s13601_s1 + $0x74] ss:$28 sps:$4 sm:$0xff]   ;;  %v9482_v27 = vld [vmem:[%s13601_s1 + $0xac] ss:$28 sps:$4 sm:$0xff]   ;;  %v9485_v31 = vld [vmem:[%s13601_s1 + $0xe4] ss:$28 sps:$4 sm:$0xff]  }
  0x10   : > { %s13873_s11 = smov (!%p326_p3, %s7694_s11), 31  ;;  %v9481_v26 = vld [vmem:[%s13601_s1 + $0x70] ss:$28 sps:$4 sm:$0xff]   ;;  %v9484_v30 = vld [vmem:[%s13601_s1 + $0xa8] ss:$28 sps:$4 sm:$0xff]   ;;  %vm10245_vm2 = vmmov 0  }
  0x11   : > { %s9435_s14 = smul.u32 28, %s13873_s11  ;;  %v9487_v34 = vld [vmem:[%s13601_s1 + $0xe0] ss:$28 sps:$4 sm:$0xff]   ;;  %v9490_v38 = vld [vmem:[%s13601_s1 + $0x118] ss:$28 sps:$4 sm:$0xff]   ;;  %vm7591_vm3 = vcmask 261120  }
  0x12   : > { %v9488_v35 = vld [vmem:[%s13601_s1 + $0x11c] ss:$28 sps:$4 sm:$0xff]   ;;  %v9491_v39 = vld [vmem:[%s13601_s1 + $0x154] ss:$28 sps:$4 sm:$0xff]   ;;  %v9494_v43 = vld [vmem:[%s13601_s1 + $0x18c] ss:$28 sps:$4 sm:$0xff]  }
  0x13   : > { %s10313_s17 = scalar_lea.vmem %s13600_s0, %s9435_s14  ;;  %v9493_v42 = vld [vmem:[%s13601_s1 + $0x150] ss:$28 sps:$4 sm:$0xff]   ;;  %v9496_v46 = vld [vmem:[%s13601_s1 + $0x188] ss:$28 sps:$4 sm:$0xff]   ;;  %v9499_v49 = vld [vmem:[%s13601_s1 + $0x1c0] ss:$28 sps:$4 sm:$0xff]  }
  0x14   : > { %v9449_v1 = vld [vmem:[%s10313_s17 + $0x4] ss:$28 sps:$4 sm:$0xff]   ;;  %v9452_v3 = vld [vmem:[%s10313_s17 + $0x3c] ss:$28 sps:$4 sm:$0xff]   ;;  %v9455_v5 = vld [vmem:[%s10313_s17 + $0x74] ss:$28 sps:$4 sm:$0xff]  }
  0x15   : > { %v9451_v2 = vld [vmem:[%s10313_s17] ss:$28 sps:$4 sm:$0xff]   ;;  %3838 = vmatprep.subr.bf16.mxu0 %v9449_v1  ;;  %8947 = vmatprep.subr.bf16.mxu1 %v9449_v1  ;;  %v9454_v4 = vld [vmem:[%s10313_s17 + $0x38] ss:$28 sps:$4 sm:$0xff]   ;;  %v9457_v6 = vld [vmem:[%s10313_s17 + $0x70] ss:$28 sps:$4 sm:$0xff]  }
  0x16   : > { %3839 = vmatpush1.bf16.xpose.msra.mxu0 %v9451_v2  ;;  %8955 = vmatpush1.bf16.xpose.msra.mxu1 %v9451_v2  ;;  %v9458_v7 = vld [vmem:[%s10313_s17 + $0xac] ss:$28 sps:$4 sm:$0xff]   ;;  %v9461_v9 = vld [vmem:[%s10313_s17 + $0xe4] ss:$28 sps:$4 sm:$0xff]   ;;  %v9464_v11 = vld [vmem:[%s10313_s17 + $0x11c] ss:$28 sps:$4 sm:$0xff]  }
  0x17   : > { %3840 = vmatprep.subr.bf16.mxu0 %v9452_v3  ;;  %8948 = vmatprep.subr.bf16.mxu1 %v9452_v3  ;;  %v9460_v8 = vld [vmem:[%s10313_s17 + $0xa8] ss:$28 sps:$4 sm:$0xff]   ;;  %v9463_v10 = vld [vmem:[%s10313_s17 + $0xe0] ss:$28 sps:$4 sm:$0xff]   ;;  %v9466_v12 = vld [vmem:[%s10313_s17 + $0x118] ss:$28 sps:$4 sm:$0xff]  }
  0x18   : > { %v9467_v13 = vld [vmem:[%s10313_s17 + $0x154] ss:$28 sps:$4 sm:$0xff]   ;;  %v9470_v15 = vld [vmem:[%s10313_s17 + $0x18c] ss:$28 sps:$4 sm:$0xff]   ;;  %v9508_v21 = vld [vmem:[%s10313_s17 + $0x44] ss:$28 sps:$4 sm:$0xff]  }
  0x19   : > { %v9469_v14 = vld [vmem:[%s10313_s17 + $0x150] ss:$28 sps:$4 sm:$0xff]   ;;  %v9472_v16 = vld [vmem:[%s10313_s17 + $0x188] ss:$28 sps:$4 sm:$0xff]   ;;  %v9506_v24 = vld [vmem:[%s10313_s17 + $0x40] ss:$28 sps:$4 sm:$0xff]  }
  0x1a   : > { %v9502_v17 = vld [vmem:[%s10313_s17 + $0xc] ss:$28 sps:$4 sm:$0xff]   ;;  %v9514_v25 = vld [vmem:[%s10313_s17 + $0x7c] ss:$28 sps:$4 sm:$0xff]   ;;  %v9520_v29 = vld [vmem:[%s10313_s17 + $0xb4] ss:$28 sps:$4 sm:$0xff]  }
  0x1b   : > { %v9500_v20 = vld [vmem:[%s10313_s17 + $0x8] ss:$28 sps:$4 sm:$0xff]   ;;  %v9512_v28 = vld [vmem:[%s10313_s17 + $0x78] ss:$28 sps:$4 sm:$0xff]   ;;  %v9518_v32 = vld [vmem:[%s10313_s17 + $0xb0] ss:$28 sps:$4 sm:$0xff]  }
  0x1c   : > { %v9526_v33 = vld [vmem:[%s10313_s17 + $0xec] ss:$28 sps:$4 sm:$0xff]   ;;  %v9532_v37 = vld [vmem:[%s10313_s17 + $0x124] ss:$28 sps:$4 sm:$0xff]   ;;  %v9538_v41 = vld [vmem:[%s10313_s17 + $0x15c] ss:$28 sps:$4 sm:$0xff]  }
  0x1d   : > { %v9524_v36 = vld [vmem:[%s10313_s17 + $0xe8] ss:$28 sps:$4 sm:$0xff]   ;;  %v9530_v40 = vld [vmem:[%s10313_s17 + $0x120] ss:$28 sps:$4 sm:$0xff]   ;;  %v9536_v44 = vld [vmem:[%s10313_s17 + $0x158] ss:$28 sps:$4 sm:$0xff]  }
  0x1e   : > { %3841 = vmatpush1.bf16.xpose.msra.mxu0 %v9454_v4  ;;  %8956 = vmatpush1.bf16.xpose.msra.mxu1 %v9454_v4  ;;  %v9544_v45 = vld [vmem:[%s10313_s17 + $0x194] ss:$28 sps:$4 sm:$0xff]   ;;  %v9497_v47 = vld [vmem:[%s13601_s1 + $0x1c4] ss:$28 sps:$4 sm:$0xff]   ;;  %v9503_v50 = vld [vmem:[%s13601_s1 + $0x1fc] ss:$28 sps:$4 sm:$0xff]  }
  0x1f   : > { %3842 = vmatprep.subr.bf16.mxu0 %v9455_v5  ;;  %8949 = vmatprep.subr.bf16.mxu1 %v9455_v5  ;;  %v9542_v48 = vld [vmem:[%s10313_s17 + $0x190] ss:$28 sps:$4 sm:$0xff]   ;;  %v9505_v51 = vld [vmem:[%s13601_s1 + $0x1f8] ss:$28 sps:$4 sm:$0xff]   ;;  %v9517_v55 = vld [vmem:[%s13601_s1 + $0x268] ss:$28 sps:$4 sm:$0xff]  }
  0x20   : > { %v9509_v52 = vld [vmem:[%s13601_s1 + $0x234] ss:$28 sps:$4 sm:$0xff]   ;;  %v9515_v54 = vld [vmem:[%s13601_s1 + $0x26c] ss:$28 sps:$4 sm:$0xff]   ;;  %v9521_v56 = vld [vmem:[%s13601_s1 + $0x2a4] ss:$28 sps:$4 sm:$0xff]  }
  0x21   : > { %v9511_v53 = vld [vmem:[%s13601_s1 + $0x230] ss:$28 sps:$4 sm:$0xff]   ;;  %v9523_v57 = vld [vmem:[%s13601_s1 + $0x2a0] ss:$28 sps:$4 sm:$0xff]   ;;  %v9529_v59 = vld [vmem:[%s13601_s1 + $0x2d8] ss:$28 sps:$4 sm:$0xff]  }
  0x22   : > { %v9527_v58 = vld [vmem:[%s13601_s1 + $0x2dc] ss:$28 sps:$4 sm:$0xff]   ;;  %v9533_v60 = vld [vmem:[%s13601_s1 + $0x314] ss:$28 sps:$4 sm:$0xff]   ;;  %v9539_v62 = vld [vmem:[%s13601_s1 + $0x34c] ss:$28 sps:$4 sm:$0xff]  }
  0x23   : > { %v9535_v61 = vld [vmem:[%s13601_s1 + $0x310] ss:$28 sps:$4 sm:$0xff]   ;;  %v9541_v63 = vld [vmem:[%s13601_s1 + $0x348] ss:$28 sps:$4 sm:$0xff]   ;;  %v9595_v1 = vld [vmem:[%s13601_s1 + $0x380] ss:$28 sps:$4 sm:$0xff]  }
  0x24   : > { %v9547_v0 = vld [vmem:[%s13601_s1 + $0xc] ss:$28 sps:$4 sm:$0xff]   ;;  %v9597_v2 = vld [vmem:[%s13601_s1 + $0x384] ss:$28 sps:$4 sm:$0xff]   ;;  %v9601_v5 = vld [vmem:[%s13601_s1 + $0x3bc] ss:$28 sps:$4 sm:$0xff]  }
  0x25   : > { %v9545_v3 = vld [vmem:[%s13601_s1 + $0x8] ss:$28 sps:$4 sm:$0xff]   ;;  %3998 = vmatprep.mubr.bf16.mxu1 %v9597_v2  ;;  %p332_p4 = scmp.lt.s32.totalorder %s10302_s10, 1 }
  0x26   : > { %3843 = vmatpush1.bf16.xpose.msra.mxu0 %v9457_v6  ;;  %8957 = vmatpush1.bf16.xpose.msra.mxu1 %v9457_v6  ;;  %v9548_v4 = vld [vmem:[%s13601_s1 + $0x44] ss:$28 sps:$4 sm:$0xff]  }
  0x27   : > { %3844 = vmatprep.subr.bf16.mxu0 %v9458_v7  ;;  %8950 = vmatprep.subr.bf16.mxu1 %v9458_v7  ;;  %v9550_v6 = vld [vmem:[%s13601_s1 + $0x40] ss:$28 sps:$4 sm:$0xff]   ;;  %v9662_v2 = vld [vmem:[%s10313_s17 + $0x48] ss:$28 sps:$4 sm:$0xff]   ;;  %s13875_s10 = smov (!%p332_p4, %s10302_s10), 1 }
  0x28   : > { %v9551_v7 = vld [vmem:[%s13601_s1 + $0x7c] ss:$28 sps:$4 sm:$0xff]  }
  0x2e   : > { %3845 = vmatpush1.bf16.xpose.msra.mxu0 %v9460_v8  ;;  %8958 = vmatpush1.bf16.xpose.msra.mxu1 %v9460_v8  ;;  %v9604_v8 = vld [vmem:[%s13601_s1 + $0x3b8] ss:$28 sps:$4 sm:$0xff]  }
  0x2f   : > { %3846 = vmatprep.subr.bf16.mxu0 %v9461_v9  ;;  %8951 = vmatprep.subr.bf16.mxu1 %v9461_v9  ;;  %v9607_v9 = vld [vmem:[%s13601_s1 + $0x3f4] ss:$28 sps:$4 sm:$0xff]  }
  0x36   : > { %3847 = vmatpush1.bf16.xpose.msra.mxu0 %v9463_v10  ;;  %8959 = vmatpush1.bf16.xpose.msra.mxu1 %v9463_v10  ;;  %v9553_v10 = vld [vmem:[%s13601_s1 + $0x78] ss:$28 sps:$4 sm:$0xff]  }
  0x37   : > { %3848 = vmatprep.subr.bf16.mxu0 %v9464_v11  ;;  %8952 = vmatprep.subr.bf16.mxu1 %v9464_v11  ;;  %v9554_v11 = vld [vmem:[%s13601_s1 + $0xb4] ss:$28 sps:$4 sm:$0xff]  }
  0x3e   : > { %3849 = vmatpush1.bf16.xpose.msra.mxu0 %v9466_v12  ;;  %8960 = vmatpush1.bf16.xpose.msra.mxu1 %v9466_v12  ;;  %v9610_v12 = vld [vmem:[%s13601_s1 + $0x3f0] ss:$28 sps:$4 sm:$0xff]  }
  0x3f   : > { %3850 = vmatprep.subr.bf16.mxu0 %v9467_v13  ;;  %8953 = vmatprep.subr.bf16.mxu1 %v9467_v13  ;;  %v9613_v13 = vld [vmem:[%s13601_s1 + $0x42c] ss:$28 sps:$4 sm:$0xff]  }
  0x46   : > { %3851 = vmatpush1.bf16.xpose.msra.mxu0 %v9469_v14  ;;  %8961 = vmatpush1.bf16.xpose.msra.mxu1 %v9469_v14  ;;  %v9556_v14 = vld [vmem:[%s13601_s1 + $0xb0] ss:$28 sps:$4 sm:$0xff]  }
  0x47   : > { %3852 = vmatprep.subr.bf16.mxu0 %v9470_v15  ;;  %8954 = vmatprep.subr.bf16.mxu1 %v9470_v15  ;;  %v9557_v15 = vld [vmem:[%s13601_s1 + $0xec] ss:$28 sps:$4 sm:$0xff]  }
  0x4e   : > { %3853 = vmatpush1.bf16.xpose.msra.mxu0 %v9472_v16  ;;  %8962 = vmatpush1.bf16.xpose.msra.mxu1 %v9472_v16  ;;  %v9616_v16 = vld [vmem:[%s13601_s1 + $0x428] ss:$28 sps:$4 sm:$0xff]  }
  0x4f   : > { %4303 = vmatprep.subr.bf16.mxu0 %v9502_v17  ;;  %v9617_v17 = vld [vmem:[%s10313_s17 + $0x10] ss:$28 sps:$4 sm:$0xff]  }
  0x55   : > { %3871 = vmatmul.mubr.bf16.vlgmr.msra.gmra.mrb[0].mxu0 %v9473_v18  ;;  %3999 = vmatmul.mubr.bf16.vlgmr.msra.gmra.mrb[0].mxu1 %v9595_v1  ;;  %v9619_v18 = vld [vmem:[%s10313_s17 + $0x14] ss:$28 sps:$4 sm:$0xff]   ;;  %v858_v1 = vld [vmem:[%s13602_s2 + $0xc8] sm:$0xff] }
  0x56   : > { %3878 = vmatprep.mubr.bf16.mxu0 %v9476_v19  ;;  %4304 = vmatpush1.bf16.xpose.msra.mxu0 %v9500_v20  ;;  %v9622_v19 = vld [vmem:[%s13601_s1 + $0x464] ss:$28 sps:$4 sm:$0xff]  }
  0x57   : > { %4305 = vmatprep.subr.bf16.mxu0 %v9508_v21  ;;  %4006 = vmatprep.mubr.bf16.mxu1 %v9601_v5  ;;  %v9559_v20 = vld [vmem:[%s13601_s1 + $0xe8] ss:$28 sps:$4 sm:$0xff]  }
  0x58   : > { %v9560_v21 = vld [vmem:[%s13601_s1 + $0x124] ss:$28 sps:$4 sm:$0xff]   ;;  %v9667_v5 = vld [vmem:[%s13601_s1 + $0x5ec] ss:$28 sps:$4 sm:$0xff]  }
  0x5d   : > { %3879 = vmatmul.mubr.bf16.gmra.mrb[4].mxu0 %v9478_v22  ;;  %4007 = vmatmul.mubr.bf16.gmra.mrb[4].mxu1 %v9604_v8  ;;  %v9625_v22 = vld [vmem:[%s13601_s1 + $0x460] ss:$28 sps:$4 sm:$0xff]   ;;  %v9581_v8 = vld [vmem:[%s13601_s1 + $0x2ac] ss:$28 sps:$4 sm:$0xff]  }
  0x5e   : > { %3886 = vmatprep.mubr.bf16.mxu0 %v9479_v23  ;;  %4306 = vmatpush1.bf16.xpose.msra.mxu0 %v9506_v24  ;;  %v9628_v23 = vld [vmem:[%s13601_s1 + $0x49c] ss:$28 sps:$4 sm:$0xff]  }
  0x5f   : > { %4307 = vmatprep.subr.bf16.mxu0 %v9514_v25  ;;  %4014 = vmatprep.mubr.bf16.mxu1 %v9607_v9  ;;  %v9562_v24 = vld [vmem:[%s13601_s1 + $0x120] ss:$28 sps:$4 sm:$0xff]   ;;  %v9670_v9 = vld [vmem:[%s13601_s1 + $0x5e8] ss:$28 sps:$4 sm:$0xff]  }
  0x60   : > { %v9563_v25 = vld [vmem:[%s13601_s1 + $0x15c] ss:$28 sps:$4 sm:$0xff]  }
  0x65   : > { %3887 = vmatmul.mubr.bf16.gmra.mrb[8].mxu0 %v9481_v26  ;;  %4015 = vmatmul.mubr.bf16.gmra.mrb[8].mxu1 %v9610_v12  ;;  %v9631_v26 = vld [vmem:[%s13601_s1 + $0x498] ss:$28 sps:$4 sm:$0xff]   ;;  %v9673_v12 = vld [vmem:[%s13601_s1 + $0x624] ss:$28 sps:$4 sm:$0xff]  }
  0x66   : > { %3894 = vmatprep.mubr.bf16.mxu0 %v9482_v27  ;;  %4308 = vmatpush1.bf16.xpose.msra.mxu0 %v9512_v28  ;;  %v9634_v27 = vld [vmem:[%s13601_s1 + $0x4d4] ss:$28 sps:$4 sm:$0xff]  }
  0x67   : > { %4309 = vmatprep.subr.bf16.mxu0 %v9520_v29  ;;  %4022 = vmatprep.mubr.bf16.mxu1 %v9613_v13  ;;  %v9565_v28 = vld [vmem:[%s13601_s1 + $0x158] ss:$28 sps:$4 sm:$0xff]   ;;  %v10243_v29 = vmov 0  }
  0x68   : > { %9448 = vset.pattern.permute.xlu1 %v10243_v29  ;;  %9447 = vset.pattern.permute.xlu0 %v10243_v29  ;;  %v843_v13 = vld [vmem:[%s13602_s2 + $0x50] sm:$0xff] }
  0x69   : > { %v847_v29 = vld [vmem:[%s13602_s2 + $0x70] sm:$0xff] }
  0x6d   : > { %3895 = vmatmul.mubr.bf16.gmra.mrb[12].mxu0 %v9484_v30  ;;  %4023 = vmatmul.mubr.bf16.gmra.mrb[12].mxu1 %v9616_v16  ;;  %v9566_v30 = vld [vmem:[%s13601_s1 + $0x194] ss:$28 sps:$4 sm:$0xff]   ;;  %v9584_v16 = vld [vmem:[%s13601_s1 + $0x2e4] ss:$28 sps:$4 sm:$0xff]  }
  0x6e   : > { %3902 = vmatprep.mubr.bf16.mxu0 %v9485_v31  ;;  %4310 = vmatpush1.bf16.xpose.msra.mxu0 %v9518_v32  ;;  %v9637_v31 = vld [vmem:[%s13601_s1 + $0x4d0] ss:$28 sps:$4 sm:$0xff]   ;;  %v849_v32 = vld [vmem:[%s13602_s2 + $0x80] sm:$0xff] }
  0x6f   : > { %4311 = vmatprep.subr.bf16.mxu0 %v9526_v33  ;;  %4030 = vmatprep.mubr.bf16.mxu1 %v9622_v19  ;;  %v833_v33 = vld [vmem:[%s13602_s2] sm:$0xff]  ;;  %v862_v19 = vld [vmem:[%s13602_s2 + $0xe8] sm:$0xff] }
  0x70   : > { %1023 = vperm.xlu0 %9447, %v849_v32   ;;  %943 = vperm.xlu1 %9448, %v833_v33   ;;  %v9590_v32 = vld [vmem:[%s13601_s1 + $0x354] ss:$28 sps:$4 sm:$0xff]  }
  0x71   : > { %v9688_v33 = vld [vmem:[%s13601_s1 + $0x690] ss:$28 sps:$4 sm:$0xff]  }
  0x75   : > { %3903 = vmatmul.mubr.bf16.gmra.mrb[16].mxu0 %v9487_v34  ;;  %4031 = vmatmul.mubr.bf16.gmra.mrb[16].mxu1 %v9625_v22  ;;  %v9640_v34 = vld [vmem:[%s13601_s1 + $0x50c] ss:$28 sps:$4 sm:$0xff]  }
  0x76   : > { %3910 = vmatprep.mubr.bf16.mxu0 %v9488_v35  ;;  %4312 = vmatpush1.bf16.xpose.msra.mxu0 %v9524_v36  ;;  %v850_v35 = vld [vmem:[%s13602_s2 + $0x88] sm:$0xff] }
  0x77   : > { %4313 = vmatprep.subr.bf16.mxu0 %v9532_v37  ;;  %4038 = vmatprep.mubr.bf16.mxu1 %v9628_v23  ;;  %v834_v36 = vld [vmem:[%s13602_s2 + $0x8] sm:$0xff]  ;;  %v9586_v23 = vld [vmem:[%s13601_s1 + $0x2e0] ss:$28 sps:$4 sm:$0xff]  }
  0x78   : > { %v9568_v37 = vld [vmem:[%s13601_s1 + $0x190] ss:$28 sps:$4 sm:$0xff]   ;;  %1028 = vperm.xlu0 %9447, %v850_v35   ;;  %948 = vperm.xlu1 %9448, %v834_v36  }
  0x79   : > { %v846_v22 = vld [vmem:[%s13602_s2 + $0x68] sm:$0xff] }
  0x7a   : > { %v882_v35 = vld [vmem:[%s13602_s2 + $0x188] sm:$0xff] }
  0x7b   : > { %v9691_v36 = vld [vmem:[%s13601_s1 + $0x6cc] ss:$28 sps:$4 sm:$0xff]  }
  0x7d   : > { %3911 = vmatmul.mubr.bf16.gmra.mrb[20].mxu0 %v9490_v38  ;;  %4039 = vmatmul.mubr.bf16.gmra.mrb[20].mxu1 %v9631_v26  ;;  %v9569_v38 = vld [vmem:[%s13601_s1 + $0x1cc] ss:$28 sps:$4 sm:$0xff]   ;;  %v863_v26 = vld [vmem:[%s13602_s2 + $0xf0] sm:$0xff] }
  0x7e   : > { %3918 = vmatprep.mubr.bf16.mxu0 %v9491_v39  ;;  %4314 = vmatpush1.bf16.xpose.msra.mxu0 %v9530_v40  ;;  %v9643_v39 = vld [vmem:[%s13601_s1 + $0x508] ss:$28 sps:$4 sm:$0xff]   ;;  %v851_v40 = vld [vmem:[%s13602_s2 + $0x90] sm:$0xff] }
  0x7f   : > { %4315 = vmatprep.subr.bf16.mxu0 %v9538_v41  ;;  %4046 = vmatprep.mubr.bf16.mxu1 %v9634_v27  ;;  %v852_v41 = vld [vmem:[%s13602_s2 + $0x98] sm:$0xff] }
  0x80   : > { %1033 = vperm.xlu0 %9447, %v851_v40   ;;  %1038 = vperm.xlu1 %9448, %v852_v41   ;;  %v864_v27 = vld [vmem:[%s13602_s2 + $0xf8] sm:$0xff]  ;;  %v9593_v40 = vld [vmem:[%s13601_s1 + $0x38c] ss:$28 sps:$4 sm:$0xff]  }
  0x81   : > { %v9694_v41 = vld [vmem:[%s13601_s1 + $0x6c8] ss:$28 sps:$4 sm:$0xff]  }
  0x85   : > { %3919 = vmatmul.mubr.bf16.gmra.mrb[24].mxu0 %v9493_v42  ;;  %4047 = vmatmul.mubr.bf16.gmra.mrb[24].mxu1 %v9637_v31  ;;  %v9646_v42 = vld [vmem:[%s13601_s1 + $0x544] ss:$28 sps:$4 sm:$0xff]   ;;  %v9589_v31 = vld [vmem:[%s13601_s1 + $0x318] ss:$28 sps:$4 sm:$0xff]  }
  0x86   : > { %3926 = vmatprep.mubr.bf16.mxu0 %v9494_v43  ;;  %4316 = vmatpush1.bf16.xpose.msra.mxu0 %v9536_v44  ;;  %v835_v43 = vld [vmem:[%s13602_s2 + $0x10] sm:$0xff]  ;;  %v836_v44 = vld [vmem:[%s13602_s2 + $0x18] sm:$0xff] }
  0x87   : > { %4317 = vmatprep.subr.bf16.mxu0 %v9544_v45  ;;  %4054 = vmatprep.mubr.bf16.mxu1 %v9640_v34  ;;  %v9571_v45 = vld [vmem:[%s13601_s1 + $0x1c8] ss:$28 sps:$4 sm:$0xff]  }
  0x88   : > { %953 = vperm.xlu0 %9447, %v835_v43   ;;  %958 = vperm.xlu1 %9448, %v836_v44   ;;  %v881_v34 = vld [vmem:[%s13602_s2 + $0x180] sm:$0xff]  ;;  %v884_v43 = vld [vmem:[%s13602_s2 + $0x198] sm:$0xff] }
  0x89   : > { %v9697_v44 = vld [vmem:[%s13601_s1 + $0x704] ss:$28 sps:$4 sm:$0xff]  }
  0x8d   : > { %3927 = vmatmul.mubr.bf16.gmra.mrb[28].mxu0 %v9496_v46  ;;  %4055 = vmatmul.mubr.bf16.gmra.mrb[28].mxu1 %v9643_v39  ;;  %v9572_v46 = vld [vmem:[%s13601_s1 + $0x204] ss:$28 sps:$4 sm:$0xff]   ;;  %v9592_v39 = vld [vmem:[%s13601_s1 + $0x350] ss:$28 sps:$4 sm:$0xff]  }
  0x8e   : > { %3934 = vmatprep.mubr.bf16.mxu0 %v9497_v47  ;;  %4318 = vmatpush1.bf16.xpose.msra.mxu0 %v9542_v48  ;;  %v9649_v47 = vld [vmem:[%s13601_s1 + $0x540] ss:$28 sps:$4 sm:$0xff]  }
  0x8f   : > { %4768 = vmatprep.subr.bf16.mxu0 %v9619_v18  ;;  %4062 = vmatprep.mubr.bf16.mxu1 %v9646_v42  ;;  %v853_v48 = vld [vmem:[%s13602_s2 + $0xa0] sm:$0xff]  ;;  %v883_v42 = vld [vmem:[%s13602_s2 + $0x190] sm:$0xff] }
  0x90   : > { %1043 = vperm.xlu0 %9447, %v853_v48   ;;  %v861_v18 = vld [vmem:[%s13602_s2 + $0xe0] sm:$0xff] }
  0x91   : > { %v9599_v48 = vld [vmem:[%s13601_s1 + $0x3c4] ss:$28 sps:$4 sm:$0xff]  }
  0x95   : > { %3935 = vmatmul.mubr.bf16.gmra.mrb[32].mxu0 %v9499_v49  ;;  %v854_v49 = vld [vmem:[%s13602_s2 + $0xa8] sm:$0xff]  ;;  %4063 = vmatmul.mubr.bf16.gmra.mrb[32].mxu1 %v9649_v47 }
  0x96   : > { %3942 = vmatprep.mubr.bf16.mxu0 %v9503_v50  ;;  %v9652_v50 = vld [vmem:[%s13601_s1 + $0x57c] ss:$28 sps:$4 sm:$0xff]   ;;  %1048 = vperm.xlu1 %9448, %v854_v49   ;;  %v9598_v47 = vld [vmem:[%s13601_s1 + $0x388] ss:$28 sps:$4 sm:$0xff]  }
  0x97   : > { %4070 = vmatprep.mubr.bf16.mxu1 %v9652_v50  ;;  %v9700_v49 = vld [vmem:[%s13601_s1 + $0x700] ss:$28 sps:$4 sm:$0xff]  }
  0x98   : > { %v885_v50 = vld [vmem:[%s13602_s2 + $0x1a0] sm:$0xff] }
  0x9d   : > { %3943 = vmatmul.mubr.bf16.gmra.mrb[36].mxu0 %v9505_v51  ;;  %v837_v51 = vld [vmem:[%s13602_s2 + $0x20] sm:$0xff] }
  0x9e   : > { %3950 = vmatprep.mubr.bf16.mxu0 %v9509_v52  ;;  %v838_v52 = vld [vmem:[%s13602_s2 + $0x28] sm:$0xff]  ;;  %963 = vperm.xlu0 %9447, %v837_v51  }
  0x9f   : > { %968 = vperm.xlu1 %9448, %v838_v52   ;;  %v886_v51 = vld [vmem:[%s13602_s2 + $0x1a8] sm:$0xff]  ;;  %v9703_v52 = vld [vmem:[%s13601_s1 + $0x73c] ss:$28 sps:$4 sm:$0xff]  }
  0xa5   : > { %3951 = vmatmul.mubr.bf16.gmra.mrb[40].mxu0 %v9511_v53  ;;  %v9574_v53 = vld [vmem:[%s13601_s1 + $0x200] ss:$28 sps:$4 sm:$0xff]  }
  0xa6   : > { %3958 = vmatprep.mubr.bf16.mxu0 %v9515_v54  ;;  %v9575_v54 = vld [vmem:[%s13601_s1 + $0x23c] ss:$28 sps:$4 sm:$0xff]  }
  0xad   : > { %3959 = vmatmul.mubr.bf16.gmra.mrb[44].mxu0 %v9517_v55  ;;  %v9655_v55 = vld [vmem:[%s13601_s1 + $0x578] ss:$28 sps:$4 sm:$0xff]  }
  0xae   : > { %3966 = vmatprep.mubr.bf16.mxu0 %v9521_v56  ;;  %v855_v56 = vld [vmem:[%s13602_s2 + $0xb0] sm:$0xff]  ;;  %4071 = vmatmul.mubr.bf16.gmra.mrb[36].mxu1 %v9655_v55  ;;  %v9603_v55 = vld [vmem:[%s13601_s1 + $0x3c0] ss:$28 sps:$4 sm:$0xff]  }
  0xaf   : > { %1053 = vperm.xlu0 %9447, %v855_v56   ;;  %v9605_v56 = vld [vmem:[%s13601_s1 + $0x3fc] ss:$28 sps:$4 sm:$0xff]  }
  0xb5   : > { %3967 = vmatmul.mubr.bf16.gmra.mrb[48].mxu0 %v9523_v57  ;;  %v856_v57 = vld [vmem:[%s13602_s2 + $0xb8] sm:$0xff] }
  0xb6   : > { %3974 = vmatprep.mubr.bf16.mxu0 %v9527_v58  ;;  %v9658_v58 = vld [vmem:[%s13601_s1 + $0x5b4] ss:$28 sps:$4 sm:$0xff]   ;;  %1058 = vperm.xlu1 %9448, %v856_v57  }
  0xb7   : > { %4078 = vmatprep.mubr.bf16.mxu1 %v9658_v58  ;;  %v9709_v57 = vld [vmem:[%s13601_s1 + $0x738] ss:$28 sps:$4 sm:$0xff]   ;;  %v9706_v58 = vld [vmem:[%s10313_s17 + $0x80] ss:$28 sps:$4 sm:$0xff]  }
  0xbd   : > { %3975 = vmatmul.mubr.bf16.gmra.mrb[52].mxu0 %v9529_v59  ;;  %v839_v59 = vld [vmem:[%s13602_s2 + $0x30] sm:$0xff] }
  0xbe   : > { %3982 = vmatprep.mubr.bf16.mxu0 %v9533_v60  ;;  %v840_v60 = vld [vmem:[%s13602_s2 + $0x38] sm:$0xff]  ;;  %973 = vperm.xlu0 %9447, %v839_v59   ;;  %v9708_v59 = vld [vmem:[%s10313_s17 + $0x84] ss:$28 sps:$4 sm:$0xff]  }
  0xbf   : > { %978 = vperm.xlu1 %9448, %v840_v60   ;;  %v887_v60 = vld [vmem:[%s13602_s2 + $0x1b0] sm:$0xff] }
  0xc3   : > { %1068 = vperm.xlu1 %9448, %v858_v1   ;;  %v9609_v1 = vld [vmem:[%s13601_s1 + $0x3f8] ss:$28 sps:$4 sm:$0xff]  }
  0xc5   : > { %3983 = vmatmul.mubr.bf16.gmra.mrb[56].mxu0 %v9535_v61  ;;  %v9577_v61 = vld [vmem:[%s13601_s1 + $0x238] ss:$28 sps:$4 sm:$0xff]  }
  0xc6   : > { %3990 = vmatprep.mubr.bf16.mxu0 %v9539_v62  ;;  %v9578_v62 = vld [vmem:[%s13601_s1 + $0x274] ss:$28 sps:$4 sm:$0xff]  }
  0xcd   : > { %3991 = vmatmul.mubr.bf16.gmra.mrb[60].mxu0 %v9541_v63  ;;  %v9661_v63 = vld [vmem:[%s13601_s1 + $0x5b0] ss:$28 sps:$4 sm:$0xff]  }
  0xce   : > { %4335 = vmatprep.mubr.bf16.mxu0 %v9547_v0  ;;  %v857_v0 = vld [vmem:[%s13602_s2 + $0xc0] sm:$0xff]  ;;  %4079 = vmatmul.mubr.bf16.gmra.mrb[40].mxu1 %v9661_v63  ;;  %v9712_v63 = vld [vmem:[%s13601_s1 + $0x774] ss:$28 sps:$4 sm:$0xff]  }
  0xcf   : > { %1063 = vperm.xlu0 %9447, %v857_v0   ;;  %4086 = vmatprep.mubr.bf16.mxu1 %v9667_v5  ;;  %v872_v0 = vld [vmem:[%s13602_s2 + $0x138] sm:$0xff]  ;;  %v890_v5 = vld [vmem:[%s13602_s2 + $0x1c8] sm:$0xff] }
  0xd5   : > { %4336 = vmatmul.mubr.bf16.vlgmr.msra.gmra.mrb[0].mxu0 %v9545_v3  ;;  %v9664_v3 = vld [vmem:[%s10313_s17 + $0x4c] ss:$28 sps:$4 sm:$0xff]  }
  0xd6   : > { %4343 = vmatprep.mubr.bf16.mxu0 %v9548_v4  ;;  %4769 = vmatpush1.bf16.xpose.msra.mxu0 %v9617_v17  ;;  %v841_v4 = vld [vmem:[%s13602_s2 + $0x40] sm:$0xff] }
  0xd7   : > { %4770 = vmatprep.subr.bf16.mxu0 %v9664_v3  ;;  %983 = vperm.xlu0 %9447, %v841_v4   ;;  %v9676_v17 = vld [vmem:[%s13601_s1 + $0x620] ss:$28 sps:$4 sm:$0xff]   ;;  %v9715_v3 = vld [vmem:[%s13601_s1 + $0x770] ss:$28 sps:$4 sm:$0xff]  }
  0xd8   : > { %4087 = vmatmul.mubr.bf16.gmra.mrb[44].mxu1 %v9670_v9  ;;  %v889_v4 = vld [vmem:[%s13602_s2 + $0x1c0] sm:$0xff]  ;;  %v9615_v9 = vld [vmem:[%s13601_s1 + $0x430] ss:$28 sps:$4 sm:$0xff]  }
  0xd9   : > { %4094 = vmatprep.mubr.bf16.mxu1 %v9673_v12  ;;  %v891_v12 = vld [vmem:[%s13602_s2 + $0x1d0] sm:$0xff] }
  0xdd   : > { %4344 = vmatmul.mubr.bf16.gmra.mrb[4].mxu0 %v9550_v6  ;;  %v842_v6 = vld [vmem:[%s13602_s2 + $0x48] sm:$0xff] }
  0xde   : > { %4351 = vmatprep.mubr.bf16.mxu0 %v9551_v7  ;;  %v9580_v7 = vld [vmem:[%s13601_s1 + $0x270] ss:$28 sps:$4 sm:$0xff]   ;;  %4771 = vmatpush1.bf16.xpose.msra.mxu0 %v9662_v2 }
  0xdf   : > { %988 = vperm.xlu1 %9448, %v842_v6   ;;  %4772 = vmatprep.subr.bf16.mxu0 %v9708_v59  ;;  %v9611_v2 = vld [vmem:[%s13601_s1 + $0x434] ss:$28 sps:$4 sm:$0xff]   ;;  %v9718_v6 = vld [vmem:[%s13601_s1 + $0x7ac] ss:$28 sps:$4 sm:$0xff]   ;;  %v9776_v59 = vld [vmem:[%s13601_s1 + $0x9a4] ss:$28 sps:$4 sm:$0xff]  }
  0xe0   : > { %4095 = vmatmul.mubr.bf16.gmra.mrb[48].mxu1 %v9676_v17  ;;  %v9624_v17 = vld [vmem:[%s13601_s1 + $0x468] ss:$28 sps:$4 sm:$0xff]  }
  0xe5   : > { %4352 = vmatmul.mubr.bf16.gmra.mrb[8].mxu0 %v9553_v10  ;;  %v859_v10 = vld [vmem:[%s13602_s2 + $0xd0] sm:$0xff] }
  0xe6   : > { %4359 = vmatprep.mubr.bf16.mxu0 %v9554_v11  ;;  %v860_v11 = vld [vmem:[%s13602_s2 + $0xd8] sm:$0xff]  ;;  %1073 = vperm.xlu0 %9447, %v859_v10   ;;  %v9620_v10 = vld [vmem:[%s13601_s1 + $0x46c] ss:$28 sps:$4 sm:$0xff]  }
  0xe7   : > { %1078 = vperm.xlu1 %9448, %v860_v11   ;;  %4773 = vmatpush1.bf16.xpose.msra.mxu0 %v9706_v58  ;;  %v9721_v11 = vld [vmem:[%s13601_s1 + $0x7a8] ss:$28 sps:$4 sm:$0xff]   ;;  %v9773_v58 = vld [vmem:[%s10313_s17 + $0x18] ss:$28 sps:$4 sm:$0xff]  }
  0xe8   : > { %9427 = vmatprep.subr.msk.bf16.mxu1 %vm3651_vm0, %v9773_v58 }
  0xea   : > { %993 = vperm.xlu0 %9447, %v843_v13   ;;  %v892_v13 = vld [vmem:[%s13602_s2 + $0x1d8] sm:$0xff] }
  0xed   : > { %4360 = vmatmul.mubr.bf16.gmra.mrb[12].mxu0 %v9556_v14  ;;  %v844_v14 = vld [vmem:[%s13602_s2 + $0x58] sm:$0xff] }
  0xee   : > { %4367 = vmatprep.mubr.bf16.mxu0 %v9557_v15  ;;  %v9583_v15 = vld [vmem:[%s13601_s1 + $0x2a8] ss:$28 sps:$4 sm:$0xff]   ;;  %998 = vperm.xlu1 %9448, %v844_v14  }
  0xef   : > { %1083 = vperm.xlu0 %9447, %v861_v18   ;;  %v9724_v14 = vld [vmem:[%s13601_s1 + $0x7e4] ss:$28 sps:$4 sm:$0xff]  }
  0xf0   : > { %v9626_v18 = vld [vmem:[%s13601_s1 + $0x4a4] ss:$28 sps:$4 sm:$0xff]  }
  0xf2   : > { %1088 = vperm.xlu1 %9448, %v862_v19   ;;  %v9727_v19 = vld [vmem:[%s13601_s1 + $0x7e0] ss:$28 sps:$4 sm:$0xff]  }
  0xf5   : > { %4368 = vmatmul.mubr.bf16.gmra.mrb[16].mxu0 %v9559_v20  ;;  %v9679_v20 = vld [vmem:[%s13601_s1 + $0x65c] ss:$28 sps:$4 sm:$0xff]  }
  0xf6   : > { %4375 = vmatprep.mubr.bf16.mxu0 %v9560_v21  ;;  %v845_v21 = vld [vmem:[%s13602_s2 + $0x60] sm:$0xff]  ;;  %4102 = vmatprep.mubr.bf16.mxu1 %v9679_v20 }
  0xf7   : > { %1003 = vperm.xlu0 %9447, %v845_v21   ;;  %1008 = vperm.xlu1 %9448, %v846_v22   ;;  %v893_v20 = vld [vmem:[%s13602_s2 + $0x1e0] sm:$0xff]  ;;  %v894_v21 = vld [vmem:[%s13602_s2 + $0x1e8] sm:$0xff]  ;;  %v9730_v22 = vld [vmem:[%s13601_s1 + $0x81c] ss:$28 sps:$4 sm:$0xff]  }
  0xfb   : > { %1093 = vperm.xlu0 %9447, %v863_v26   ;;  %1098 = vperm.xlu1 %9448, %v864_v27   ;;  %v9632_v26 = vld [vmem:[%s13601_s1 + $0x4dc] ss:$28 sps:$4 sm:$0xff]  }
  0xfc   : > { %v9733_v27 = vld [vmem:[%s13601_s1 + $0x818] ss:$28 sps:$4 sm:$0xff]  }
  0xfd   : > { %4376 = vmatmul.mubr.bf16.gmra.mrb[20].mxu0 %v9562_v24  ;;  %v9587_v24 = vld [vmem:[%s13601_s1 + $0x31c] ss:$28 sps:$4 sm:$0xff]  }
  0xfe   : > { %4383 = vmatprep.mubr.bf16.mxu0 %v9563_v25  ;;  %v9682_v25 = vld [vmem:[%s13601_s1 + $0x658] ss:$28 sps:$4 sm:$0xff]  }
  0xff   : > { %4103 = vmatmul.mubr.bf16.gmra.mrb[52].mxu1 %v9682_v25  ;;  %1013 = vperm.xlu0 %9447, %v847_v29   ;;  %v9630_v25 = vld [vmem:[%s13601_s1 + $0x4a0] ss:$28 sps:$4 sm:$0xff]  }
 0x100   : > { %v896_v29 = vld [vmem:[%s13602_s2 + $0x1f8] sm:$0xff] }
 0x103   : > { %1183 = vperm.xlu0 %9447, %v881_v34   ;;  %v9638_v34 = vld [vmem:[%s13601_s1 + $0x514] ss:$28 sps:$4 sm:$0xff]  }
 0x105   : > { %4384 = vmatmul.mubr.bf16.gmra.mrb[24].mxu0 %v9565_v28  ;;  %v9685_v28 = vld [vmem:[%s13601_s1 + $0x694] ss:$28 sps:$4 sm:$0xff]  }
 0x106   : > { %4391 = vmatprep.mubr.bf16.mxu0 %v9566_v30  ;;  %v848_v30 = vld [vmem:[%s13602_s2 + $0x78] sm:$0xff]  ;;  %4110 = vmatprep.mubr.bf16.mxu1 %v9685_v28  ;;  %v895_v28 = vld [vmem:[%s13602_s2 + $0x1f0] sm:$0xff] }
 0x107   : > { %1018 = vperm.xlu1 %9448, %v848_v30   ;;  %4111 = vmatmul.mubr.bf16.gmra.mrb[56].mxu1 %v9688_v33  ;;  %v9736_v30 = vld [vmem:[%s13601_s1 + $0x854] ss:$28 sps:$4 sm:$0xff]  }
 0x108   : > { %4118 = vmatprep.mubr.bf16.mxu1 %v9691_v36  ;;  %v9636_v33 = vld [vmem:[%s13601_s1 + $0x4d8] ss:$28 sps:$4 sm:$0xff]   ;;  %v9742_v36 = vld [vmem:[%s13601_s1 + $0x88c] ss:$28 sps:$4 sm:$0xff]  }
 0x10b   : > { %1188 = vperm.xlu1 %9448, %v882_v35   ;;  %v9739_v35 = vld [vmem:[%s13601_s1 + $0x850] ss:$28 sps:$4 sm:$0xff]  }
 0x10d   : > { %4392 = vmatmul.mubr.bf16.gmra.mrb[28].mxu0 %v9568_v37  ;;  %v865_v37 = vld [vmem:[%s13602_s2 + $0x100] sm:$0xff] }
 0x10e   : > { %4399 = vmatprep.mubr.bf16.mxu0 %v9569_v38  ;;  %v866_v38 = vld [vmem:[%s13602_s2 + $0x108] sm:$0xff]  ;;  %1103 = vperm.xlu0 %9447, %v865_v37  }
 0x10f   : > { %1108 = vperm.xlu1 %9448, %v866_v38   ;;  %4119 = vmatmul.mubr.bf16.gmra.mrb[60].mxu1 %v9694_v41  ;;  %v9642_v37 = vld [vmem:[%s13601_s1 + $0x510] ss:$28 sps:$4 sm:$0xff]   ;;  %v9748_v41 = vld [vmem:[%s10313_s17 + $0xbc] ss:$28 sps:$4 sm:$0xff]  }
 0x110   : > { %4126 = vmatprep.mubr.bf16.mxu1 %v9697_v44  ;;  %v9644_v38 = vld [vmem:[%s13601_s1 + $0x54c] ss:$28 sps:$4 sm:$0xff]   ;;  %4774 = vmatprep.subr.bf16.mxu0 %v9748_v41  ;;  %v9650_v44 = vld [vmem:[%s13601_s1 + $0x584] ss:$28 sps:$4 sm:$0xff]  }
 0x112   : > { %1193 = vperm.xlu0 %9447, %v883_v42   ;;  %v9751_v42 = vld [vmem:[%s13601_s1 + $0x8c4] ss:$28 sps:$4 sm:$0xff]  }
 0x113   : > { %1198 = vperm.xlu1 %9448, %v884_v43   ;;  %v9648_v43 = vld [vmem:[%s13601_s1 + $0x548] ss:$28 sps:$4 sm:$0xff]  }
 0x115   : > { %4400 = vmatmul.mubr.bf16.gmra.mrb[32].mxu0 %v9571_v45  ;;  %v867_v45 = vld [vmem:[%s13602_s2 + $0x110] sm:$0xff] }
 0x116   : > { %4407 = vmatprep.mubr.bf16.mxu0 %v9572_v46  ;;  %v868_v46 = vld [vmem:[%s13602_s2 + $0x118] sm:$0xff]  ;;  %1113 = vperm.xlu0 %9447, %v867_v45  }
 0x117   : > { %1118 = vperm.xlu1 %9448, %v868_v46   ;;  %4127 = vmatmul.mubr.bf16.gmra.mrb[64].mxu1 %v9700_v49  ;;  %v9754_v45 = vld [vmem:[%s13601_s1 + $0x8c0] ss:$28 sps:$4 sm:$0xff]   ;;  %v9760_v49 = vld [vmem:[%s13601_s1 + $0x8f8] ss:$28 sps:$4 sm:$0xff]  }
 0x118   : > { %4134 = vmatprep.mubr.bf16.mxu1 %v9703_v52  ;;  %v9757_v46 = vld [vmem:[%s13601_s1 + $0x8fc] ss:$28 sps:$4 sm:$0xff]   ;;  %v9665_v52 = vld [vmem:[%s13601_s1 + $0x5f4] ss:$28 sps:$4 sm:$0xff]  }
 0x11a   : > { %1203 = vperm.xlu0 %9447, %v885_v50   ;;  %v9763_v50 = vld [vmem:[%s13601_s1 + $0x934] ss:$28 sps:$4 sm:$0xff]  }
 0x11b   : > { %1208 = vperm.xlu1 %9448, %v886_v51   ;;  %v9660_v51 = vld [vmem:[%s13601_s1 + $0x5b8] ss:$28 sps:$4 sm:$0xff]  }
 0x11d   : > { %4408 = vmatmul.mubr.bf16.gmra.mrb[36].mxu0 %v9574_v53  ;;  %v869_v53 = vld [vmem:[%s13602_s2 + $0x120] sm:$0xff] }
 0x11e   : > { %4415 = vmatprep.mubr.bf16.mxu0 %v9575_v54  ;;  %v870_v54 = vld [vmem:[%s13602_s2 + $0x128] sm:$0xff]  ;;  %1123 = vperm.xlu0 %9447, %v869_v53  }
 0x11f   : > { %1128 = vperm.xlu1 %9448, %v870_v54   ;;  %4135 = vmatmul.mubr.bf16.gmra.mrb[68].mxu1 %v9709_v57  ;;  %v9766_v53 = vld [vmem:[%s13601_s1 + $0x930] ss:$28 sps:$4 sm:$0xff]   ;;  %v9772_v57 = vld [vmem:[%s13601_s1 + $0x968] ss:$28 sps:$4 sm:$0xff]  }
 0x120   : > { %4142 = vmatprep.mubr.bf16.mxu1 %v9712_v63  ;;  %v9769_v54 = vld [vmem:[%s13601_s1 + $0x96c] ss:$28 sps:$4 sm:$0xff]   ;;  %v9779_v63 = vld [vmem:[%s13601_s1 + $0x9a0] ss:$28 sps:$4 sm:$0xff]  }
 0x122   : > { %1213 = vperm.xlu0 %9447, %v887_v60   ;;  %v3815_v60 = vsel %vm3651_vm0, %v9773_v58, 0  ;;  %v9818_v58 = vld [vmem:[%s13601_s1 + $0xaf4] ss:$28 sps:$4 sm:$0xff]  }
 0x123   : > { %8772 = vmatpush3.bf16.xpose.msra.mxu1 %v3815_v60  ;;  %v904_v60 = vld [vmem:[%s13602_s2 + $0x238] sm:$0xff] }
 0x125   : > { %4416 = vmatmul.mubr.bf16.gmra.mrb[40].mxu0 %v9577_v61  ;;  %v888_v61 = vld [vmem:[%s13602_s2 + $0x1b8] sm:$0xff] }
 0x126   : > { %4423 = vmatprep.mubr.bf16.mxu0 %v9578_v62  ;;  %1218 = vperm.xlu1 %9448, %v888_v61   ;;  %v871_v62 = vld [vmem:[%s13602_s2 + $0x130] sm:$0xff]  ;;  %v9675_v61 = vld [vmem:[%s13601_s1 + $0x628] ss:$28 sps:$4 sm:$0xff]  }
 0x127   : > { %1133 = vperm.xlu0 %9447, %v871_v62   ;;  %4143 = vmatmul.mubr.bf16.gmra.mrb[72].mxu1 %v9715_v3  ;;  %v9677_v62 = vld [vmem:[%s13601_s1 + $0x664] ss:$28 sps:$4 sm:$0xff]   ;;  %v9785_v3 = vld [vmem:[%s13601_s1 + $0x9d8] ss:$28 sps:$4 sm:$0xff]  }
 0x128   : > { %4150 = vmatprep.mubr.bf16.mxu1 %v9718_v6  ;;  %v9689_v6 = vld [vmem:[%s13601_s1 + $0x6d4] ss:$28 sps:$4 sm:$0xff]  }
 0x12a   : > { %1138 = vperm.xlu1 %9448, %v872_v0   ;;  %v9782_v0 = vld [vmem:[%s13601_s1 + $0x9dc] ss:$28 sps:$4 sm:$0xff]  }
 0x12b   : > { %1223 = vperm.xlu0 %9447, %v889_v4   ;;  %v9788_v4 = vld [vmem:[%s13601_s1 + $0xa14] ss:$28 sps:$4 sm:$0xff]  }
 0x12d   : > { %4424 = vmatmul.mubr.bf16.gmra.mrb[44].mxu0 %v9580_v7  ;;  %v873_v7 = vld [vmem:[%s13602_s2 + $0x140] sm:$0xff] }
 0x12e   : > { %4431 = vmatprep.mubr.bf16.mxu0 %v9581_v8  ;;  %1228 = vperm.xlu1 %9448, %v890_v5   ;;  %v874_v8 = vld [vmem:[%s13602_s2 + $0x148] sm:$0xff]  ;;  %v9687_v5 = vld [vmem:[%s13601_s1 + $0x698] ss:$28 sps:$4 sm:$0xff]  }
 0x12f   : > { %1143 = vperm.xlu0 %9447, %v873_v7   ;;  %4151 = vmatmul.mubr.bf16.gmra.mrb[76].mxu1 %v9721_v11  ;;  %v9791_v7 = vld [vmem:[%s13601_s1 + $0xa10] ss:$28 sps:$4 sm:$0xff]  }
 0x130   : > { %4158 = vmatprep.mubr.bf16.mxu1 %v9724_v14  ;;  %v9792_v11 = vld [vmem:[%s10313_s17 + $0xf0] ss:$28 sps:$4 sm:$0xff]  }
 0x132   : > { %1148 = vperm.xlu1 %9448, %v874_v8   ;;  %v913_v8 = vld [vmem:[%s13602_s2 + $0x280] sm:$0xff] }
 0x133   : > { %1233 = vperm.xlu0 %9447, %v891_v12  }
 0x135   : > { %4432 = vmatmul.mubr.bf16.gmra.mrb[48].mxu0 %v9583_v15  ;;  %v875_v15 = vld [vmem:[%s13602_s2 + $0x150] sm:$0xff] }
 0x136   : > { %4439 = vmatprep.mubr.bf16.mxu0 %v9584_v16  ;;  %1238 = vperm.xlu1 %9448, %v892_v13   ;;  %v876_v16 = vld [vmem:[%s13602_s2 + $0x158] sm:$0xff]  ;;  %v9794_v13 = vld [vmem:[%s10313_s17 + $0xf4] ss:$28 sps:$4 sm:$0xff]  }
 0x137   : > { %1153 = vperm.xlu0 %9447, %v875_v15   ;;  %4159 = vmatmul.mubr.bf16.gmra.mrb[80].mxu1 %v9727_v19  ;;  %v897_v15 = vld [vmem:[%s13602_s2 + $0x200] sm:$0xff]  ;;  %v9693_v19 = vld [vmem:[%s13601_s1 + $0x6d0] ss:$28 sps:$4 sm:$0xff]  }
 0x138   : > { %4166 = vmatprep.mubr.bf16.mxu1 %v9730_v22  ;;  %v9801_v22 = vld [vmem:[%s10313_s17 + $0x50] ss:$28 sps:$4 sm:$0xff]  }
 0x139   : > { %9428 = vmatprep.subr.msk.bf16.mxu1 %vm3651_vm0, %v9801_v22 }
 0x13a   : > { %1158 = vperm.xlu1 %9448, %v876_v16   ;;  %v9797_v16 = vld [vmem:[%s13601_s1 + $0xa4c] ss:$28 sps:$4 sm:$0xff]  }
 0x13b   : > { %1243 = vperm.xlu0 %9447, %v893_v20   ;;  %v9695_v20 = vld [vmem:[%s13601_s1 + $0x70c] ss:$28 sps:$4 sm:$0xff]  }
 0x13d   : > { %4440 = vmatmul.mubr.bf16.gmra.mrb[52].mxu0 %v9586_v23  ;;  %v877_v23 = vld [vmem:[%s13602_s2 + $0x160] sm:$0xff] }
 0x13e   : > { %4447 = vmatprep.mubr.bf16.mxu0 %v9587_v24  ;;  %1248 = vperm.xlu1 %9448, %v894_v21   ;;  %v878_v24 = vld [vmem:[%s13602_s2 + $0x168] sm:$0xff] }
 0x13f   : > { %1163 = vperm.xlu0 %9447, %v877_v23   ;;  %4167 = vmatmul.mubr.bf16.gmra.mrb[84].mxu1 %v9733_v27  ;;  %v9800_v21 = vld [vmem:[%s13601_s1 + $0xa48] ss:$28 sps:$4 sm:$0xff]   ;;  %v915_v23 = vld [vmem:[%s13602_s2 + $0x290] sm:$0xff]  ;;  %v3818_v27 = vsel %vm3651_vm0, %v9801_v22, 0 }
 0x140   : > { %4174 = vmatprep.mubr.bf16.mxu1 %v9736_v30  ;;  %v9804_v30 = vld [vmem:[%s13601_s1 + $0xa84] ss:$28 sps:$4 sm:$0xff]   ;;  %8774 = vmatpush3.bf16.xpose.msra.mxu1 %v3818_v27 }
 0x141   : > { %v9835_v27 = vld [vmem:[%s13601_s1 + $0xb64] ss:$28 sps:$4 sm:$0xff]  }
 0x142   : > { %1168 = vperm.xlu1 %9448, %v878_v24   ;;  %v916_v24 = vld [vmem:[%s13602_s2 + $0x298] sm:$0xff] }
 0x143   : > { %1253 = vperm.xlu0 %9447, %v895_v28  }
 0x145   : > { %4448 = vmatmul.mubr.bf16.gmra.mrb[56].mxu0 %v9589_v31  ;;  %v879_v31 = vld [vmem:[%s13602_s2 + $0x170] sm:$0xff] }
 0x146   : > { %4455 = vmatprep.mubr.bf16.mxu0 %v9590_v32  ;;  %1258 = vperm.xlu1 %9448, %v896_v29   ;;  %v880_v32 = vld [vmem:[%s13602_s2 + $0x178] sm:$0xff]  ;;  %v899_v29 = vld [vmem:[%s13602_s2 + $0x210] sm:$0xff] }
 0x147   : > { %1173 = vperm.xlu0 %9447, %v879_v31   ;;  %4175 = vmatmul.mubr.bf16.gmra.mrb[88].mxu1 %v9739_v35  ;;  %v9807_v35 = vld [vmem:[%s13601_s1 + $0xa80] ss:$28 sps:$4 sm:$0xff]  }
 0x148   : > { %4182 = vmatprep.mubr.bf16.mxu1 %v9742_v36  ;;  %v9808_v36 = vld [vmem:[%s10313_s17 + $0x88] ss:$28 sps:$4 sm:$0xff]  }
 0x149   : > { %v3821_v41 = vsel %vm3651_vm0, %v9808_v36, 0  ;;  %9429 = vmatprep.subr.msk.bf16.mxu1 %vm3651_vm0, %v9808_v36  ;;  %v9842_v36 = vld [vmem:[%s10313_s17 + $0x168] ss:$28 sps:$4 sm:$0xff]  }
 0x14a   : > { %1178 = vperm.xlu1 %9448, %v880_v32   ;;  %v900_v32 = vld [vmem:[%s13602_s2 + $0x218] sm:$0xff]  ;;  %8776 = vmatpush3.bf16.xpose.msra.mxu1 %v3821_v41 }
 0x14b   : > { %1343 = vperm.xlu0 %9447, %v913_v8   ;;  %v9825_v8 = vld [vmem:[%s13601_s1 + $0xb2c] ss:$28 sps:$4 sm:$0xff]  }
 0x14d   : > { %4456 = vmatmul.mubr.bf16.gmra.mrb[60].mxu0 %v9592_v39  ;;  %v9745_v39 = vld [vmem:[%s13601_s1 + $0x888] ss:$28 sps:$4 sm:$0xff]  }
 0x14e   : > { %4463 = vmatprep.mubr.bf16.mxu0 %v9593_v40  ;;  %v9746_v40 = vld [vmem:[%s10313_s17 + $0xb8] ss:$28 sps:$4 sm:$0xff]  }
 0x14f   : > { %4183 = vmatmul.mubr.bf16.gmra.mrb[92].mxu1 %v9745_v39  ;;  %4775 = vmatpush1.bf16.xpose.msra.mxu0 %v9746_v40 }
 0x150   : > { %4190 = vmatprep.mubr.bf16.mxu1 %v9751_v42  ;;  %4776 = vmatprep.subr.bf16.mxu0 %v9794_v13  ;;  %v9722_v13 = vld [vmem:[%s13601_s1 + $0x7ec] ss:$28 sps:$4 sm:$0xff]  }
 0x151   : > { %1263 = vperm.xlu0 %9447, %v897_v15   ;;  %v9830_v15 = vld [vmem:[%s10313_s17 + $0x12c] ss:$28 sps:$4 sm:$0xff]  }
 0x155   : > { %4464 = vmatmul.mubr.bf16.gmra.mrb[64].mxu0 %v9598_v47  ;;  %v9654_v47 = vld [vmem:[%s13601_s1 + $0x580] ss:$28 sps:$4 sm:$0xff]   ;;  %1353 = vperm.xlu0 %9447, %v915_v23  }
 0x156   : > { %4471 = vmatprep.mubr.bf16.mxu0 %v9599_v48  ;;  %v9656_v48 = vld [vmem:[%s13601_s1 + $0x5bc] ss:$28 sps:$4 sm:$0xff]  }
 0x157   : > { %4191 = vmatmul.mubr.bf16.gmra.mrb[96].mxu1 %v9754_v45  ;;  %4777 = vmatpush1.bf16.xpose.msra.mxu0 %v9792_v11  ;;  %v906_v11 = vld [vmem:[%s13602_s2 + $0x248] sm:$0xff] }
 0x158   : > { %4198 = vmatprep.mubr.bf16.mxu1 %v9757_v46  ;;  %v902_v46 = vld [vmem:[%s13602_s2 + $0x228] sm:$0xff]  ;;  %4778 = vmatprep.subr.bf16.mxu0 %v9830_v15 }
 0x159   : > { %1273 = vperm.xlu0 %9447, %v899_v29   ;;  %v9749_v15 = vld [vmem:[%s13601_s1 + $0x8cc] ss:$28 sps:$4 sm:$0xff]  }
 0x15d   : > { %4472 = vmatmul.mubr.bf16.gmra.mrb[68].mxu0 %v9603_v55  ;;  %v9669_v55 = vld [vmem:[%s13601_s1 + $0x5f0] ss:$28 sps:$4 sm:$0xff]  }
 0x15e   : > { %4479 = vmatprep.mubr.bf16.mxu0 %v9605_v56  ;;  %v9671_v56 = vld [vmem:[%s13601_s1 + $0x62c] ss:$28 sps:$4 sm:$0xff]  }
 0x15f   : > { %4199 = vmatmul.mubr.bf16.gmra.mrb[100].mxu1 %v9760_v49  ;;  %v9814_v49 = vld [vmem:[%s13601_s1 + $0xab8] ss:$28 sps:$4 sm:$0xff]  }
 0x160   : > { %4206 = vmatprep.mubr.bf16.mxu1 %v9763_v50  ;;  %v9815_v50 = vld [vmem:[%s10313_s17 + $0xc0] ss:$28 sps:$4 sm:$0xff]  }
 0x161   : > { %9430 = vmatprep.subr.msk.bf16.mxu1 %vm3651_vm0, %v9815_v50 }
 0x165   : > { %4480 = vmatmul.mubr.bf16.gmra.mrb[72].mxu0 %v9609_v1  ;;  %v9681_v1 = vld [vmem:[%s13601_s1 + $0x660] ss:$28 sps:$4 sm:$0xff]  }
 0x166   : > { %4487 = vmatprep.mubr.bf16.mxu0 %v9611_v2  ;;  %v9683_v2 = vld [vmem:[%s13601_s1 + $0x69c] ss:$28 sps:$4 sm:$0xff]  }
 0x167   : > { %4207 = vmatmul.mubr.bf16.gmra.mrb[104].mxu1 %v9766_v53 }
 0x168   : > { %4214 = vmatprep.mubr.bf16.mxu1 %v9769_v54 }
 0x16d   : > { %4488 = vmatmul.mubr.bf16.gmra.mrb[76].mxu0 %v9615_v9  ;;  %v914_v9 = vld [vmem:[%s13602_s2 + $0x288] sm:$0xff] }
 0x16e   : > { %4495 = vmatprep.mubr.bf16.mxu0 %v9620_v10  ;;  %v11024_v10 = vpop.f32.mrb[0].mxu1  ;;  %1348 = vperm.xlu1 %9448, %v914_v9  }
 0x16f   : > { %4215 = vmatmul.mubr.bf16.gmra.mrb[108].mxu1 %v9772_v57  ;;  %13610 = vst [vmem:[#allocation2_spill] sm:$0xff] %v11024_v10  ;;  %v4002_v12 = vpop.f32.mrb[1].mxu1  ;;  %v903_v57 = vld [vmem:[%s13602_s2 + $0x230] sm:$0xff]  ;;  %v9946_v10 = vld [vmem:[%s13601_s1 + $0x51c] ss:$28 sps:$4 sm:$0xff]  }
 0x170   : > { %4222 = vmatprep.mubr.bf16.mxu1 %v9776_v59  ;;  %v11028_v14 = vpop.f32.mrb[2].mxu1  ;;  %v9720_v12 = vld [vmem:[%s13601_s1 + $0x7b0] ss:$28 sps:$4 sm:$0xff]  }
 0x171   : > { %13611 = vst [vmem:[#allocation3_spill] sm:$0xff] %v11028_v14 }
 0x175   : > { %4496 = vmatmul.mubr.bf16.gmra.mrb[80].mxu0 %v9624_v17  ;;  %v4005_v17 = vpop.f32.mrb[3].mxu1 }
 0x176   : > { %4503 = vmatprep.mubr.bf16.mxu0 %v9626_v18  ;;  %v898_v18 = vld [vmem:[%s13602_s2 + $0x208] sm:$0xff] }
 0x177   : > { %4223 = vmatmul.mubr.bf16.gmra.mrb[112].mxu1 %v9779_v63  ;;  %1268 = vperm.xlu1 %9448, %v898_v18   ;;  %v9821_v63 = vld [vmem:[%s13601_s1 + $0xaf0] ss:$28 sps:$4 sm:$0xff]   ;;  %v9831_v17 = vld [vmem:[%s13601_s1 + $0xb28] ss:$28 sps:$4 sm:$0xff]  }
 0x178   : > { %4230 = vmatprep.mubr.bf16.mxu1 %v9782_v0  ;;  %v9822_v0 = vld [vmem:[%s10313_s17 + $0xf8] ss:$28 sps:$4 sm:$0xff]   ;;  %v9832_v18 = vld [vmem:[%s10313_s17 + $0x130] ss:$28 sps:$4 sm:$0xff]  }
 0x179   : > { %v3830_v23 = vsel %vm3651_vm0, %v9832_v18, 0 }
 0x17b   : > { %1358 = vperm.xlu1 %9448, %v916_v24  }
 0x17d   : > { %4504 = vmatmul.mubr.bf16.gmra.mrb[84].mxu0 %v9630_v25  ;;  %v11055_v25 = vpop.f32.mrb[4].mxu1 }
 0x17e   : > { %4511 = vmatprep.mubr.bf16.mxu0 %v9632_v26  ;;  %13612 = vst [vmem:[#allocation4_spill] sm:$0xff] %v11055_v25  ;;  %v4010_v26 = vpop.f32.mrb[5].mxu1  ;;  %v9938_v25 = vld [vmem:[%s13601_s1 + $0x4ac] ss:$28 sps:$4 sm:$0xff]  }
 0x17f   : > { %4231 = vmatmul.mubr.bf16.gmra.mrb[116].mxu1 %v9785_v3  ;;  %v11059_v28 = vpop.f32.mrb[6].mxu1  ;;  %1278 = vperm.xlu1 %9448, %v900_v32   ;;  %v907_v26 = vld [vmem:[%s13602_s2 + $0x250] sm:$0xff]  ;;  %v9728_v32 = vld [vmem:[%s13601_s1 + $0x824] ss:$28 sps:$4 sm:$0xff]  }
 0x180   : > { %4238 = vmatprep.mubr.bf16.mxu1 %v9788_v4  ;;  %13613 = vst [vmem:[#allocation5_spill] sm:$0xff] %v11059_v28  ;;  %v4013_v31 = vpop.f32.mrb[7].mxu1 }
 0x181   : > { %v11086_v39 = vpop.f32.mrb[8].mxu1  ;;  %v9726_v31 = vld [vmem:[%s13601_s1 + $0x7e8] ss:$28 sps:$4 sm:$0xff]  }
 0x182   : > { %13614 = vst [vmem:[#allocation6_spill] sm:$0xff] %v11086_v39  ;;  %v4018_v40 = vpop.f32.mrb[9].mxu1  ;;  %v9999_v39 = vld [vmem:[%s13601_s1 + $0x868] ss:$28 sps:$4 sm:$0xff]  }
 0x183   : > { %v11090_v42 = vpop.f32.mrb[10].mxu1 }
 0x184   : > { %13615 = vst [vmem:[#allocation7_spill] sm:$0xff] %v11090_v42  ;;  %v4021_v45 = vpop.f32.mrb[11].mxu1 }
 0x185   : > { %4512 = vmatmul.mubr.bf16.gmra.mrb[88].mxu0 %v9636_v33  ;;  %v9699_v33 = vld [vmem:[%s13601_s1 + $0x708] ss:$28 sps:$4 sm:$0xff]   ;;  %v11117_v53 = vpop.f32.mrb[12].mxu1 }
 0x186   : > { %4519 = vmatprep.mubr.bf16.mxu0 %v9638_v34  ;;  %v9701_v34 = vld [vmem:[%s13601_s1 + $0x744] ss:$28 sps:$4 sm:$0xff]   ;;  %13616 = vst [vmem:[#allocation8_spill] sm:$0xff] %v11117_v53  ;;  %v4026_v54 = vpop.f32.mrb[13].mxu1 }
 0x187   : > { %4239 = vmatmul.mubr.bf16.gmra.mrb[120].mxu1 %v9791_v7  ;;  %v905_v7 = vld [vmem:[%s13602_s2 + $0x240] sm:$0xff]  ;;  %v9851_v54 = vld [vmem:[%s13601_s1 + $0xb98] ss:$28 sps:$4 sm:$0xff]  }
 0x188   : > { %4246 = vmatprep.mubr.bf16.mxu1 %v9797_v16  ;;  %v9828_v16 = vld [vmem:[%s10313_s17 + $0x128] ss:$28 sps:$4 sm:$0xff]  }
 0x189   : > { %4779 = vmatpush1.bf16.xpose.msra.mxu0 %v9828_v16  ;;  %v909_v45 = vld [vmem:[%s13602_s2 + $0x260] sm:$0xff]  ;;  %v11283_v16 = vpop.permute.xlu0 %1023 }
 0x18a   : > { %v9989_v53 = vld [vmem:[%s13601_s1 + $0x788] ss:$28 sps:$4 sm:$0xff]  }
 0x18d   : > { %4520 = vmatmul.mubr.bf16.gmra.mrb[92].mxu0 %v9642_v37  ;;  %v917_v37 = vld [vmem:[%s13602_s2 + $0x2a0] sm:$0xff] }
 0x18e   : > { %4527 = vmatprep.mubr.bf16.mxu0 %v9644_v38  ;;  %v918_v38 = vld [vmem:[%s13602_s2 + $0x2a8] sm:$0xff]  ;;  %1363 = vperm.xlu0 %9447, %v917_v37   ;;  %v925_v37 = vld [vmem:[%s13602_s2 + $0x2e0] sm:$0xff] }
 0x18f   : > { %4247 = vmatmul.mubr.bf16.gmra.mrb[124].mxu1 %v9800_v21  ;;  %1368 = vperm.xlu1 %9448, %v918_v38   ;;  %v926_v38 = vld [vmem:[%s13602_s2 + $0x2e8] sm:$0xff] }
 0x190   : > { %4254 = vmatprep.mubr.bf16.mxu1 %v9804_v30  ;;  %v908_v30 = vld [vmem:[%s13602_s2 + $0x258] sm:$0xff] }
 0x193   : > { %1288 = vperm.xlu1 %9448, %v902_v46   ;;  %v9845_v46 = vld [vmem:[%s13601_s1 + $0xb9c] ss:$28 sps:$4 sm:$0xff]  }
 0x195   : > { %4528 = vmatmul.mubr.bf16.gmra.mrb[96].mxu0 %v9648_v43  ;;  %v901_v43 = vld [vmem:[%s13602_s2 + $0x220] sm:$0xff] }
 0x196   : > { %4535 = vmatprep.mubr.bf16.mxu0 %v9650_v44  ;;  %v9811_v44 = vld [vmem:[%s13601_s1 + $0xabc] ss:$28 sps:$4 sm:$0xff]   ;;  %1283 = vperm.xlu0 %9447, %v901_v43   ;;  %v3833_v43 = vsel %vm3651_vm0, %v9842_v36, 0 }
 0x197   : > { %4255 = vmatmul.mubr.bf16.gmra.mrb[128].mxu1 %v9807_v35  ;;  %v9841_v35 = vld [vmem:[%s13601_s1 + $0xb60] ss:$28 sps:$4 sm:$0xff]  }
 0x198   : > { %4262 = vmatprep.mubr.bf16.mxu1 %v9811_v44 }
 0x19d   : > { %4536 = vmatmul.mubr.bf16.gmra.mrb[100].mxu0 %v9654_v47  ;;  %v9705_v47 = vld [vmem:[%s13601_s1 + $0x740] ss:$28 sps:$4 sm:$0xff]  }
 0x19e   : > { %4543 = vmatprep.mubr.bf16.mxu0 %v9656_v48  ;;  %v9710_v48 = vld [vmem:[%s13601_s1 + $0x77c] ss:$28 sps:$4 sm:$0xff]  }
 0x19f   : > { %4263 = vmatmul.mubr.bf16.gmra.mrb[132].mxu1 %v9814_v49  ;;  %v9732_v49 = vld [vmem:[%s13601_s1 + $0x820] ss:$28 sps:$4 sm:$0xff]  }
 0x1a0   : > { %4270 = vmatprep.mubr.bf16.mxu1 %v9818_v58  ;;  %v928_v58 = vld [vmem:[%s13602_s2 + $0x2f8] sm:$0xff] }
 0x1a5   : > { %4544 = vmatmul.mubr.bf16.gmra.mrb[104].mxu0 %v9660_v51  ;;  %v919_v51 = vld [vmem:[%s13602_s2 + $0x2b0] sm:$0xff] }
 0x1a6   : > { %4551 = vmatprep.mubr.bf16.mxu0 %v9665_v52  ;;  %v920_v52 = vld [vmem:[%s13602_s2 + $0x2b8] sm:$0xff]  ;;  %1373 = vperm.xlu0 %9447, %v919_v51  }
 0x1a7   : > { %1378 = vperm.xlu1 %9448, %v920_v52   ;;  %4271 = vmatmul.mubr.bf16.gmra.mrb[136].mxu1 %v9821_v63  ;;  %v9850_v51 = vld [vmem:[%s10313_s17 + $0x19c] ss:$28 sps:$4 sm:$0xff]   ;;  %v911_v63 = vld [vmem:[%s13602_s2 + $0x270] sm:$0xff] }
 0x1a8   : > { %4278 = vmatprep.mubr.bf16.mxu1 %v9825_v8  ;;  %v9848_v52 = vld [vmem:[%s10313_s17 + $0x198] ss:$28 sps:$4 sm:$0xff]  }
 0x1aa   : > { %1293 = vperm.xlu0 %9447, %v903_v57   ;;  %v927_v57 = vld [vmem:[%s13602_s2 + $0x2f0] sm:$0xff] }
 0x1ab   : > { %1298 = vperm.xlu1 %9448, %v904_v60  }
 0x1ad   : > { %4552 = vmatmul.mubr.bf16.gmra.mrb[108].mxu0 %v9669_v55  ;;  %v3824_v55 = vsel %vm3651_vm0, %v9815_v50, 0  ;;  %v9734_v50 = vld [vmem:[%s13601_s1 + $0x85c] ss:$28 sps:$4 sm:$0xff]  }
 0x1ae   : > { %4559 = vmatprep.mubr.bf16.mxu0 %v9671_v56  ;;  %v11121_v56 = vpop.f32.mrb[14].mxu1  ;;  %8778 = vmatpush3.bf16.xpose.msra.mxu1 %v3824_v55  ;;  %v9852_v55 = vld [vmem:[%s10313_s17 + $0x1a0] ss:$28 sps:$4 sm:$0xff]  }
 0x1af   : > { %13617 = vst [vmem:[#allocation9_spill] sm:$0xff] %v11121_v56  ;;  %v4029_v59 = vpop.f32.mrb[15].mxu1  ;;  %9431 = vmatprep.subr.msk.bf16.mxu1 %vm3651_vm0, %v9822_v0  ;;  %4279 = vmatmul.mubr.bf16.gmra.mrb[140].mxu1 %v9831_v17  ;;  %v9985_v56 = vld [vmem:[%s13601_s1 + $0x750] ss:$28 sps:$4 sm:$0xff]  }
 0x1b0   : > { %v11148_v3 = vpop.f32.mrb[16].mxu1  ;;  %4286 = vmatprep.mubr.bf16.mxu1 %v9835_v27  ;;  %v11297_v27 = vpop.permute.xlu0 %1028 }
 0x1b1   : > { %13618 = vst [vmem:[#allocation10_spill] sm:$0xff] %v11148_v3  ;;  %v4034_v4 = vpop.f32.mrb[17].mxu1 }
 0x1b2   : > { %v9740_v4 = vld [vmem:[%s13601_s1 + $0x894] ss:$28 sps:$4 sm:$0xff]  }
 0x1b5   : > { %4560 = vmatmul.mubr.bf16.gmra.mrb[112].mxu0 %v9675_v61  ;;  %v9714_v61 = vld [vmem:[%s13601_s1 + $0x778] ss:$28 sps:$4 sm:$0xff]  }
 0x1b6   : > { %4567 = vmatprep.mubr.bf16.mxu0 %v9677_v62  ;;  %v9716_v62 = vld [vmem:[%s13601_s1 + $0x7b4] ss:$28 sps:$4 sm:$0xff]  }
 0x1b7   : > { %4287 = vmatmul.mubr.bf16.gmra.mrb[144].mxu1 %v9841_v35 }
 0x1b8   : > { %4294 = vmatprep.mubr.bf16.mxu1 %v9845_v46 }
 0x1bd   : > { %4568 = vmatmul.mubr.bf16.gmra.mrb[116].mxu0 %v9681_v1  ;;  %v921_v1 = vld [vmem:[%s13602_s2 + $0x2c0] sm:$0xff] }
 0x1be   : > { %4575 = vmatprep.mubr.bf16.mxu0 %v9683_v2  ;;  %v922_v2 = vld [vmem:[%s13602_s2 + $0x2c8] sm:$0xff]  ;;  %1383 = vperm.xlu0 %9447, %v921_v1   ;;  %v912_v1 = vld [vmem:[%s13602_s2 + $0x278] sm:$0xff] }
 0x1bf   : > { %1388 = vperm.xlu1 %9448, %v922_v2   ;;  %4295 = vmatmul.mubr.bf16.gmra.mrb[148].mxu1 %v9851_v54  ;;  %v9738_v2 = vld [vmem:[%s13601_s1 + $0x858] ss:$28 sps:$4 sm:$0xff]   ;;  %v9873_v54 = vld [vmem:[%s13601_s1 + $0x130] ss:$28 sps:$4 sm:$0xff]  }
 0x1c2   : > { %1303 = vperm.xlu0 %9447, %v905_v7   ;;  %v9857_v7 = vld [vmem:[%s13601_s1 + $0x50] ss:$28 sps:$4 sm:$0xff]  }
 0x1c3   : > { %1308 = vperm.xlu1 %9448, %v906_v11  }
 0x1c5   : > { %4576 = vmatmul.mubr.bf16.gmra.mrb[120].mxu0 %v9687_v5  ;;  %v3827_v5 = vsel %vm3651_vm0, %v9822_v0, 0 }
 0x1c6   : > { %4583 = vmatprep.mubr.bf16.mxu0 %v9689_v6  ;;  %v11152_v6 = vpop.f32.mrb[18].mxu1  ;;  %8780 = vmatpush3.bf16.xpose.msra.mxu1 %v3827_v5  ;;  %v9856_v5 = vld [vmem:[%s13601_s1 + $0x18] ss:$28 sps:$4 sm:$0xff]  }
 0x1c7   : > { %13619 = vst [vmem:[#allocation11_spill] sm:$0xff] %v11152_v6  ;;  %v4037_v9 = vpop.f32.mrb[19].mxu1  ;;  %9432 = vmatprep.subr.msk.bf16.mxu1 %vm3651_vm0, %v9832_v18  ;;  %8787 = vmatprep.mubr.msk.bf16.mxu1 %vm3651_vm0, %v9856_v5 }
 0x1c8   : > { %v11181_v21 = vpop.f32.mrb[20].mxu1 }
 0x1c9   : > { %13620 = vst [vmem:[#allocation12_spill] sm:$0xff] %v11181_v21  ;;  %v4042_v22 = vpop.f32.mrb[21].mxu1  ;;  %v9917_v21 = vld [vmem:[%s13601_s1 + $0x394] ss:$28 sps:$4 sm:$0xff]  }
 0x1ca   : > { %v11184_v24 = vpop.f32.mrb[22].mxu1  ;;  %v9753_v22 = vld [vmem:[%s13601_s1 + $0x8c8] ss:$28 sps:$4 sm:$0xff]  }
 0x1cb   : > { %13621 = vst [vmem:[#allocation13_spill] sm:$0xff] %v11184_v24  ;;  %v4045_v29 = vpop.f32.mrb[23].mxu1  ;;  %v9977_v24 = vld [vmem:[%s13601_s1 + $0x6e0] ss:$28 sps:$4 sm:$0xff]  }
 0x1cc   : > { %v11214_v40 = vpop.f32.mrb[24].mxu1  ;;  %v9864_v29 = vld [vmem:[%s13601_s1 + $0x88] ss:$28 sps:$4 sm:$0xff]  }
 0x1cd   : > { %4584 = vmatmul.mubr.bf16.gmra.mrb[124].mxu0 %v9693_v19  ;;  %v923_v19 = vld [vmem:[%s13602_s2 + $0x2d0] sm:$0xff]  ;;  %13622 = vst [vmem:[#allocation14_spill] sm:$0xff] %v11214_v40  ;;  %v4050_v41 = vpop.f32.mrb[25].mxu1 }
 0x1ce   : > { %4591 = vmatprep.mubr.bf16.mxu0 %v9695_v20  ;;  %v924_v20 = vld [vmem:[%s13602_s2 + $0x2d8] sm:$0xff]  ;;  %1393 = vperm.xlu0 %9447, %v923_v19   ;;  %v11217_v44 = vpop.f32.mrb[26].mxu1 }
 0x1cf   : > { %1398 = vperm.xlu1 %9448, %v924_v20   ;;  %8782 = vmatpush3.bf16.xpose.msra.mxu1 %v3830_v23  ;;  %13623 = vst [vmem:[#allocation15_spill] sm:$0xff] %v11217_v44  ;;  %v11292_v23 = vpop.permute.xlu1 %943 }
 0x1d0   : > { %9433 = vmatprep.subr.msk.bf16.mxu1 %vm3651_vm0, %v9842_v36  ;;  %v11313_v36 = vpop.permute.xlu0 %1033 }
 0x1d2   : > { %1313 = vperm.xlu0 %9447, %v907_v26   ;;  %v9755_v26 = vld [vmem:[%s13601_s1 + $0x904] ss:$28 sps:$4 sm:$0xff]  }
 0x1d3   : > { %1318 = vperm.xlu1 %9448, %v908_v30   ;;  %v9865_v30 = vld [vmem:[%s13601_s1 + $0xc0] ss:$28 sps:$4 sm:$0xff]  }
 0x1d4   : > { %v11325_v46 = vpop.permute.xlu0 %953 }
 0x1d5   : > { %4592 = vmatmul.mubr.bf16.gmra.mrb[128].mxu0 %v9699_v33  ;;  %v9840_v33 = vld [vmem:[%s10313_s17 + $0x164] ss:$28 sps:$4 sm:$0xff]  }
 0x1d6   : > { %4599 = vmatprep.mubr.bf16.mxu0 %v9701_v34  ;;  %v9838_v34 = vld [vmem:[%s10313_s17 + $0x160] ss:$28 sps:$4 sm:$0xff]   ;;  %4780 = vmatprep.subr.bf16.mxu0 %v9840_v33  ;;  %s7696_s17 = sshll.u32 %s13875_s10, 3 }
 0x1d7   : > { %1403 = vperm.xlu0 %9447, %v925_v37   ;;  %1408 = vperm.xlu1 %9448, %v926_v38   ;;  %v9759_v37 = vld [vmem:[%s13601_s1 + $0x900] ss:$28 sps:$4 sm:$0xff]   ;;  %s335_s18 = scalar_lea.vmem %s13609_s9, %s7696_s17 }
 0x1d8   : > { %4781 = vmatpush1.bf16.xpose.msra.mxu0 %v9838_v34  ;;  %8784 = vmatpush3.bf16.xpose.msra.mxu1 %v3833_v43  ;;  %v11311_v34 = vpop.permute.xlu1 %948  ;;  %v9761_v38 = vld [vmem:[%s13601_s1 + $0x93c] ss:$28 sps:$4 sm:$0xff]  }
 0x1d9   : > { %4782 = vmatprep.subr.bf16.mxu0 %v9850_v51  ;;  %9434 = vmatprep.subr.msk.bf16.mxu1 %vm3651_vm0, %v9852_v55  ;;  %v9872_v51 = vld [vmem:[%s13601_s1 + $0xf8] ss:$28 sps:$4 sm:$0xff]  }
 0x1db   : > { %1323 = vperm.xlu0 %9447, %v909_v45  }
 0x1dc   : > { %v11323_v43 = vpop.permute.xlu1 %1038 }
 0x1dd   : > { %4600 = vmatmul.mubr.bf16.gmra.mrb[132].mxu0 %v9705_v47  ;;  %v4053_v47 = vpop.f32.mrb[27].mxu1 }
 0x1de   : > { %4607 = vmatprep.mubr.bf16.mxu0 %v9710_v48  ;;  %v910_v48 = vld [vmem:[%s13602_s2 + $0x268] sm:$0xff]  ;;  %v11247_v59 = vpop.f32.mrb[28].mxu1 }
 0x1df   : > { %1328 = vperm.xlu1 %9448, %v910_v48   ;;  %13624 = vst [vmem:[#allocation16_spill] sm:$0xff] %v11247_v59  ;;  %1413 = vperm.xlu0 %9447, %v927_v57   ;;  %v4058_v60 = vpop.f32.mrb[29].mxu1 }
 0x1e0   : > { %4783 = vmatpush1.bf16.xpose.msra.mxu0 %v9848_v52  ;;  %v11338_v52 = vpop.permute.xlu1 %958 }
 0x1e3   : > { %1418 = vperm.xlu1 %9448, %v928_v58   ;;  %1333 = vperm.xlu0 %9447, %v911_v63   ;;  %v9771_v63 = vld [vmem:[%s13601_s1 + $0x970] ss:$28 sps:$4 sm:$0xff]  }
 0x1e5   : > { %4608 = vmatmul.mubr.bf16.gmra.mrb[136].mxu0 %v9714_v61  ;;  %v3836_v61 = vsel %vm3651_vm0, %v9852_v55, 0  ;;  %v11343_v55 = vpop.permute.xlu0 %1043 }
 0x1e6   : > { %4615 = vmatprep.mubr.bf16.mxu0 %v9716_v62  ;;  %v11250_v62 = vpop.f32.mrb[30].mxu1  ;;  %8786 = vmatpush3.bf16.xpose.msra.mxu1 %v3836_v61 }
 0x1e7   : > { %13625 = vst [vmem:[#allocation17_spill] sm:$0xff] %v11250_v62  ;;  %v4061_v0 = vpop.f32.mrb[31].mxu1  ;;  %1338 = vperm.xlu1 %9448, %v912_v1   ;;  %v9774_v1 = vld [vmem:[%s13601_s1 + $0x9ac] ss:$28 sps:$4 sm:$0xff]   ;;  %v9869_v62 = vld [vmem:[%s13601_s1 + $0xf4] ss:$28 sps:$4 sm:$0xff]  }
 0x1e8   : > { %v11272_v8 = vpop.f32.mrb[32].mxu1  ;;  %v11354_v0 = vpop.permute.xlu1 %1048 }
 0x1e9   : > { %13626 = vst [vmem:[#allocation18_spill] sm:$0xff] %v11272_v8  ;;  %v4066_v9 = vpop.f32.mrb[33].mxu1 }
 0x1ea   : > { %v11274_v11 = vpop.f32.mrb[34].mxu1 }
 0x1eb   : > { %13627 = vst [vmem:[#allocation19_spill] sm:$0xff] %v11274_v11 }
 0x1ec   : > { %v11365_v9 = vpop.permute.xlu1 %968 }
 0x1ed   : > { %4616 = vmatmul.mubr.bf16.gmra.mrb[140].mxu0 %v9720_v12  ;;  %8788 = vmatmul.mubr.msk.bf16.vlgmr.msra.gmra.mrb[152].mxu1 %vm3651_vm0, %v9857_v7  ;;  %v4069_v12 = vpop.f32.mrb[35].mxu1 }
 0x1ee   : > { %4623 = vmatprep.mubr.bf16.mxu0 %v9722_v13  ;;  %v9744_v13 = vld [vmem:[%s13601_s1 + $0x890] ss:$28 sps:$4 sm:$0xff]   ;;  %v11285_v17 = vpop.f32.mrb[36].mxu1  ;;  %8791 = vmatprep.mubr.msk.bf16.mxu1 %vm3651_vm0, %v9864_v29  ;;  %v929_v29 = vld [vmem:[%s13602_s2 + $0x300] sm:$0xff] }
 0x1ef   : > { %13628 = vst [vmem:[#allocation20_spill] sm:$0xff] %v11285_v17  ;;  %v4074_v18 = vpop.f32.mrb[37].mxu1  ;;  %1423 = vperm.xlu0 %9447, %v929_v29   ;;  %v9790_v29 = vld [vmem:[%s13601_s1 + $0xa18] ss:$28 sps:$4 sm:$0xff]  }
 0x1f0   : > { %v11287_v19 = vpop.f32.mrb[38].mxu1  ;;  %v9780_v18 = vld [vmem:[%s13601_s1 + $0x9e4] ss:$28 sps:$4 sm:$0xff]  }
 0x1f1   : > { %13629 = vst [vmem:[#allocation21_spill] sm:$0xff] %v11287_v19  ;;  %v4077_v20 = vpop.f32.mrb[39].mxu1  ;;  %v6015_v19 = vld [vmem:[%s13604_s4 + $0xd8] sm:$0xff] }
 0x1f2   : > { %v9880_v20 = vld [vmem:[%s13601_s1 + $0x168] ss:$28 sps:$4 sm:$0xff]  }
 0x1f5   : > { %4624 = vmatmul.mubr.bf16.gmra.mrb[144].mxu0 %v9726_v31  ;;  %v11306_v31 = vpop.f32.mrb[40].mxu1  ;;  %8792 = vmatmul.mubr.msk.bf16.gmra.mrb[156].mxu1 %vm3651_vm0, %v9865_v30  ;;  %v930_v30 = vld [vmem:[%s13602_s2 + $0x308] sm:$0xff] }
 0x1f6   : > { %4631 = vmatprep.mubr.bf16.mxu0 %v9728_v32  ;;  %13630 = vst [vmem:[#allocation22_spill] sm:$0xff] %v11306_v31  ;;  %v4082_v32 = vpop.f32.mrb[41].mxu1  ;;  %8795 = vmatprep.mubr.msk.bf16.mxu1 %vm3651_vm0, %v9872_v51 }
 0x1f7   : > { %v11309_v33 = vpop.f32.mrb[42].mxu1  ;;  %v11390_v32 = vpop.permute.xlu1 %1058  ;;  %1428 = vperm.xlu1 %9448, %v930_v30  }
 0x1f8   : > { %13631 = vst [vmem:[#allocation23_spill] sm:$0xff] %v11309_v33  ;;  %v4085_v35 = vpop.f32.mrb[43].mxu1 }
 0x1f9   : > { %v11321_v41 = vpop.f32.mrb[44].mxu1 }
 0x1fa   : > { %13632 = vst [vmem:[#allocation24_spill] sm:$0xff] %v11321_v41  ;;  %v4090_v45 = vpop.f32.mrb[45].mxu1  ;;  %v9837_v41 = vld [vmem:[%s13601_s1 + $0xb68] ss:$28 sps:$4 sm:$0xff]  }
 0x1fb   : > { %v11327_v47 = vpop.f32.mrb[46].mxu1  ;;  %v11406_v51 = vpop.permute.xlu1 %978 }
 0x1fc   : > { %13633 = vst [vmem:[#allocation25_spill] sm:$0xff] %v11327_v47  ;;  %v4093_v48 = vpop.f32.mrb[47].mxu1 }
 0x1fd   : > { %4632 = vmatmul.mubr.bf16.gmra.mrb[148].mxu0 %v9732_v49  ;;  %v9765_v49 = vld [vmem:[%s13601_s1 + $0x938] ss:$28 sps:$4 sm:$0xff]   ;;  %v11346_v57 = vpop.f32.mrb[48].mxu1  ;;  %8796 = vmatmul.mubr.msk.bf16.gmra.mrb[160].mxu1 %vm3651_vm0, %v9873_v54 }
 0x1fe   : > { %4639 = vmatprep.mubr.bf16.mxu0 %v9734_v50  ;;  %v9767_v50 = vld [vmem:[%s13601_s1 + $0x974] ss:$28 sps:$4 sm:$0xff]   ;;  %13634 = vst [vmem:[#allocation26_spill] sm:$0xff] %v11346_v57  ;;  %v4098_v58 = vpop.f32.mrb[49].mxu1  ;;  %8799 = vmatprep.mubr.msk.bf16.mxu1 %vm3651_vm0, %v9880_v20  ;;  %v6011_v57 = vld [vmem:[%s13604_s4 + $0xb8] sm:$0xff] }
 0x1ff   : > { %v11349_v60 = vpop.f32.mrb[50].mxu1  ;;  %v931_v48 = vld [vmem:[%s13602_s2 + $0x310] sm:$0xff]  ;;  %v11437_v30 = vpop.permute.xlu1 %1068 }
 0x200   : > { %13635 = vst [vmem:[#allocation27_spill] sm:$0xff] %v11349_v60  ;;  %v4101_v61 = vpop.f32.mrb[51].mxu1  ;;  %1433 = vperm.xlu0 %9447, %v931_v48  }
 0x201   : > { %v933_v61 = vld [vmem:[%s13602_s2 + $0x320] sm:$0xff] }
 0x204   : > { %1443 = vperm.xlu0 %9447, %v933_v61  }
 0x205   : > { %4640 = vmatmul.mubr.bf16.gmra.mrb[152].mxu0 %v9738_v2  ;;  %v11359_v2 = vpop.permute.xlu0 %963 }
 0x206   : > { %4647 = vmatprep.mubr.bf16.mxu0 %v9740_v4  ;;  %v11361_v4 = vpop.f32.mrb[52].mxu1 }
 0x207   : > { %13636 = vst [vmem:[#allocation28_spill] sm:$0xff] %v11361_v4  ;;  %v4106_v5 = vpop.f32.mrb[53].mxu1 }
 0x208   : > { %v11363_v7 = vpop.f32.mrb[54].mxu1 }
 0x209   : > { %13637 = vst [vmem:[#allocation29_spill] sm:$0xff] %v11363_v7  ;;  %v4109_v12 = vpop.f32.mrb[55].mxu1 }
 0x20a   : > { %v9886_v12 = vld [vmem:[%s13601_s1 + $0x210] ss:$28 sps:$4 sm:$0xff]  }
 0x20d   : > { %4648 = vmatmul.mubr.bf16.gmra.mrb[156].mxu0 %v9744_v13  ;;  %v11367_v13 = vpop.permute.xlu0 %1053 }
 0x20e   : > { %4655 = vmatprep.mubr.bf16.mxu0 %v9749_v15  ;;  %v9778_v15 = vld [vmem:[%s13601_s1 + $0x9a8] ss:$28 sps:$4 sm:$0xff]  }
 0x215   : > { %4656 = vmatmul.mubr.bf16.gmra.mrb[160].mxu0 %v9753_v22  ;;  %v9881_v22 = vld [vmem:[%s13601_s1 + $0x1a0] ss:$28 sps:$4 sm:$0xff]  }
 0x216   : > { %4663 = vmatprep.mubr.bf16.mxu0 %v9755_v26  ;;  %v11382_v26 = vpop.f32.mrb[56].mxu1  ;;  %8800 = vmatmul.mubr.msk.bf16.gmra.mrb[164].mxu1 %vm3651_vm0, %v9881_v22  ;;  %v935_v22 = vld [vmem:[%s13602_s2 + $0x330] sm:$0xff] }
 0x217   : > { %13638 = vst [vmem:[#allocation30_spill] sm:$0xff] %v11382_v26  ;;  %v4114_v35 = vpop.f32.mrb[57].mxu1  ;;  %1453 = vperm.xlu0 %9447, %v935_v22   ;;  %v9799_v22 = vld [vmem:[%s13601_s1 + $0xa50] ss:$28 sps:$4 sm:$0xff]  }
 0x218   : > { %v9795_v35 = vld [vmem:[%s13601_s1 + $0xa54] ss:$28 sps:$4 sm:$0xff]  }
 0x21d   : > { %4664 = vmatmul.mubr.bf16.gmra.mrb[164].mxu0 %v9759_v37  ;;  %v11393_v37 = vpop.permute.xlu0 %973 }
 0x21e   : > { %4671 = vmatprep.mubr.bf16.mxu0 %v9761_v38  ;;  %v11395_v38 = vpop.f32.mrb[58].mxu1 }
 0x21f   : > { %13639 = vst [vmem:[#allocation31_spill] sm:$0xff] %v11395_v38  ;;  %v4117_v45 = vpop.f32.mrb[59].mxu1 }
 0x220   : > { %v11410_v58 = vpop.f32.mrb[60].mxu1 }
 0x221   : > { %v11408_v54 = vpop.permute.xlu0 %1063  ;;  %13640 = vst [vmem:[#allocation32_spill] sm:$0xff] %v11410_v58  ;;  %v4122_v5 = vpop.f32.mrb[61].mxu1 }
 0x222   : > { %v11457_v5 = vpop.permute.xlu1 %988 }
 0x225   : > { %4672 = vmatmul.mubr.bf16.gmra.mrb[168].mxu0 %v9765_v49  ;;  %v9784_v49 = vld [vmem:[%s13601_s1 + $0x9e0] ss:$28 sps:$4 sm:$0xff]   ;;  %v11442_v45 = vpop.permute.xlu0 %983 }
 0x226   : > { %4679 = vmatprep.mubr.bf16.mxu0 %v9767_v50  ;;  %v9786_v50 = vld [vmem:[%s13601_s1 + $0xa1c] ss:$28 sps:$4 sm:$0xff]  }
 0x22d   : > { %4680 = vmatmul.mubr.bf16.gmra.mrb[172].mxu0 %v9771_v63  ;;  %v932_v63 = vld [vmem:[%s13602_s2 + $0x318] sm:$0xff] }
 0x22e   : > { %4687 = vmatprep.mubr.bf16.mxu0 %v9774_v1  ;;  %v9885_v1 = vld [vmem:[%s13601_s1 + $0x1d8] ss:$28 sps:$4 sm:$0xff]   ;;  %1438 = vperm.xlu1 %9448, %v932_v63  }
 0x22f   : > { %8803 = vmatprep.mubr.msk.bf16.mxu1 %vm3651_vm0, %v9885_v1  ;;  %v938_v1 = vld [vmem:[%s13602_s2 + $0x348] sm:$0xff] }
 0x230   : > { %8804 = vmatmul.mubr.msk.bf16.gmra.mrb[168].mxu1 %vm3651_vm0, %v9886_v12 }
 0x235   : > { %4688 = vmatmul.mubr.bf16.gmra.mrb[176].mxu0 %v9778_v15  ;;  %v11424_v15 = vpop.f32.mrb[62].mxu1 }
 0x236   : > { %4695 = vmatprep.mubr.bf16.mxu0 %v9780_v18  ;;  %13641 = vst [vmem:[#allocation33_spill] sm:$0xff] %v11424_v15  ;;  %v934_v18 = vld [vmem:[%s13602_s2 + $0x328] sm:$0xff]  ;;  %v4125_v20 = vpop.f32.mrb[63].mxu1 }
 0x237   : > { %1448 = vperm.xlu1 %9448, %v934_v18   ;;  %v11444_v48 = vpop.f32.mrb[64].mxu1  ;;  %v939_v18 = vld [vmem:[%s13602_s2 + $0x350] sm:$0xff]  ;;  %v11462_v20 = vpop.permute.xlu0 %1073 }
 0x238   : > { %13642 = vst [vmem:[#allocation34_spill] sm:$0xff] %v11444_v48  ;;  %v4130_v61 = vpop.f32.mrb[65].mxu1  ;;  %13644 = vst [vmem:[#allocation36_spill] sm:$0xff] %v11462_v20 }
 0x239   : > { %v11452_v63 = vpop.f32.mrb[66].mxu1  ;;  %v11478_v61 = vpop.permute.xlu1 %1078 }
 0x23a   : > { %13643 = vst [vmem:[#allocation35_spill] sm:$0xff] %v11452_v63  ;;  %v4133_v12 = vpop.f32.mrb[67].mxu1  ;;  %13646 = vst [vmem:[#allocation38_spill] sm:$0xff] %v11478_v61 }
 0x23b   : > { %v11480_v63 = vpop.permute.xlu0 %993 }
 0x23d   : > { %4696 = vmatmul.mubr.bf16.gmra.mrb[180].mxu0 %v9784_v49  ;;  %v937_v49 = vld [vmem:[%s13602_s2 + $0x340] sm:$0xff] }
 0x23e   : > { %4703 = vmatprep.mubr.bf16.mxu0 %v9786_v50  ;;  %v936_v50 = vld [vmem:[%s13602_s2 + $0x338] sm:$0xff]  ;;  %1463 = vperm.xlu0 %9447, %v937_v49   ;;  %v6004_v49 = vld [vmem:[%s13604_s4 + $0x80] sm:$0xff] }
 0x23f   : > { %1458 = vperm.xlu1 %9448, %v936_v50   ;;  %v940_v50 = vld [vmem:[%s13602_s2 + $0x358] sm:$0xff] }
 0x242   : > { %1473 = vperm.xlu0 %9447, %v939_v18   ;;  %v6005_v18 = vld [vmem:[%s13604_s4 + $0x88] sm:$0xff] }
 0x243   : > { %1468 = vperm.xlu1 %9448, %v938_v1  }
 0x245   : > { %4704 = vmatmul.mubr.bf16.gmra.mrb[184].mxu0 %v9790_v29  ;;  %v9802_v29 = vld [vmem:[%s13601_s1 + $0xa8c] ss:$28 sps:$4 sm:$0xff]  }
 0x246   : > { %4711 = vmatprep.mubr.bf16.mxu0 %v9795_v35  ;;  %v11470_v35 = vpop.f32.mrb[68].mxu1  ;;  %6102 = vperm.xlu0 %9447, %v6004_v49   ;;  %v9896_v49 = vld [vmem:[%s13601_s1 + $0x248] ss:$28 sps:$4 sm:$0xff]  }
 0x247   : > { %13645 = vst [vmem:[#allocation37_spill] sm:$0xff] %v11470_v35  ;;  %v4138_v12 = vpop.f32.mrb[69].mxu1  ;;  %1478 = vperm.xlu1 %9448, %v940_v50   ;;  %v5988_v35 = vld [vmem:[%s13604_s4] sm:$0xff]  ;;  %8807 = vmatprep.mubr.msk.bf16.mxu1 %vm3651_vm0, %v9896_v49  ;;  %v5990_v49 = vld [vmem:[%s13604_s4 + $0x10] sm:$0xff] }
 0x248   : > { %v11482_v1 = vpop.f32.mrb[70].mxu1  ;;  %v9809_v50 = vld [vmem:[%s13601_s1 + $0xac4] ss:$28 sps:$4 sm:$0xff]   ;;  %v11499_v12 = vpop.permute.xlu1 %998 }
 0x249   : > { %13647 = vst [vmem:[#allocation39_spill] sm:$0xff] %v11482_v1  ;;  %v11504_v1 = vpop.permute.xlu0 %1083 }
 0x24a   : > { %6022 = vperm.xlu0 %9447, %v5988_v35   ;;  %13648 = vst [vmem:[#allocation40_spill] sm:$0xff] %v11504_v1  ;;  %v6006_v35 = vld [vmem:[%s13604_s4 + $0x90] sm:$0xff]  ;;  %v9957_v1 = vld [vmem:[%s13601_s1 + $0x5c4] ss:$28 sps:$4 sm:$0xff]  }
 0x24b   : > { %6107 = vperm.xlu1 %9448, %v6005_v18   ;;  %v5989_v18 = vld [vmem:[%s13604_s4 + $0x8] sm:$0xff] }
 0x24c   : > { %v11527_v38 = vpop.permute.xlu1 %1088 }
 0x24d   : > { %4712 = vmatmul.mubr.bf16.gmra.mrb[188].mxu0 %v9799_v22  ;;  %v4141_v22 = vpop.f32.mrb[71].mxu1  ;;  %13651 = vst [vmem:[#allocation43_spill] sm:$0xff] %v11527_v38  ;;  %v9954_v38 = vld [vmem:[%s13601_s1 + $0x58c] ss:$28 sps:$4 sm:$0xff]  }
 0x24e   : > { %4719 = vmatprep.mubr.bf16.mxu0 %v9802_v29  ;;  %v9806_v29 = vld [vmem:[%s13601_s1 + $0xa88] ss:$28 sps:$4 sm:$0xff]   ;;  %v9897_v22 = vld [vmem:[%s13601_s1 + $0x280] ss:$28 sps:$4 sm:$0xff]   ;;  %v11507_v48 = vpop.f32.mrb[72].mxu1  ;;  %6112 = vperm.xlu0 %9447, %v6006_v35  }
 0x24f   : > { %13649 = vst [vmem:[#allocation41_spill] sm:$0xff] %v11507_v48  ;;  %8808 = vmatmul.mubr.msk.bf16.gmra.mrb[172].mxu1 %vm3651_vm0, %v9897_v22  ;;  %v4146_v15 = vpop.f32.mrb[73].mxu1  ;;  %6027 = vperm.xlu1 %9448, %v5989_v18   ;;  %v6007_v48 = vld [vmem:[%s13604_s4 + $0x98] sm:$0xff]  ;;  %v11532_v22 = vpop.permute.xlu0 %1003  ;;  %v6008_v18 = vld [vmem:[%s13604_s4 + $0xa0] sm:$0xff] }
 0x250   : > { %v11516_v58 = vpop.f32.mrb[74].mxu1  ;;  %v9816_v15 = vld [vmem:[%s13601_s1 + $0xafc] ss:$28 sps:$4 sm:$0xff]   ;;  %v11544_v7 = vpop.permute.xlu1 %1008 }
 0x251   : > { %13650 = vst [vmem:[#allocation42_spill] sm:$0xff] %v11516_v58 }
 0x252   : > { %6032 = vperm.xlu0 %9447, %v5990_v49   ;;  %v5992_v49 = vld [vmem:[%s13604_s4 + $0x20] sm:$0xff] }
 0x253   : > { %6117 = vperm.xlu1 %9448, %v6007_v48  }
 0x255   : > { %4720 = vmatmul.mubr.bf16.gmra.mrb[192].mxu0 %v9806_v29  ;;  %v4149_v29 = vpop.f32.mrb[75].mxu1 }
 0x256   : > { %4727 = vmatprep.mubr.bf16.mxu0 %v9809_v50  ;;  %v9813_v50 = vld [vmem:[%s13601_s1 + $0xac0] ss:$28 sps:$4 sm:$0xff]   ;;  %v11534_v35 = vpop.f32.mrb[76].mxu1  ;;  %6122 = vperm.xlu0 %9447, %v6008_v18   ;;  %v9904_v18 = vld [vmem:[%s13601_s1 + $0x2b8] ss:$28 sps:$4 sm:$0xff]  }
 0x257   : > { %13652 = vst [vmem:[#allocation44_spill] sm:$0xff] %v11534_v35  ;;  %v5991_v29 = vld [vmem:[%s13604_s4 + $0x18] sm:$0xff]  ;;  %v4154_v58 = vpop.f32.mrb[77].mxu1  ;;  %v11552_v35 = vpop.permute.xlu0 %1093  ;;  %8811 = vmatprep.mubr.msk.bf16.mxu1 %vm3651_vm0, %v9904_v18 }
 0x258   : > { %6037 = vperm.xlu1 %9448, %v5991_v29   ;;  %v11542_v26 = vpop.f32.mrb[78].mxu1  ;;  %13654 = vst [vmem:[#allocation46_spill] sm:$0xff] %v11552_v35  ;;  %v9820_v58 = vld [vmem:[%s13601_s1 + $0xaf8] ss:$28 sps:$4 sm:$0xff]   ;;  %v9905_v29 = vld [vmem:[%s13601_s1 + $0x2f0] ss:$28 sps:$4 sm:$0xff]  }
 0x259   : > { %13653 = vst [vmem:[#allocation45_spill] sm:$0xff] %v11542_v26  ;;  %v4157_v48 = vpop.f32.mrb[79].mxu1  ;;  %v6010_v26 = vld [vmem:[%s13604_s4 + $0xb0] sm:$0xff]  ;;  %8812 = vmatmul.mubr.msk.bf16.gmra.mrb[176].mxu1 %vm3651_vm0, %v9905_v29 }
 0x25a   : > { %6042 = vperm.xlu0 %9447, %v5992_v49   ;;  %v11567_v48 = vpop.f32.mrb[80].mxu1  ;;  %v5993_v49 = vld [vmem:[%s13604_s4 + $0x28] sm:$0xff]  ;;  %v10024_v35 = vld [vmem:[%s13601_s1 + $0xa98] ss:$28 sps:$4 sm:$0xff]  }
 0x25b   : > { %13655 = vst [vmem:[#allocation47_spill] sm:$0xff] %v11567_v48  ;;  %v4162_v4 = vpop.f32.mrb[81].mxu1  ;;  %v11578_v60 = vpop.permute.xlu0 %1013  ;;  %v5994_v48 = vld [vmem:[%s13604_s4 + $0x30] sm:$0xff] }
 0x25c   : > { %v9833_v4 = vld [vmem:[%s13601_s1 + $0xb6c] ss:$28 sps:$4 sm:$0xff]  }
 0x25d   : > { %4728 = vmatmul.mubr.bf16.gmra.mrb[196].mxu0 %v9813_v50  ;;  %v6009_v50 = vld [vmem:[%s13604_s4 + $0xa8] sm:$0xff] }
 0x25e   : > { %4735 = vmatprep.mubr.bf16.mxu0 %v9816_v15  ;;  %v9823_v15 = vld [vmem:[%s13601_s1 + $0xb34] ss:$28 sps:$4 sm:$0xff]   ;;  %6127 = vperm.xlu1 %9448, %v6009_v50   ;;  %v11575_v50 = vpop.permute.xlu1 %1098 }
 0x25f   : > { %13656 = vst [vmem:[#allocation48_spill] sm:$0xff] %v11575_v50  ;;  %6132 = vperm.xlu0 %9447, %v6010_v26   ;;  %v11596_v29 = vpop.permute.xlu0 %1183 }
 0x260   : > { %13658 = vst [vmem:[#allocation50_spill] sm:$0xff] %v11596_v29 }
 0x262   : > { %6047 = vperm.xlu1 %9448, %v5993_v49   ;;  %v11594_v26 = vpop.permute.xlu1 %1018 }
 0x263   : > { %6052 = vperm.xlu0 %9447, %v5994_v48  }
 0x265   : > { %4736 = vmatmul.mubr.bf16.gmra.mrb[200].mxu0 %v9820_v58  ;;  %v11580_v58 = vpop.f32.mrb[82].mxu1 }
 0x266   : > { %4743 = vmatprep.mubr.bf16.mxu0 %v9823_v15  ;;  %13657 = vst [vmem:[#allocation49_spill] sm:$0xff] %v11580_v58  ;;  %v4165_v18 = vpop.f32.mrb[83].mxu1  ;;  %v9827_v15 = vld [vmem:[%s13601_s1 + $0xb30] ss:$28 sps:$4 sm:$0xff]   ;;  %6137 = vperm.xlu1 %9448, %v6011_v57   ;;  %v5995_v58 = vld [vmem:[%s13604_s4 + $0x38] sm:$0xff]  ;;  %v11617_v33 = vpop.permute.xlu1 %1188 }
 0x267   : > { %v11598_v49 = vpop.f32.mrb[84].mxu1  ;;  %v6012_v18 = vld [vmem:[%s13604_s4 + $0xc0] sm:$0xff]  ;;  %13661 = vst [vmem:[#allocation53_spill] sm:$0xff] %v11617_v33 }
 0x268   : > { %13659 = vst [vmem:[#allocation51_spill] sm:$0xff] %v11598_v49  ;;  %v4170_v47 = vpop.f32.mrb[85].mxu1  ;;  %6142 = vperm.xlu0 %9447, %v6012_v18   ;;  %v6013_v49 = vld [vmem:[%s13604_s4 + $0xc8] sm:$0xff]  ;;  %v9913_v18 = vld [vmem:[%s13601_s1 + $0x360] ss:$28 sps:$4 sm:$0xff]  }
 0x269   : > { %v11606_v57 = vpop.f32.mrb[86].mxu1  ;;  %v9843_v47 = vld [vmem:[%s13601_s1 + $0xba4] ss:$28 sps:$4 sm:$0xff]  }
 0x26a   : > { %6057 = vperm.xlu1 %9448, %v5995_v58   ;;  %13660 = vst [vmem:[#allocation52_spill] sm:$0xff] %v11606_v57  ;;  %v4173_v48 = vpop.f32.mrb[87].mxu1  ;;  %v11622_v58 = vpop.permute.xlu0 %1103  ;;  %v6014_v57 = vld [vmem:[%s13604_s4 + $0xd0] sm:$0xff] }
 0x26b   : > { %13662 = vst [vmem:[#allocation54_spill] sm:$0xff] %v11622_v58  ;;  %v11631_v48 = vpop.f32.mrb[88].mxu1  ;;  %v9949_v58 = vld [vmem:[%s13601_s1 + $0x554] ss:$28 sps:$4 sm:$0xff]  }
 0x26c   : > { %13663 = vst [vmem:[#allocation55_spill] sm:$0xff] %v11631_v48  ;;  %v5998_v48 = vld [vmem:[%s13604_s4 + $0x50] sm:$0xff] }
 0x26d   : > { %4744 = vmatmul.mubr.bf16.gmra.mrb[204].mxu0 %v9827_v15  ;;  %v5996_v15 = vld [vmem:[%s13604_s4 + $0x40] sm:$0xff] }
 0x26e   : > { %4751 = vmatprep.mubr.bf16.mxu0 %v9833_v4  ;;  %6062 = vperm.xlu0 %9447, %v5996_v15   ;;  %v9912_v4 = vld [vmem:[%s13601_s1 + $0x328] ss:$28 sps:$4 sm:$0xff]   ;;  %v4178_v15 = vpop.f32.mrb[89].mxu1  ;;  %v11650_v17 = vpop.permute.xlu0 %1193 }
 0x26f   : > { %6147 = vperm.xlu1 %9448, %v6013_v49   ;;  %8815 = vmatprep.mubr.msk.bf16.mxu1 %vm3651_vm0, %v9912_v4  ;;  %v5997_v49 = vld [vmem:[%s13604_s4 + $0x48] sm:$0xff]  ;;  %v11640_v31 = vpop.f32.mrb[90].mxu1  ;;  %13666 = vst [vmem:[#allocation58_spill] sm:$0xff] %v11650_v17  ;;  %v5999_v15 = vld [vmem:[%s13604_s4 + $0x58] sm:$0xff] }
 0x270   : > { %8816 = vmatmul.mubr.msk.bf16.gmra.mrb[180].mxu1 %vm3651_vm0, %v9913_v18  ;;  %13664 = vst [vmem:[#allocation56_spill] sm:$0xff] %v11640_v31  ;;  %v4181_v4 = vpop.f32.mrb[91].mxu1 }
 0x271   : > { %v11658_v18 = vpop.f32.mrb[92].mxu1 }
 0x272   : > { %6152 = vperm.xlu0 %9447, %v6014_v57   ;;  %v9847_v57 = vld [vmem:[%s13601_s1 + $0xba0] ss:$28 sps:$4 sm:$0xff]   ;;  %13667 = vst [vmem:[#allocation59_spill] sm:$0xff] %v11658_v18  ;;  %v4186_v31 = vpop.f32.mrb[93].mxu1  ;;  %v11668_v17 = vpop.permute.xlu0 %1113  ;;  %v6017_v18 = vld [vmem:[%s13604_s4 + $0xe8] sm:$0xff] }
 0x273   : > { %6067 = vperm.xlu1 %9448, %v5997_v49   ;;  %v6016_v49 = vld [vmem:[%s13604_s4 + $0xe0] sm:$0xff]  ;;  %13669 = vst [vmem:[#allocation61_spill] sm:$0xff] %v11668_v17  ;;  %v9858_v31 = vld [vmem:[%s13601_s1 + $0x4c] ss:$28 sps:$4 sm:$0xff]  }
 0x274   : > { %v9941_v17 = vld [vmem:[%s13601_s1 + $0x4e4] ss:$28 sps:$4 sm:$0xff]  }
 0x275   : > { %4752 = vmatmul.mubr.bf16.gmra.mrb[208].mxu0 %v9837_v41  ;;  %v11642_v41 = vpop.permute.xlu1 %1108 }
 0x276   : > { %4759 = vmatprep.mubr.bf16.mxu0 %v9843_v47  ;;  %13665 = vst [vmem:[#allocation57_spill] sm:$0xff] %v11642_v41  ;;  %v9855_v47 = vld [vmem:[%s13601_s1 + $0x14] ss:$28 sps:$4 sm:$0xff]   ;;  %6072 = vperm.xlu0 %9447, %v5998_v48  }
 0x277   : > { %6157 = vperm.xlu1 %9448, %v6015_v19   ;;  %v11670_v19 = vpop.f32.mrb[94].mxu1  ;;  %v10014_v41 = vld [vmem:[%s13601_s1 + $0x9b8] ss:$28 sps:$4 sm:$0xff]  }
 0x278   : > { %13670 = vst [vmem:[#allocation62_spill] sm:$0xff] %v11670_v19  ;;  %v4189_v48 = vpop.f32.mrb[95].mxu1  ;;  %v11692_v19 = vpop.permute.xlu0 %1203 }
 0x279   : > { %v11666_v4 = vpop.permute.xlu1 %1198  ;;  %v9921_v48 = vld [vmem:[%s13601_s1 + $0x3d0] ss:$28 sps:$4 sm:$0xff]   ;;  %13672 = vst [vmem:[#allocation64_spill] sm:$0xff] %v11692_v19 }
 0x27a   : > { %13668 = vst [vmem:[#allocation60_spill] sm:$0xff] %v11666_v4  ;;  %6162 = vperm.xlu0 %9447, %v6016_v49   ;;  %v9920_v49 = vld [vmem:[%s13601_s1 + $0x398] ss:$28 sps:$4 sm:$0xff]   ;;  %v11695_v4 = vpop.f32.mrb[96].mxu1 }
 0x27b   : > { %6077 = vperm.xlu1 %9448, %v5999_v15   ;;  %8819 = vmatprep.mubr.msk.bf16.mxu1 %vm3651_vm0, %v9920_v49  ;;  %13673 = vst [vmem:[#allocation65_spill] sm:$0xff] %v11695_v4  ;;  %v4194_v11 = vpop.f32.mrb[97].mxu1  ;;  %v6002_v49 = vld [vmem:[%s13604_s4 + $0x70] sm:$0xff]  ;;  %v6019_v4 = vld [vmem:[%s13604_s4 + $0xf8] sm:$0xff] }
 0x27c   : > { %8820 = vmatmul.mubr.msk.bf16.gmra.mrb[184].mxu1 %vm3651_vm0, %v9921_v48  ;;  %v11704_v19 = vpop.f32.mrb[98].mxu1  ;;  %v9861_v11 = vld [vmem:[%s13601_s1 + $0x84] ss:$28 sps:$4 sm:$0xff]   ;;  %v11720_v48 = vpop.permute.xlu0 %1123 }
 0x27d   : > { %4760 = vmatmul.mubr.bf16.gmra.mrb[212].mxu0 %v9847_v57  ;;  %v6000_v57 = vld [vmem:[%s13604_s4 + $0x60] sm:$0xff]  ;;  %v11687_v15 = vpop.permute.xlu1 %1118  ;;  %13674 = vst [vmem:[#allocation66_spill] sm:$0xff] %v11704_v19  ;;  %13676 = vst [vmem:[#allocation68_spill] sm:$0xff] %v11720_v48  ;;  %v9933_v48 = vld [vmem:[%s13601_s1 + $0x474] ss:$28 sps:$4 sm:$0xff]  }
 0x27e   : > { %4800 = vmatprep.mubr.bf16.mxu0 %v9855_v47  ;;  %v9853_v47 = vld [vmem:[%s13601_s1 + $0x10] ss:$28 sps:$4 sm:$0xff]   ;;  %6082 = vperm.xlu0 %9447, %v6000_v57   ;;  %13671 = vst [vmem:[#allocation63_spill] sm:$0xff] %v11687_v15  ;;  %v10004_v15 = vld [vmem:[%s13601_s1 + $0x8d8] ss:$28 sps:$4 sm:$0xff]  }
 0x27f   : > { %6167 = vperm.xlu1 %9448, %v6017_v18   ;;  %v6018_v18 = vld [vmem:[%s13604_s4 + $0xf0] sm:$0xff]  ;;  %v6001_v57 = vld [vmem:[%s13604_s4 + $0x68] sm:$0xff] }
 0x281   : > { %v11715_v33 = vpop.permute.xlu1 %1208 }
 0x282   : > { %6172 = vperm.xlu0 %9447, %v6018_v18   ;;  %13675 = vst [vmem:[#allocation67_spill] sm:$0xff] %v11715_v33 }
 0x283   : > { %6087 = vperm.xlu1 %9448, %v6001_v57   ;;  %v7485_v57 = vld [vmem:[%s13606_s6] sm:$0xff] }
 0x285   : > { %4801 = vmatmul.mubr.bf16.vlgmr.msra.gmra.mrb[0].mxu0 %v9853_v47  ;;  %v4197_v47 = vpop.f32.mrb[99].mxu1  ;;  %v11732_v8 = vpop.permute.xlu1 %1128 }
 0x286   : > { %4808 = vmatprep.mubr.bf16.mxu0 %v9858_v31  ;;  %v9860_v31 = vld [vmem:[%s13601_s1 + $0x48] ss:$28 sps:$4 sm:$0xff]   ;;  %6092 = vperm.xlu0 %9447, %v6002_v49   ;;  %v11722_v18 = vpop.f32.mrb[100].mxu1  ;;  %v6003_v47 = vld [vmem:[%s13604_s4 + $0x78] sm:$0xff]  ;;  %13679 = vst [vmem:[#allocation71_spill] sm:$0xff] %v11732_v8  ;;  %v7487_v49 = vld [vmem:[%s13606_s6 + $0x10] sm:$0xff] }
 0x287   : > { %6177 = vperm.xlu1 %9448, %v6019_v4   ;;  %13677 = vst [vmem:[#allocation69_spill] sm:$0xff] %v11722_v18  ;;  %v4202_v19 = vpop.f32.mrb[101].mxu1  ;;  %v11740_v18 = vpop.permute.xlu0 %1213  ;;  %v9994_v8 = vld [vmem:[%s13601_s1 + $0x7f8] ss:$28 sps:$4 sm:$0xff]  }
 0x288   : > { %v11730_v33 = vpop.f32.mrb[102].mxu1  ;;  %13680 = vst [vmem:[#allocation72_spill] sm:$0xff] %v11740_v18  ;;  %v9863_v19 = vld [vmem:[%s13601_s1 + $0x80] ss:$28 sps:$4 sm:$0xff]  }
 0x289   : > { %13678 = vst [vmem:[#allocation70_spill] sm:$0xff] %v11730_v33  ;;  %v4205_v4 = vpop.f32.mrb[103].mxu1  ;;  %v7585_v33 = vld [vmem:[%s13608_s8] sm:$0xff] }
 0x28a   : > { %7491 = vperm.xlu0 %9447, %v7485_v57   ;;  %v9928_v57 = vld [vmem:[%s13601_s1 + $0x408] ss:$28 sps:$4 sm:$0xff]   ;;  %v11755_v4 = vpop.f32.mrb[104].mxu1 }
 0x28b   : > { %6097 = vperm.xlu1 %9448, %v6003_v47   ;;  %v9929_v47 = vld [vmem:[%s13601_s1 + $0x440] ss:$28 sps:$4 sm:$0xff]   ;;  %8823 = vmatprep.mubr.msk.bf16.mxu1 %vm3651_vm0, %v9928_v57  ;;  %13681 = vst [vmem:[#allocation73_spill] sm:$0xff] %v11755_v4  ;;  %v4210_v18 = vpop.f32.mrb[105].mxu1  ;;  %v11766_v29 = vpop.permute.xlu0 %1133  ;;  %v9868_v4 = vld [vmem:[%s13601_s1 + $0xb8] ss:$28 sps:$4 sm:$0xff]  }
 0x28c   : > { %8824 = vmatmul.mubr.msk.bf16.gmra.mrb[188].mxu1 %vm3651_vm0, %v9929_v47  ;;  %13683 = vst [vmem:[#allocation75_spill] sm:$0xff] %v11766_v29  ;;  %v9925_v29 = vld [vmem:[%s13601_s1 + $0x404] ss:$28 sps:$4 sm:$0xff]  }
 0x28d   : > { %4809 = vmatmul.mubr.bf16.gmra.mrb[4].mxu0 %v9860_v31  ;;  %v7486_v31 = vld [vmem:[%s13606_s6 + $0x8] sm:$0xff] }
 0x28e   : > { %4816 = vmatprep.mubr.bf16.mxu0 %v9861_v11  ;;  %v9866_v11 = vld [vmem:[%s13601_s1 + $0xbc] ss:$28 sps:$4 sm:$0xff]   ;;  %7501 = vperm.xlu0 %9447, %v7487_v49  }
 0x28f   : > { %7496 = vperm.xlu1 %9448, %v7486_v31   ;;  %v7488_v49 = vld [vmem:[%s13606_s6 + $0x18] sm:$0xff]  ;;  %v11763_v31 = vpop.permute.xlu1 %1218 }
 0x290   : > { %13682 = vst [vmem:[#allocation74_spill] sm:$0xff] %v11763_v31  ;;  %v9877_v31 = vld [vmem:[%s13601_s1 + $0x164] ss:$28 sps:$4 sm:$0xff]  }
 0x292   : > { %7588 = vperm.xlu0 %9447, %v7585_v33  }
 0x293   : > { %7506 = vperm.xlu1 %9448, %v7488_v49   ;;  %v9871_v49 = vld [vmem:[%s13601_s1 + $0xf0] ss:$28 sps:$4 sm:$0xff]  }
 0x295   : > { %4817 = vmatmul.mubr.bf16.gmra.mrb[8].mxu0 %v9863_v19  ;;  %v11768_v19 = vpop.f32.mrb[106].mxu1 }
 0x296   : > { %4824 = vmatprep.mubr.bf16.mxu0 %v9866_v11  ;;  %13684 = vst [vmem:[#allocation76_spill] sm:$0xff] %v11768_v19  ;;  %v4213_v57 = vpop.f32.mrb[107].mxu1  ;;  %v9936_v19 = vld [vmem:[%s13601_s1 + $0x478] ss:$28 sps:$4 sm:$0xff]  }
 0x297   : > { %v11776_v11 = vpop.f32.mrb[108].mxu1  ;;  %v9874_v57 = vld [vmem:[%s13601_s1 + $0x12c] ss:$28 sps:$4 sm:$0xff]   ;;  %8827 = vmatprep.mubr.msk.bf16.mxu1 %vm3651_vm0, %v9936_v19 }
 0x298   : > { %13685 = vst [vmem:[#allocation77_spill] sm:$0xff] %v11776_v11  ;;  %v4218_v18 = vpop.f32.mrb[109].mxu1  ;;  %v9876_v11 = vld [vmem:[%s13601_s1 + $0x128] ss:$28 sps:$4 sm:$0xff]  }
 0x299   : > { %v11778_v47 = vpop.f32.mrb[110].mxu1 }
 0x29a   : > { %13686 = vst [vmem:[#allocation78_spill] sm:$0xff] %v11778_v47  ;;  %v4221_v33 = vpop.f32.mrb[111].mxu1 }
 0x29d   : > { %4825 = vmatmul.mubr.bf16.gmra.mrb[12].mxu0 %v9868_v4  ;;  %v11793_v4 = vpop.f32.mrb[112].mxu1 }
 0x29e   : > { %4832 = vmatprep.mubr.bf16.mxu0 %v9869_v62  ;;  %v9937_v62 = vld [vmem:[%s13601_s1 + $0x4b0] ss:$28 sps:$4 sm:$0xff]   ;;  %13687 = vst [vmem:[#allocation79_spill] sm:$0xff] %v11793_v4  ;;  %v4226_v18 = vpop.f32.mrb[113].mxu1 }
 0x29f   : > { %8828 = vmatmul.mubr.msk.bf16.gmra.mrb[192].mxu1 %vm3651_vm0, %v9937_v62  ;;  %v11796_v33 = vpop.f32.mrb[114].mxu1  ;;  %v9882_v18 = vld [vmem:[%s13601_s1 + $0x19c] ss:$28 sps:$4 sm:$0xff]  }
 0x2a0   : > { %13688 = vst [vmem:[#allocation80_spill] sm:$0xff] %v11796_v33  ;;  %v4229_v47 = vpop.f32.mrb[115].mxu1  ;;  %v9944_v33 = vld [vmem:[%s13601_s1 + $0x4e8] ss:$28 sps:$4 sm:$0xff]  }
 0x2a1   : > { %v9879_v47 = vld [vmem:[%s13601_s1 + $0x160] ss:$28 sps:$4 sm:$0xff]   ;;  %8831 = vmatprep.mubr.msk.bf16.mxu1 %vm3651_vm0, %v9944_v33 }
 0x2a5   : > { %4833 = vmatmul.mubr.bf16.gmra.mrb[16].mxu0 %v9871_v49  ;;  %v11804_v49 = vpop.f32.mrb[116].mxu1 }
 0x2a6   : > { %4840 = vmatprep.mubr.bf16.mxu0 %v9874_v57  ;;  %13689 = vst [vmem:[#allocation81_spill] sm:$0xff] %v11804_v49  ;;  %v4234_v19 = vpop.f32.mrb[117].mxu1  ;;  %v9884_v49 = vld [vmem:[%s13601_s1 + $0x198] ss:$28 sps:$4 sm:$0xff]  }
 0x2a7   : > { %v11806_v57 = vpop.f32.mrb[118].mxu1 }
 0x2a8   : > { %13690 = vst [vmem:[#allocation82_spill] sm:$0xff] %v11806_v57  ;;  %v4237_v62 = vpop.f32.mrb[119].mxu1 }
 0x2ad   : > { %4841 = vmatmul.mubr.bf16.gmra.mrb[20].mxu0 %v9876_v11  ;;  %v11821_v11 = vpop.f32.mrb[120].mxu1 }
 0x2ae   : > { %4848 = vmatprep.mubr.bf16.mxu0 %v9877_v31  ;;  %v9945_v31 = vld [vmem:[%s13601_s1 + $0x520] ss:$28 sps:$4 sm:$0xff]   ;;  %13691 = vst [vmem:[#allocation83_spill] sm:$0xff] %v11821_v11  ;;  %v4242_v19 = vpop.f32.mrb[121].mxu1 }
 0x2af   : > { %8832 = vmatmul.mubr.msk.bf16.gmra.mrb[196].mxu1 %vm3651_vm0, %v9945_v31  ;;  %v11824_v62 = vpop.f32.mrb[122].mxu1 }
 0x2b0   : > { %13692 = vst [vmem:[#allocation84_spill] sm:$0xff] %v11824_v62  ;;  %v4245_v57 = vpop.f32.mrb[123].mxu1 }
 0x2b1   : > { %v11829_v4 = vpop.f32.mrb[124].mxu1  ;;  %v9889_v57 = vld [vmem:[%s13601_s1 + $0x1d0] ss:$28 sps:$4 sm:$0xff]  }
 0x2b2   : > { %13693 = vst [vmem:[#allocation85_spill] sm:$0xff] %v11829_v4  ;;  %v4250_v33 = vpop.f32.mrb[125].mxu1  ;;  %v9890_v4 = vld [vmem:[%s13601_s1 + $0x20c] ss:$28 sps:$4 sm:$0xff]  }
 0x2b3   : > { %v11834_v11 = vpop.f32.mrb[126].mxu1 }
 0x2b4   : > { %13694 = vst [vmem:[#allocation86_spill] sm:$0xff] %v11834_v11 }
 0x2b5   : > { %4849 = vmatmul.mubr.bf16.gmra.mrb[24].mxu0 %v9879_v47  ;;  %v9887_v47 = vld [vmem:[%s13601_s1 + $0x1d4] ss:$28 sps:$4 sm:$0xff]  }
 0x2b6   : > { %4856 = vmatprep.mubr.bf16.mxu0 %v9882_v18  ;;  %v4253_v18 = vpop.f32.mrb[127].mxu1 }
 0x2b7   : > { %v11836_v31 = vpop.f32.mrb[128].mxu1  ;;  %v9953_v18 = vld [vmem:[%s13601_s1 + $0x590] ss:$28 sps:$4 sm:$0xff]  }
 0x2b8   : > { %13695 = vst [vmem:[#allocation87_spill] sm:$0xff] %v11836_v31  ;;  %v4258_v19 = vpop.f32.mrb[129].mxu1 }
 0x2b9   : > { %v11841_v62 = vpop.f32.mrb[130].mxu1 }
 0x2ba   : > { %13696 = vst [vmem:[#allocation88_spill] sm:$0xff] %v11841_v62  ;;  %v4261_v59 = vpop.f32.mrb[131].mxu1 }
 0x2bb   : > { %v11846_v33 = vpop.f32.mrb[132].mxu1 }
 0x2bc   : > { %13697 = vst [vmem:[#allocation89_spill] sm:$0xff] %v11846_v33 }
 0x2bd   : > { %4857 = vmatmul.mubr.bf16.gmra.mrb[28].mxu0 %v9884_v49  ;;  %v9952_v49 = vld [vmem:[%s13601_s1 + $0x558] ss:$28 sps:$4 sm:$0xff]  }
 0x2be   : > { %4864 = vmatprep.mubr.bf16.mxu0 %v9887_v47  ;;  %v4266_v47 = vpop.f32.mrb[133].mxu1  ;;  %8835 = vmatprep.mubr.msk.bf16.mxu1 %vm3651_vm0, %v9952_v49 }
 0x2bf   : > { %v11855_v19 = vpop.f32.mrb[134].mxu1  ;;  %8836 = vmatmul.mubr.msk.bf16.gmra.mrb[200].mxu1 %vm3651_vm0, %v9953_v18  ;;  %v9892_v47 = vld [vmem:[%s13601_s1 + $0x208] ss:$28 sps:$4 sm:$0xff]  }
 0x2c0   : > { %13698 = vst [vmem:[#allocation90_spill] sm:$0xff] %v11855_v19  ;;  %v4269_v59 = vpop.f32.mrb[135].mxu1 }
 0x2c1   : > { %v11858_v62 = vpop.f32.mrb[136].mxu1 }
 0x2c2   : > { %13699 = vst [vmem:[#allocation91_spill] sm:$0xff] %v11858_v62  ;;  %v4274_v33 = vpop.f32.mrb[137].mxu1 }
 0x2c3   : > { %v11863_v31 = vpop.f32.mrb[138].mxu1 }
 0x2c4   : > { %13700 = vst [vmem:[#allocation92_spill] sm:$0xff] %v11863_v31  ;;  %v4277_v49 = vpop.f32.mrb[139].mxu1  ;;  %v9895_v31 = vld [vmem:[%s13601_s1 + $0x240] ss:$28 sps:$4 sm:$0xff]  }
 0x2c5   : > { %4865 = vmatmul.mubr.bf16.gmra.mrb[32].mxu0 %v9889_v57  ;;  %v9893_v57 = vld [vmem:[%s13601_s1 + $0x244] ss:$28 sps:$4 sm:$0xff]   ;;  %v11868_v11 = vpop.f32.mrb[140].mxu1  ;;  %v9898_v49 = vld [vmem:[%s13601_s1 + $0x27c] ss:$28 sps:$4 sm:$0xff]  }
 0x2c6   : > { %4872 = vmatprep.mubr.bf16.mxu0 %v9890_v4  ;;  %13701 = vst [vmem:[#allocation93_spill] sm:$0xff] %v11868_v11  ;;  %v4282_v4 = vpop.f32.mrb[141].mxu1 }
 0x2c7   : > { %v11870_v18 = vpop.f32.mrb[142].mxu1 }
 0x2c8   : > { %13702 = vst [vmem:[#allocation94_spill] sm:$0xff] %v11870_v18  ;;  %v4285_v59 = vpop.f32.mrb[143].mxu1  ;;  %v9909_v18 = vld [vmem:[%s13601_s1 + $0x324] ss:$28 sps:$4 sm:$0xff]  }
 0x2c9   : > { %v11872_v33 = vpop.f32.mrb[144].mxu1 }
 0x2ca   : > { %13703 = vst [vmem:[#allocation95_spill] sm:$0xff] %v11872_v33  ;;  %v4290_v62 = vpop.f32.mrb[145].mxu1 }
 0x2cb   : > { %v11877_v19 = vpop.f32.mrb[146].mxu1  ;;  %v9961_v62 = vld [vmem:[%s13601_s1 + $0x600] ss:$28 sps:$4 sm:$0xff]  }
 0x2cc   : > { %13704 = vst [vmem:[#allocation96_spill] sm:$0xff] %v11877_v19  ;;  %v4293_v11 = vpop.f32.mrb[147].mxu1 }
 0x2cd   : > { %4873 = vmatmul.mubr.bf16.gmra.mrb[36].mxu0 %v9892_v47  ;;  %v11882_v4 = vpop.f32.mrb[148].mxu1  ;;  %v9960_v47 = vld [vmem:[%s13601_s1 + $0x5c8] ss:$28 sps:$4 sm:$0xff]  }
 0x2ce   : > { %4880 = vmatprep.mubr.bf16.mxu0 %v9893_v57  ;;  %13705 = vst [vmem:[#allocation97_spill] sm:$0xff] %v11882_v4  ;;  %v4298_v57 = vpop.f32.mrb[149].mxu1  ;;  %8839 = vmatprep.mubr.msk.bf16.mxu1 %vm3651_vm0, %v9960_v47  ;;  %v9900_v4 = vld [vmem:[%s13601_s1 + $0x278] ss:$28 sps:$4 sm:$0xff]   ;;  %v9903_v47 = vld [vmem:[%s13601_s1 + $0x2b0] ss:$28 sps:$4 sm:$0xff]  }
 0x2cf   : > { %v11891_v59 = vpop.f32.mrb[150].mxu1  ;;  %8840 = vmatmul.mubr.msk.bf16.gmra.mrb[204].mxu1 %vm3651_vm0, %v9961_v62  ;;  %v9901_v57 = vld [vmem:[%s13601_s1 + $0x2b4] ss:$28 sps:$4 sm:$0xff]   ;;  %v9906_v62 = vld [vmem:[%s13601_s1 + $0x2ec] ss:$28 sps:$4 sm:$0xff]  }
 0x2d0   : > { %13706 = vst [vmem:[#allocation98_spill] sm:$0xff] %v11891_v59  ;;  %v4301_v11 = vpop.f32.mrb[151].mxu1 }
 0x2d1   : > { %v11900_v19 = vpop.f32.mrb[152].mxu1  ;;  %v9968_v11 = vld [vmem:[%s13601_s1 + $0x638] ss:$28 sps:$4 sm:$0xff]  }
 0x2d2   : > { %v11902_v33 = vpop.f32.mrb[153].mxu1  ;;  %8843 = vmatprep.mubr.msk.bf16.mxu1 %vm3651_vm0, %v9968_v11  ;;  %v9914_v11 = vld [vmem:[%s13601_s1 + $0x35c] ss:$28 sps:$4 sm:$0xff]  }
 0x2d5   : > { %4881 = vmatmul.mubr.bf16.gmra.mrb[40].mxu0 %v9895_v31  ;;  %v11904_v31 = vpop.f32.mrb[154].mxu1 }
 0x2d6   : > { %4888 = vmatprep.mubr.bf16.mxu0 %v9898_v49  ;;  %v11906_v49 = vpop.f32.mrb[155].mxu1 }
 0x2d7   : > { %v11925_v59 = vpop.f32.mrb[156].mxu1 }
 0x2d8   : > { %v11930_v44 = vpop.f32.mrb[157].mxu1 }
 0x2d9   : > { %v11932_v40 = vpop.f32.mrb[158].mxu1 }
 0x2dd   : > { %4889 = vmatmul.mubr.bf16.gmra.mrb[44].mxu0 %v9900_v4  ;;  %v9969_v4 = vld [vmem:[%s13601_s1 + $0x670] ss:$28 sps:$4 sm:$0xff]  }
 0x2de   : > { %4896 = vmatprep.mubr.bf16.mxu0 %v9901_v57  ;;  %8844 = vmatmul.mubr.msk.bf16.gmra.mrb[208].mxu1 %vm3651_vm0, %v9969_v4  ;;  %v9908_v57 = vld [vmem:[%s13601_s1 + $0x2e8] ss:$28 sps:$4 sm:$0xff]  }
 0x2df   : > { %v9976_v4 = vld [vmem:[%s13601_s1 + $0x6a8] ss:$28 sps:$4 sm:$0xff]  }
 0x2e0   : > { %8847 = vmatprep.mubr.msk.bf16.mxu1 %vm3651_vm0, %v9976_v4  ;;  %v9922_v4 = vld [vmem:[%s13601_s1 + $0x3cc] ss:$28 sps:$4 sm:$0xff]  }
 0x2e5   : > { %4897 = vmatmul.mubr.bf16.gmra.mrb[48].mxu0 %v9903_v47  ;;  %v11934_v47 = vpop.f32.mrb[159].mxu1 }
 0x2e6   : > { %4904 = vmatprep.mubr.bf16.mxu0 %v9906_v62  ;;  %v9911_v62 = vld [vmem:[%s13601_s1 + $0x320] ss:$28 sps:$4 sm:$0xff]   ;;  %8848 = vmatmul.mubr.msk.bf16.gmra.mrb[212].mxu1 %vm3651_vm0, %v9977_v24  ;;  %v9919_v24 = vld [vmem:[%s13601_s1 + $0x390] ss:$28 sps:$4 sm:$0xff]  }
 0x2ed   : > { %4905 = vmatmul.mubr.bf16.gmra.mrb[52].mxu0 %v9908_v57  ;;  %v11953_v57 = vpop.f32.mrb[160].mxu1 }
 0x2ee   : > { %4912 = vmatprep.mubr.bf16.mxu0 %v9909_v18  ;;  %v9916_v18 = vld [vmem:[%s13601_s1 + $0x358] ss:$28 sps:$4 sm:$0xff]   ;;  %v11958_v6 = vpop.f32.mrb[161].mxu1 }
 0x2ef   : > { %v11960_v3 = vpop.f32.mrb[162].mxu1 }
 0x2f5   : > { %4913 = vmatmul.mubr.bf16.gmra.mrb[56].mxu0 %v9911_v62  ;;  %v11962_v62 = vpop.f32.mrb[163].mxu1 }
 0x2f6   : > { %4920 = vmatprep.mubr.bf16.mxu0 %v9914_v11  ;;  %v9984_v11 = vld [vmem:[%s13601_s1 + $0x718] ss:$28 sps:$4 sm:$0xff]  }
 0x2f7   : > { %8851 = vmatprep.mubr.msk.bf16.mxu1 %vm3651_vm0, %v9984_v11 }
 0x2f8   : > { %8852 = vmatmul.mubr.msk.bf16.gmra.mrb[216].mxu1 %vm3651_vm0, %v9985_v56  ;;  %v9990_v56 = vld [vmem:[%s13601_s1 + $0x7c0] ss:$28 sps:$4 sm:$0xff]  }
 0x2f9   : > { %8855 = vmatprep.mubr.msk.bf16.mxu1 %vm3651_vm0, %v9989_v53  ;;  %v9930_v53 = vld [vmem:[%s13601_s1 + $0x43c] ss:$28 sps:$4 sm:$0xff]  }
 0x2fd   : > { %4921 = vmatmul.mubr.bf16.gmra.mrb[60].mxu0 %v9916_v18  ;;  %v11981_v18 = vpop.f32.mrb[164].mxu1 }
 0x2fe   : > { %4928 = vmatprep.mubr.bf16.mxu0 %v9917_v21  ;;  %v9924_v21 = vld [vmem:[%s13601_s1 + $0x3c8] ss:$28 sps:$4 sm:$0xff]   ;;  %v11989_v42 = vpop.f32.mrb[165].mxu1 }
 0x300   : > { %8856 = vmatmul.mubr.msk.bf16.gmra.mrb[220].mxu1 %vm3651_vm0, %v9990_v56  ;;  %v9995_v56 = vld [vmem:[%s13601_s1 + $0x830] ss:$28 sps:$4 sm:$0xff]  }
 0x301   : > { %8859 = vmatprep.mubr.msk.bf16.mxu1 %vm3651_vm0, %v9994_v8  ;;  %v10000_v8 = vld [vmem:[%s13601_s1 + $0x8a0] ss:$28 sps:$4 sm:$0xff]  }
 0x305   : > { %4929 = vmatmul.mubr.bf16.gmra.mrb[64].mxu0 %v9919_v24  ;;  %v11995_v24 = vpop.f32.mrb[166].mxu1 }
 0x306   : > { %4936 = vmatprep.mubr.bf16.mxu0 %v9922_v4  ;;  %v11998_v11 = vpop.f32.mrb[167].mxu1  ;;  %v9927_v4 = vld [vmem:[%s13601_s1 + $0x400] ss:$28 sps:$4 sm:$0xff]  }
 0x308   : > { %8860 = vmatmul.mubr.msk.bf16.gmra.mrb[224].mxu1 %vm3651_vm0, %v9995_v56  ;;  %v9935_v56 = vld [vmem:[%s13601_s1 + $0x470] ss:$28 sps:$4 sm:$0xff]  }
 0x309   : > { %8863 = vmatprep.mubr.msk.bf16.mxu1 %vm3651_vm0, %v9999_v39  ;;  %v10005_v39 = vld [vmem:[%s13601_s1 + $0x910] ss:$28 sps:$4 sm:$0xff]  }
 0x30d   : > { %4937 = vmatmul.mubr.bf16.gmra.mrb[68].mxu0 %v9924_v21  ;;  %v12017_v21 = vpop.f32.mrb[168].mxu1 }
 0x30e   : > { %4944 = vmatprep.mubr.bf16.mxu0 %v9925_v29  ;;  %v9932_v29 = vld [vmem:[%s13601_s1 + $0x438] ss:$28 sps:$4 sm:$0xff]   ;;  %v12025_v28 = vpop.f32.mrb[169].mxu1 }
 0x310   : > { %8864 = vmatmul.mubr.msk.bf16.gmra.mrb[228].mxu1 %vm3651_vm0, %v10000_v8  ;;  %v10009_v8 = vld [vmem:[%s13601_s1 + $0x948] ss:$28 sps:$4 sm:$0xff]  }
 0x311   : > { %8867 = vmatprep.mubr.msk.bf16.mxu1 %vm3651_vm0, %v10004_v15 }
 0x315   : > { %4945 = vmatmul.mubr.bf16.gmra.mrb[72].mxu0 %v9927_v4  ;;  %v12030_v4 = vpop.f32.mrb[170].mxu1 }
 0x316   : > { %4952 = vmatprep.mubr.bf16.mxu0 %v9930_v53  ;;  %v12033_v53 = vpop.f32.mrb[171].mxu1 }
 0x318   : > { %8868 = vmatmul.mubr.msk.bf16.gmra.mrb[232].mxu1 %vm3651_vm0, %v10005_v39  ;;  %v9943_v39 = vld [vmem:[%s13601_s1 + $0x4e0] ss:$28 sps:$4 sm:$0xff]  }
 0x319   : > { %8871 = vmatprep.mubr.msk.bf16.mxu1 %vm3651_vm0, %v10009_v8  ;;  %v10015_v8 = vld [vmem:[%s13601_s1 + $0x9f0] ss:$28 sps:$4 sm:$0xff]  }
 0x31d   : > { %4953 = vmatmul.mubr.bf16.gmra.mrb[76].mxu0 %v9932_v29 }
 0x31e   : > { %4960 = vmatprep.mubr.bf16.mxu0 %v9933_v48  ;;  %v9940_v48 = vld [vmem:[%s13601_s1 + $0x4a8] ss:$28 sps:$4 sm:$0xff]  }
 0x322   : > { %v12053_v29 = vpop.f32.mrb[172].mxu1 }
 0x323   : > { %v12061_v14 = vpop.f32.mrb[173].mxu1 }
 0x324   : > { %v12066_v15 = vpop.f32.mrb[174].mxu1 }
 0x325   : > { %4961 = vmatmul.mubr.bf16.gmra.mrb[80].mxu0 %v9935_v56  ;;  %v12069_v56 = vpop.f32.mrb[175].mxu1 }
 0x326   : > { %4968 = vmatprep.mubr.bf16.mxu0 %v9938_v25  ;;  %v10010_v25 = vld [vmem:[%s13601_s1 + $0x980] ss:$28 sps:$4 sm:$0xff]  }
 0x327   : > { %8872 = vmatmul.mubr.msk.bf16.gmra.mrb[236].mxu1 %vm3651_vm0, %v10010_v25  ;;  %v10019_v25 = vld [vmem:[%s13601_s1 + $0xa28] ss:$28 sps:$4 sm:$0xff]  }
 0x328   : > { %8875 = vmatprep.mubr.msk.bf16.mxu1 %vm3651_vm0, %v10014_v41 }
 0x32d   : > { %4969 = vmatmul.mubr.bf16.gmra.mrb[84].mxu0 %v9940_v48  ;;  %v12089_v48 = vpop.f32.mrb[176].mxu1 }
 0x32e   : > { %4976 = vmatprep.mubr.bf16.mxu0 %v9941_v17  ;;  %v9948_v17 = vld [vmem:[%s13601_s1 + $0x518] ss:$28 sps:$4 sm:$0xff]   ;;  %13707 = vst [vmem:[#allocation99_spill] sm:$0xff] %v12089_v48  ;;  %v12097_v50 = vpop.f32.mrb[177].mxu1 }
 0x32f   : > { %8876 = vmatmul.mubr.msk.bf16.gmra.mrb[240].mxu1 %vm3651_vm0, %v10015_v8  ;;  %v12102_v41 = vpop.f32.mrb[178].mxu1  ;;  %v9951_v8 = vld [vmem:[%s13601_s1 + $0x550] ss:$28 sps:$4 sm:$0xff]  }
 0x330   : > { %13708 = vst [vmem:[#allocation100_spill] sm:$0xff] %v12102_v41  ;;  %8879 = vmatprep.mubr.msk.bf16.mxu1 %vm3651_vm0, %v10019_v25  ;;  %v10025_v25 = vld [vmem:[%s13601_s1 + $0xad0] ss:$28 sps:$4 sm:$0xff]  }
 0x331   : > { %v9965_v48 = vld [vmem:[%s13601_s1 + $0x634] ss:$28 sps:$4 sm:$0xff]  }
 0x335   : > { %4977 = vmatmul.mubr.bf16.gmra.mrb[88].mxu0 %v9943_v39  ;;  %v12105_v39 = vpop.f32.mrb[179].mxu1 }
 0x336   : > { %4984 = vmatprep.mubr.bf16.mxu0 %v9946_v10  ;;  %v10020_v10 = vld [vmem:[%s13601_s1 + $0xa60] ss:$28 sps:$4 sm:$0xff]   ;;  %13709 = vst [vmem:[#allocation101_spill] sm:$0xff] %v12105_v39 }
 0x337   : > { %8880 = vmatmul.mubr.msk.bf16.gmra.mrb[244].mxu1 %vm3651_vm0, %v10020_v10  ;;  %v10029_v10 = vld [vmem:[%s13601_s1 + $0xb08] ss:$28 sps:$4 sm:$0xff]  }
 0x338   : > { %8883 = vmatprep.mubr.msk.bf16.mxu1 %vm3651_vm0, %v10024_v35 }
 0x33d   : > { %4985 = vmatmul.mubr.bf16.gmra.mrb[92].mxu0 %v9948_v17 }
 0x33e   : > { %4992 = vmatprep.mubr.bf16.mxu0 %v9949_v58  ;;  %v9956_v58 = vld [vmem:[%s13601_s1 + $0x588] ss:$28 sps:$4 sm:$0xff]  }
 0x33f   : > { %8884 = vmatmul.mubr.msk.bf16.gmra.mrb[248].mxu1 %vm3651_vm0, %v10025_v25  ;;  %v9959_v25 = vld [vmem:[%s13601_s1 + $0x5c0] ss:$28 sps:$4 sm:$0xff]  }
 0x340   : > { %8887 = vmatprep.mubr.msk.bf16.mxu1 %vm3651_vm0, %v10029_v10  ;;  %v10035_v10 = vld [vmem:[%s13601_s1 + $0xbb0] ss:$28 sps:$4 sm:$0xff]  }
 0x343   : > { %v12125_v17 = vpop.f32.mrb[180].mxu1 }
 0x344   : > { %13710 = vst [vmem:[#allocation102_spill] sm:$0xff] %v12125_v17  ;;  %v12133_v41 = vpop.f32.mrb[181].mxu1  ;;  %v10034_v17 = vld [vmem:[%s13601_s1 + $0xb78] ss:$28 sps:$4 sm:$0xff]  }
 0x345   : > { %4993 = vmatmul.mubr.bf16.gmra.mrb[96].mxu0 %v9951_v8  ;;  %13711 = vst [vmem:[#allocation103_spill] sm:$0xff] %v12133_v41  ;;  %v12138_v35 = vpop.f32.mrb[182].mxu1 }
 0x346   : > { %5000 = vmatprep.mubr.bf16.mxu0 %v9954_v38  ;;  %v10030_v38 = vld [vmem:[%s13601_s1 + $0xb40] ss:$28 sps:$4 sm:$0xff]   ;;  %13712 = vst [vmem:[#allocation104_spill] sm:$0xff] %v12138_v35  ;;  %v12141_v8 = vpop.f32.mrb[183].mxu1 }
 0x347   : > { %13713 = vst [vmem:[#allocation105_spill] sm:$0xff] %v12141_v8  ;;  %8888 = vmatmul.mubr.msk.bf16.gmra.mrb[252].mxu1 %vm3651_vm0, %v10030_v38  ;;  %v9962_v35 = vld [vmem:[%s13601_s1 + $0x5fc] ss:$28 sps:$4 sm:$0xff]  }
 0x348   : > { %8891 = vmatprep.mubr.msk.bf16.mxu1 %vm3651_vm0, %v10034_v17  ;;  %v9964_v8 = vld [vmem:[%s13601_s1 + $0x5f8] ss:$28 sps:$4 sm:$0xff]  }
 0x34d   : > { %5001 = vmatmul.mubr.bf16.gmra.mrb[100].mxu0 %v9956_v58 }
 0x34e   : > { %5008 = vmatprep.mubr.bf16.mxu0 %v9957_v1 }
 0x34f   : > { %8892 = vmatmul.mubr.msk.bf16.gmra.mrb[0].mxu1 %vm3651_vm0, %v10035_v10  ;;  %v12162_v41 = vpop.f32.mrb[184].mxu1 }
 0x350   : > { %13714 = vst [vmem:[#allocation106_spill] sm:$0xff] %v12162_v41  ;;  %v12167_v17 = vpop.f32.mrb[185].mxu1 }
 0x351   : > { %13715 = vst [vmem:[#allocation107_spill] sm:$0xff] %v12167_v17 }
 0x355   : > { %5009 = vmatmul.mubr.bf16.gmra.mrb[104].mxu0 %v9959_v25 }
 0x356   : > { %5016 = vmatprep.mubr.bf16.mxu0 %v9962_v35 }
 0x358   : > { %v4802_v1 = vpop.f32.mrb[0].mxu0 }
 0x359   : > { %v8963_v58 = vadd.f32 %v4802_v1, %v11292_v23  ;;  %v4804_v38 = vpop.f32.mrb[1].mxu0  ;;  %v12171_v23 = vpop.f32.mrb[186].mxu1 }
 0x35a   : > { %v4805_v61 = vpop.f32.mrb[2].mxu0  ;;  %v12173_v1 = vpop.f32.mrb[187].mxu1  ;;  %v10041_v38 = vld [vmem:[%s13603_s3 + $0x4] ss:$28 sps:$4 sm:$0xff]  }
 0x35b   : > { %v8964_v25 = vadd.f32 %v4805_v61, %v11311_v34  ;;  %v5268_v35 = vadd.f32 %v8963_v58, %v11902_v33  ;;  %v4807_v10 = vpop.f32.mrb[3].mxu0  ;;  %6821 = vmatprep.mubr.bf16.mxu1 %v10041_v38  ;;  %v9967_v58 = vld [vmem:[%s13601_s1 + $0x630] ss:$28 sps:$4 sm:$0xff]  }
 0x35d   : > { %v5271_v41 = vadd.f32 %v8964_v25, %v11906_v49  ;;  %5017 = vmatmul.mubr.bf16.gmra.mrb[108].mxu0 %v9964_v8  ;;  %v5698_v20 = vmax.f32 %v5268_v35, 0.0  ;;  %v9970_v49 = vld [vmem:[%s13601_s1 + $0x66c] ss:$28 sps:$4 sm:$0xff]  }
 0x35e   : > { %5024 = vmatprep.mubr.bf16.mxu0 %v9965_v48 }
 0x35f   : > { %v5699_v17 = vmax.f32 %v5271_v41, 0.0 }
 0x360   : > { %v4810_v39 = vpop.f32.mrb[4].mxu0 }
 0x361   : > { %v12179_v34 = vpack.c.bf16 %v5699_v17, %v5698_v20  ;;  %v8965_v61 = vadd.f32 %v4810_v39, %v11325_v46  ;;  %v4812_v33 = vpop.f32.mrb[5].mxu0 }
 0x362   : > { %v4813_v10 = vpop.f32.mrb[6].mxu0  ;;  %v9972_v33 = vld [vmem:[%s13601_s1 + $0x668] ss:$28 sps:$4 sm:$0xff]  }
 0x363   : > { %v5276_v48 = vadd.f32 %v8965_v61, %v11900_v19  ;;  %v8966_v8 = vadd.f32 %v4813_v10, %v11338_v52  ;;  %v4815_v41 = vpop.f32.mrb[7].mxu0  ;;  %v12197_v19 = vpop.f32.mrb[188].mxu1 }
 0x364   : > { %v12202_v61 = vpop.f32.mrb[189].mxu1 }
 0x365   : > { %v5279_v20 = vadd.f32 %v8966_v8, %v11904_v31  ;;  %5025 = vmatmul.mubr.bf16.gmra.mrb[112].mxu0 %v9967_v58  ;;  %v5700_v46 = vmax.f32 %v5276_v48, 0.0  ;;  %v9973_v31 = vld [vmem:[%s13601_s1 + $0x6a4] ss:$28 sps:$4 sm:$0xff]  }
 0x366   : > { %5032 = vmatprep.mubr.bf16.mxu0 %v9970_v49 }
 0x367   : > { %v5701_v39 = vmax.f32 %v5279_v20, 0.0 }
 0x368   : > { %v4818_v17 = vpop.f32.mrb[8].mxu0 }
 0x369   : > { %v12191_v25 = vpack.c.bf16 %v5701_v39, %v5700_v46  ;;  %v8967_v35 = vadd.f32 %v4818_v17, %v11359_v2  ;;  %v4820_v38 = vpop.f32.mrb[9].mxu0  ;;  %v12206_v2 = vpop.f32.mrb[190].mxu1 }
 0x36a   : > { %v4821_v52 = vpop.f32.mrb[10].mxu0  ;;  %v12208_v48 = vpop.f32.mrb[191].mxu1 }
 0x36b   : > { %v8968_v58 = vadd.f32 %v4821_v52, %v11365_v9  ;;  %v5284_v10 = vadd.f32 %v8967_v35, %v11930_v44  ;;  %v4823_v49 = vpop.f32.mrb[11].mxu0  ;;  %v9975_v44 = vld [vmem:[%s13601_s1 + $0x6a0] ss:$28 sps:$4 sm:$0xff]  }
 0x36c   : > { %v9978_v35 = vld [vmem:[%s13601_s1 + $0x6dc] ss:$28 sps:$4 sm:$0xff]  }
 0x36d   : > { %v5287_v8 = vadd.f32 %v8968_v58, %v11934_v47  ;;  %5033 = vmatmul.mubr.bf16.gmra.mrb[116].mxu0 %v9972_v33  ;;  %v5702_v41 = vmax.f32 %v5284_v10, 0.0 }
 0x36e   : > { %5040 = vmatprep.mubr.bf16.mxu0 %v9973_v31 }
 0x36f   : > { %v5703_v20 = vmax.f32 %v5287_v8, 0.0 }
 0x370   : > { %v4826_v46 = vpop.f32.mrb[12].mxu0 }
 0x371   : > { %v12211_v39 = vpack.c.bf16 %v5703_v20, %v5702_v41  ;;  %v8969_v17 = vadd.f32 %v4826_v46, %v11393_v37  ;;  %v4828_v38 = vpop.f32.mrb[13].mxu0  ;;  %v9980_v20 = vld [vmem:[%s13601_s1 + $0x6d8] ss:$28 sps:$4 sm:$0xff]  }
 0x372   : > { %v4829_v9 = vpop.f32.mrb[14].mxu0 }
 0x373   : > { %v5292_v47 = vadd.f32 %v8969_v17, %v11925_v59  ;;  %v8970_v33 = vadd.f32 %v4829_v9, %v11406_v51  ;;  %v4831_v52 = vpop.f32.mrb[15].mxu0  ;;  %v12229_v59 = vpop.f32.mrb[192].mxu1 }
 0x374   : > { %v12234_v46 = vpop.f32.mrb[193].mxu1 }
 0x375   : > { %v5295_v31 = vadd.f32 %v8970_v33, %v11932_v40  ;;  %5041 = vmatmul.mubr.bf16.gmra.mrb[120].mxu0 %v9975_v44  ;;  %v5704_v37 = vmax.f32 %v5292_v47, 0.0  ;;  %v9981_v40 = vld [vmem:[%s13601_s1 + $0x714] ss:$28 sps:$4 sm:$0xff]  }
 0x376   : > { %5048 = vmatprep.mubr.bf16.mxu0 %v9978_v35 }
 0x377   : > { %v5705_v58 = vmax.f32 %v5295_v31, 0.0 }
 0x378   : > { %v4834_v10 = vpop.f32.mrb[16].mxu0 }
 0x379   : > { %v12223_v49 = vpack.c.bf16 %v5705_v58, %v5704_v37  ;;  %v8971_v8 = vadd.f32 %v4834_v10, %v11442_v45  ;;  %v4836_v41 = vpop.f32.mrb[17].mxu0  ;;  %v12238_v45 = vpop.f32.mrb[194].mxu1  ;;  %v9986_v10 = vld [vmem:[%s13601_s1 + $0x74c] ss:$28 sps:$4 sm:$0xff]  }
 0x37a   : > { %v4837_v51 = vpop.f32.mrb[18].mxu0  ;;  %v12240_v9 = vpop.f32.mrb[195].mxu1 }
 0x37b   : > { %v8972_v17 = vadd.f32 %v4837_v51, %v11457_v5  ;;  %v5300_v38 = vadd.f32 %v8971_v8, %v11958_v6  ;;  %v4839_v44 = vpop.f32.mrb[19].mxu0  ;;  %v9983_v6 = vld [vmem:[%s13601_s1 + $0x710] ss:$28 sps:$4 sm:$0xff]  }
 0x37d   : > { %v5303_v35 = vadd.f32 %v8972_v17, %v11962_v62  ;;  %5049 = vmatmul.mubr.bf16.gmra.mrb[124].mxu0 %v9980_v20  ;;  %v5706_v47 = vmax.f32 %v5300_v38, 0.0 }
 0x37e   : > { %5056 = vmatprep.mubr.bf16.mxu0 %v9981_v40 }
 0x37f   : > { %v5707_v33 = vmax.f32 %v5303_v35, 0.0  ;;  %v9988_v35 = vld [vmem:[%s13601_s1 + $0x748] ss:$28 sps:$4 sm:$0xff]  }
 0x380   : > { %v4842_v52 = vpop.f32.mrb[20].mxu0 }
 0x381   : > { %v12243_v31 = vpack.c.bf16 %v5707_v33, %v5706_v47  ;;  %v8973_v37 = vadd.f32 %v4842_v52, %v11480_v63  ;;  %v4844_v58 = vpop.f32.mrb[21].mxu0 }
 0x382   : > { %v4845_v5 = vpop.f32.mrb[22].mxu0 }
 0x383   : > { %v5308_v62 = vadd.f32 %v8973_v37, %v11953_v57  ;;  %v8974_v8 = vadd.f32 %v4845_v5, %v11499_v12  ;;  %v4847_v41 = vpop.f32.mrb[23].mxu0  ;;  %v12261_v57 = vpop.f32.mrb[196].mxu1 }
 0x384   : > { %v12266_v47 = vpop.f32.mrb[197].mxu1 }
 0x385   : > { %v5311_v20 = vadd.f32 %v8974_v8, %v11960_v3  ;;  %5057 = vmatmul.mubr.bf16.gmra.mrb[128].mxu0 %v9983_v6  ;;  %v5708_v63 = vmax.f32 %v5308_v62, 0.0  ;;  %v9991_v3 = vld [vmem:[%s13601_s1 + $0x784] ss:$28 sps:$4 sm:$0xff]  }
 0x386   : > { %5064 = vmatprep.mubr.bf16.mxu0 %v9986_v10 }
 0x387   : > { %v5709_v51 = vmax.f32 %v5311_v20, 0.0 }
 0x388   : > { %v4850_v40 = vpop.f32.mrb[24].mxu0 }
 0x389   : > { %v12255_v17 = vpack.c.bf16 %v5709_v51, %v5708_v63  ;;  %v8975_v38 = vadd.f32 %v4850_v40, %v11532_v22  ;;  %v4852_v44 = vpop.f32.mrb[25].mxu0  ;;  %v12270_v22 = vpop.f32.mrb[198].mxu1  ;;  %v9996_v63 = vld [vmem:[%s13601_s1 + $0x7bc] ss:$28 sps:$4 sm:$0xff]  }
 0x38a   : > { %v4853_v12 = vpop.f32.mrb[26].mxu0  ;;  %v12272_v58 = vpop.f32.mrb[199].mxu1 }
 0x38b   : > { %v8976_v33 = vadd.f32 %v4853_v12, %v11544_v7  ;;  %v5316_v52 = vadd.f32 %v8975_v38, %v11989_v42  ;;  %v4855_v37 = vpop.f32.mrb[27].mxu0  ;;  %v9993_v42 = vld [vmem:[%s13601_s1 + $0x780] ss:$28 sps:$4 sm:$0xff]  }
 0x38d   : > { %v5319_v6 = vadd.f32 %v8976_v33, %v11998_v11  ;;  %5065 = vmatmul.mubr.bf16.gmra.mrb[132].mxu0 %v9988_v35  ;;  %v5710_v5 = vmax.f32 %v5316_v52, 0.0  ;;  %v9998_v52 = vld [vmem:[%s13601_s1 + $0x7b8] ss:$28 sps:$4 sm:$0xff]  }
 0x38e   : > { %5072 = vmatprep.mubr.bf16.mxu0 %v9991_v3 }
 0x38f   : > { %v5711_v10 = vmax.f32 %v5319_v6, 0.0 }
 0x390   : > { %v4858_v62 = vpop.f32.mrb[28].mxu0 }
 0x391   : > { %v12275_v8 = vpack.c.bf16 %v5711_v10, %v5710_v5  ;;  %v8977_v41 = vadd.f32 %v4858_v62, %v11578_v60  ;;  %v4860_v20 = vpop.f32.mrb[29].mxu0 }
 0x392   : > { %v4861_v7 = vpop.f32.mrb[30].mxu0 }
 0x393   : > { %v5324_v11 = vadd.f32 %v8977_v41, %v11981_v18  ;;  %v8978_v51 = vadd.f32 %v4861_v7, %v11594_v26  ;;  %v4863_v40 = vpop.f32.mrb[31].mxu0  ;;  %v12293_v18 = vpop.f32.mrb[200].mxu1 }
 0x394   : > { %v12298_v37 = vpop.f32.mrb[201].mxu1  ;;  %v10006_v40 = vld [vmem:[%s13601_s1 + $0x82c] ss:$28 sps:$4 sm:$0xff]  }
 0x395   : > { %v5327_v38 = vadd.f32 %v8978_v51, %v11995_v24  ;;  %5073 = vmatmul.mubr.bf16.gmra.mrb[136].mxu0 %v9993_v42  ;;  %v5712_v60 = vmax.f32 %v5324_v11, 0.0  ;;  %v10001_v24 = vld [vmem:[%s13601_s1 + $0x7f4] ss:$28 sps:$4 sm:$0xff]  }
 0x396   : > { %5080 = vmatprep.mubr.bf16.mxu0 %v9996_v63 }
 0x397   : > { %v5713_v44 = vmax.f32 %v5327_v38, 0.0 }
 0x398   : > { %v4866_v35 = vpop.f32.mrb[32].mxu0 }
 0x399   : > { %v12287_v12 = vpack.c.bf16 %v5713_v44, %v5712_v60  ;;  %v8979_v3 = vadd.f32 %v4866_v35, %v11283_v16  ;;  %v4868_v33 = vpop.f32.mrb[33].mxu0  ;;  %v12302_v16 = vpop.f32.mrb[202].mxu1 }
 0x39a   : > { %v4869_v26 = vpop.f32.mrb[34].mxu0  ;;  %v12304_v62 = vpop.f32.mrb[203].mxu1 }
 0x39b   : > { %v5332_v6 = vadd.f32 %v8979_v3, %v12025_v28  ;;  %v8980_v5 = vadd.f32 %v4869_v26, %v11297_v27  ;;  %v4871_v10 = vpop.f32.mrb[35].mxu0  ;;  %v10003_v28 = vld [vmem:[%s13601_s1 + $0x7f0] ss:$28 sps:$4 sm:$0xff]  }
 0x39d   : > { %v5335_v41 = vadd.f32 %v8980_v5, %v12033_v53  ;;  %5081 = vmatmul.mubr.bf16.gmra.mrb[140].mxu0 %v9998_v52  ;;  %v5714_v20 = vmax.f32 %v5332_v6, 0.0 }
 0x39e   : > { %5088 = vmatprep.mubr.bf16.mxu0 %v10001_v24 }
 0x39f   : > { %v5715_v42 = vmax.f32 %v5335_v41, 0.0 }
 0x3a0   : > { %v4874_v7 = vpop.f32.mrb[36].mxu0 }
 0x3a1   : > { %v8981_v63 = vadd.f32 %v4874_v7, %v11313_v36  ;;  %v4876_v11 = vpop.f32.mrb[37].mxu0  ;;  %v5814_v51 = vpack.c.bf16 %v5715_v42, %v5714_v20 }
 0x3a2   : > { %v4877_v27 = vpop.f32.mrb[38].mxu0 }
 0x3a3   : > { %v5340_v53 = vadd.f32 %v8981_v63, %v12017_v21  ;;  %v8982_v38 = vadd.f32 %v4877_v27, %v11323_v43  ;;  %v4879_v60 = vpop.f32.mrb[39].mxu0  ;;  %8382 = vmatprep.subr.bf16.mxu1 %v5814_v51  ;;  %v10008_v21 = vld [vmem:[%s13601_s1 + $0x828] ss:$28 sps:$4 sm:$0xff]   ;;  %v12322_v43 = vpop.f32.mrb[204].mxu1 }
 0x3a4   : > { %8383 = vmatpush3.bf16.msra.mxu1 %v12179_v34  ;;  %v12327_v34 = vpop.f32.mrb[205].mxu1 }
 0x3a5   : > { %v5343_v36 = vadd.f32 %v8982_v38, %v12030_v4  ;;  %5089 = vmatmul.mubr.bf16.gmra.mrb[144].mxu0 %v10003_v28  ;;  %v5716_v44 = vmax.f32 %v5340_v53, 0.0  ;;  %v10011_v4 = vld [vmem:[%s13601_s1 + $0x864] ss:$28 sps:$4 sm:$0xff]   ;;  %v12331_v10 = vpop.f32.mrb[206].mxu1 }
 0x3a6   : > { %5096 = vmatprep.mubr.bf16.mxu0 %v10006_v40  ;;  %v12334_v41 = vpop.f32.mrb[207].mxu1 }
 0x3a7   : > { %v5717_v35 = vmax.f32 %v5343_v36, 0.0 }
 0x3a8   : > { %v4882_v3 = vpop.f32.mrb[40].mxu0 }
 0x3a9   : > { %v8983_v33 = vadd.f32 %v4882_v3, %v11343_v55  ;;  %v4884_v52 = vpop.f32.mrb[41].mxu0  ;;  %v5815_v26 = vpack.c.bf16 %v5717_v35, %v5716_v44 }
 0x3aa   : > { %v4885_v24 = vpop.f32.mrb[42].mxu0 }
 0x3ab   : > { %v8984_v6 = vadd.f32 %v4885_v24, %v11354_v0  ;;  %v5348_v5 = vadd.f32 %v8983_v33, %v12061_v14  ;;  %v4887_v55 = vpop.f32.mrb[43].mxu0  ;;  %8384 = vmatprep.subr.bf16.mxu1 %v5815_v26  ;;  %v10013_v14 = vld [vmem:[%s13601_s1 + $0x860] ss:$28 sps:$4 sm:$0xff]  }
 0x3ac   : > { %8385 = vmatpush3.bf16.msra.mxu1 %v12191_v25  ;;  %v10016_v25 = vld [vmem:[%s13601_s1 + $0x89c] ss:$28 sps:$4 sm:$0xff]  }
 0x3ad   : > { %v5351_v20 = vadd.f32 %v8984_v6, %v12069_v56  ;;  %5097 = vmatmul.mubr.bf16.gmra.mrb[148].mxu0 %v10008_v21  ;;  %v5718_v42 = vmax.f32 %v5348_v5, 0.0  ;;  %v13716_v24 = vld [vmem:[#allocation101_spill] sm:$0xff] }
 0x3ae   : > { %5104 = vmatprep.mubr.bf16.mxu0 %v10011_v4 }
 0x3af   : > { %v5719_v7 = vmax.f32 %v5351_v20, 0.0  ;;  %v13717_v20 = vld [vmem:[#allocation36_spill] sm:$0xff] }
 0x3b0   : > { %v4890_v63 = vpop.f32.mrb[44].mxu0 }
 0x3b1   : > { %v8985_v11 = vadd.f32 %v4890_v63, %v11367_v13  ;;  %v4892_v0 = vpop.f32.mrb[45].mxu0  ;;  %v5816_v51 = vpack.c.bf16 %v5719_v7, %v5718_v42 }
 0x3b2   : > { %v4893_v28 = vpop.f32.mrb[46].mxu0 }
 0x3b3   : > { %v5356_v56 = vadd.f32 %v8985_v11, %v12053_v29  ;;  %v8986_v27 = vadd.f32 %v4893_v28, %v11390_v32  ;;  %v4895_v40 = vpop.f32.mrb[47].mxu0  ;;  %8386 = vmatprep.subr.bf16.mxu1 %v5816_v51  ;;  %v10018_v29 = vld [vmem:[%s13601_s1 + $0x898] ss:$28 sps:$4 sm:$0xff]   ;;  %v12352_v32 = vpop.f32.mrb[208].mxu1  ;;  %v13718_v11 = vld [vmem:[#allocation99_spill] sm:$0xff]  ;;  %v13719_v51 = vld [vmem:[#allocation38_spill] sm:$0xff] }
 0x3b4   : > { %8387 = vmatpush3.bf16.msra.mxu1 %v12211_v39  ;;  %v12357_v39 = vpop.f32.mrb[209].mxu1 }
 0x3b5   : > { %v5359_v13 = vadd.f32 %v8986_v27, %v12066_v15  ;;  %5105 = vmatmul.mubr.bf16.gmra.mrb[152].mxu0 %v10013_v14  ;;  %v5720_v53 = vmax.f32 %v5356_v56, 0.0  ;;  %v10021_v15 = vld [vmem:[%s13601_s1 + $0x8d4] ss:$28 sps:$4 sm:$0xff]   ;;  %v12361_v26 = vpop.f32.mrb[210].mxu1 }
 0x3b6   : > { %5112 = vmatprep.mubr.bf16.mxu0 %v10016_v25  ;;  %v12364_v21 = vpop.f32.mrb[211].mxu1  ;;  %v13720_v25 = vld [vmem:[#allocation100_spill] sm:$0xff] }
 0x3b7   : > { %v5721_v38 = vmax.f32 %v5359_v13, 0.0 }
 0x3b8   : > { %v4898_v60 = vpop.f32.mrb[48].mxu0 }
 0x3b9   : > { %v8987_v36 = vadd.f32 %v4898_v60, %v11408_v54  ;;  %v4900_v44 = vpop.f32.mrb[49].mxu0  ;;  %v5817_v35 = vpack.c.bf16 %v5721_v38, %v5720_v53  ;;  %v13721_v53 = vld [vmem:[#allocation40_spill] sm:$0xff] }
 0x3ba   : > { %v4901_v3 = vpop.f32.mrb[50].mxu0  ;;  %v10028_v44 = vld [vmem:[%s13601_s1 + $0x908] ss:$28 sps:$4 sm:$0xff]  }
 0x3bb   : > { %v8988_v33 = vadd.f32 %v4901_v3, %v11437_v30  ;;  %v5364_v52 = vadd.f32 %v8987_v36, %v12097_v50  ;;  %v4903_v54 = vpop.f32.mrb[51].mxu0  ;;  %8388 = vmatprep.subr.bf16.mxu1 %v5817_v35  ;;  %v10023_v50 = vld [vmem:[%s13601_s1 + $0x8d0] ss:$28 sps:$4 sm:$0xff]   ;;  %v12382_v35 = vpop.f32.mrb[212].mxu1 }
 0x3bc   : > { %8389 = vmatpush3.bf16.msra.mxu1 %v12223_v49  ;;  %v10026_v49 = vld [vmem:[%s13601_s1 + $0x90c] ss:$28 sps:$4 sm:$0xff]   ;;  %v12387_v3 = vpop.f32.mrb[213].mxu1 }
 0x3bd   : > { %v5367_v4 = vadd.f32 %v8988_v33, %v13716_v24  ;;  %5113 = vmatmul.mubr.bf16.gmra.mrb[156].mxu0 %v10018_v29  ;;  %v5722_v6 = vmax.f32 %v5364_v52, 0.0  ;;  %v13723_v52 = vld [vmem:[#allocation103_spill] sm:$0xff] }
 0x3be   : > { %5120 = vmatprep.mubr.bf16.mxu0 %v10021_v15  ;;  %v13722_v15 = vld [vmem:[#allocation43_spill] sm:$0xff] }
 0x3bf   : > { %v5723_v5 = vmax.f32 %v5367_v4, 0.0  ;;  %v12391_v4 = vpop.f32.mrb[214].mxu1 }
 0x3c0   : > { %v4906_v55 = vpop.f32.mrb[52].mxu0 }
 0x3c1   : > { %v8989_v42 = vadd.f32 %v4906_v55, %v13717_v20  ;;  %v4908_v30 = vpop.f32.mrb[53].mxu0  ;;  %v5818_v7 = vpack.c.bf16 %v5723_v5, %v5722_v6  ;;  %v12394_v6 = vpop.f32.mrb[215].mxu1  ;;  %v13724_v5 = vld [vmem:[#allocation105_spill] sm:$0xff] }
 0x3c2   : > { %v4909_v63 = vpop.f32.mrb[54].mxu0 }
 0x3c3   : > { %v5372_v0 = vadd.f32 %v8989_v42, %v13718_v11  ;;  %v8990_v14 = vadd.f32 %v4909_v63, %v13719_v51  ;;  %v4911_v28 = vpop.f32.mrb[55].mxu0  ;;  %8390 = vmatprep.subr.bf16.mxu1 %v5818_v7  ;;  %v12397_v7 = vpop.permute.xlu1 %1138  ;;  %v10036_v51 = vld [vmem:[%s13601_s1 + $0x97c] ss:$28 sps:$4 sm:$0xff]  }
 0x3c4   : > { %8391 = vmatpush3.bf16.msra.mxu1 %v12243_v31  ;;  %v10031_v31 = vld [vmem:[%s13601_s1 + $0x944] ss:$28 sps:$4 sm:$0xff]  }
 0x3c5   : > { %v5375_v56 = vadd.f32 %v8990_v14, %v13720_v25  ;;  %5121 = vmatmul.mubr.bf16.gmra.mrb[160].mxu0 %v10023_v50  ;;  %v5724_v27 = vmax.f32 %v5372_v0, 0.0  ;;  %v13725_v50 = vld [vmem:[#allocation46_spill] sm:$0xff]  ;;  %v13727_v25 = vld [vmem:[#allocation48_spill] sm:$0xff] }
 0x3c6   : > { %5128 = vmatprep.mubr.bf16.mxu0 %v10026_v49  ;;  %v10033_v0 = vld [vmem:[%s13601_s1 + $0x940] ss:$28 sps:$4 sm:$0xff]  }
 0x3c7   : > { %v5725_v40 = vmax.f32 %v5375_v56, 0.0  ;;  %v13726_v14 = vld [vmem:[#allocation102_spill] sm:$0xff] }
 0x3c8   : > { %v4914_v13 = vpop.f32.mrb[56].mxu0 }
 0x3c9   : > { %v8991_v38 = vadd.f32 %v4914_v13, %v13721_v53  ;;  %v4916_v60 = vpop.f32.mrb[57].mxu0  ;;  %v5819_v36 = vpack.c.bf16 %v5725_v40, %v5724_v27  ;;  %v13728_v40 = vld [vmem:[#allocation104_spill] sm:$0xff]  ;;  %v12410_v53 = vpop.permute.xlu0 %1223 }
 0x3ca   : > { %v4917_v29 = vpop.f32.mrb[58].mxu0  ;;  %v13730_v60 = vld [vmem:[#allocation2_spill] sm:$0xff] }
 0x3cb   : > { %v8992_v33 = vadd.f32 %v4917_v29, %v13722_v15  ;;  %v5380_v54 = vadd.f32 %v8991_v38, %v13723_v52  ;;  %v4919_v24 = vpop.f32.mrb[59].mxu0  ;;  %8392 = vmatprep.subr.bf16.mxu1 %v5819_v36  ;;  %v13729_v38 = vld [vmem:[#allocation54_spill] sm:$0xff]  ;;  %v12416_v15 = vpop.f32.mrb[216].mxu1 }
 0x3cc   : > { %8393 = vmatpush3.bf16.msra.mxu1 %v12255_v17  ;;  %v4001_v36 = vadd.f32 %v13730_v60, %v13729_v38  ;;  %v12418_v52 = vpop.f32.mrb[217].mxu1 }
 0x3cd   : > { %v5383_v55 = vadd.f32 %v8992_v33, %v13724_v5  ;;  %5129 = vmatmul.mubr.bf16.gmra.mrb[164].mxu0 %v10028_v44  ;;  %v5726_v20 = vmax.f32 %v5380_v54, 0.0  ;;  %v12414_v44 = vpop.permute.xlu1 %1228  ;;  %v13731_v54 = vld [vmem:[#allocation57_spill] sm:$0xff] }
 0x3ce   : > { %5136 = vmatprep.mubr.bf16.mxu0 %v10031_v31 }
 0x3cf   : > { %v5727_v42 = vmax.f32 %v5383_v55, 0.0 }
 0x3d0   : > { %v4922_v30 = vpop.f32.mrb[60].mxu0 }
 0x3d1   : > { %v8993_v63 = vadd.f32 %v4922_v30, %v13725_v50  ;;  %v4924_v49 = vpop.f32.mrb[61].mxu0  ;;  %v5820_v11 = vpack.c.bf16 %v5727_v42, %v5726_v20  ;;  %v10038_v42 = vld [vmem:[%s13601_s1 + $0x978] ss:$28 sps:$4 sm:$0xff]   ;;  %v12425_v30 = vpop.f32.mrb[218].mxu1 }
 0x3d2   : > { %v4925_v17 = vpop.f32.mrb[62].mxu0  ;;  %v12430_v49 = vpop.f32.mrb[219].mxu1 }
 0x3d3   : > { %v5388_v28 = vadd.f32 %v8993_v63, %v13726_v14  ;;  %v8994_v56 = vadd.f32 %v4925_v17, %v13727_v25  ;;  %v4927_v27 = vpop.f32.mrb[63].mxu0  ;;  %8394 = vmatprep.subr.bf16.mxu1 %v5820_v11  ;;  %v10042_v63 = vld [vmem:[%s13601_s1 + $0x9b4] ss:$28 sps:$4 sm:$0xff]   ;;  %v10039_v14 = vld [vmem:[%s13603_s3] ss:$28 sps:$4 sm:$0xff]   ;;  %v12445_v38 = vpop.permute.xlu1 %1148 }
 0x3d4   : > { %8395 = vmatpush3.bf16.msra.mxu1 %v12275_v8  ;;  %v13732_v8 = vld [vmem:[#allocation3_spill] sm:$0xff]  ;;  %v13734_v27 = vld [vmem:[#allocation61_spill] sm:$0xff] }
 0x3d5   : > { %v5391_v13 = vadd.f32 %v8994_v56, %v13728_v40  ;;  %5137 = vmatmul.mubr.bf16.gmra.mrb[168].mxu0 %v10033_v0  ;;  %v5728_v29 = vmax.f32 %v5388_v28, 0.0  ;;  %v4004_v24 = vadd.f32 %v13732_v8, %v13731_v54  ;;  %v13733_v0 = vld [vmem:[#allocation107_spill] sm:$0xff]  ;;  %v10047_v28 = vld [vmem:[%s13603_s3 + $0x3c] ss:$28 sps:$4 sm:$0xff]   ;;  %v12441_v56 = vpop.permute.xlu0 %1143  ;;  %v13735_v40 = vld [vmem:[#allocation4_spill] sm:$0xff] }
 0x3d6   : > { %5144 = vmatprep.mubr.bf16.mxu0 %v10036_v51 }
 0x3d7   : > { %v5729_v31 = vmax.f32 %v5391_v13, 0.0  ;;  %v4009_v13 = vadd.f32 %v13735_v40, %v13734_v27  ;;  %v13739_v40 = vld [vmem:[#allocation68_spill] sm:$0xff] }
 0x3d8   : > { %v4930_v33 = vpop.f32.mrb[64].mxu0 }
 0x3d9   : > { %v8996_v5 = vadd.f32 %v4930_v33, %v4001_v36  ;;  %v4932_v55 = vpop.f32.mrb[65].mxu0  ;;  %v5821_v20 = vpack.c.bf16 %v5729_v31, %v5728_v29  ;;  %v12447_v29 = vpop.f32.mrb[220].mxu1  ;;  %v13736_v33 = vld [vmem:[#allocation63_spill] sm:$0xff] }
 0x3da   : > { %v4933_v50 = vpop.f32.mrb[66].mxu0  ;;  %v12449_v31 = vpop.f32.mrb[221].mxu1  ;;  %v10044_v55 = vld [vmem:[%s13601_s1 + $0x9b0] ss:$28 sps:$4 sm:$0xff]  }
 0x3db   : > { %v8998_v11 = vadd.f32 %v4933_v50, %v4004_v24  ;;  %v5396_v17 = vadd.f32 %v8996_v5, %v13733_v0  ;;  %v4935_v51 = vpop.f32.mrb[67].mxu0  ;;  %8396 = vmatprep.subr.bf16.mxu1 %v5821_v20  ;;  %v12458_v20 = vpop.f32.mrb[222].mxu1  ;;  %v10048_v50 = vld [vmem:[%s13601_s1 + $0x9ec] ss:$28 sps:$4 sm:$0xff]  }
 0x3dc   : > { %8397 = vmatpush3.bf16.msra.mxu1 %v12287_v12  ;;  %v12473_v27 = vpop.permute.xlu0 %1233 }
 0x3dd   : > { %v5399_v25 = vadd.f32 %v8998_v11, %v12173_v1  ;;  %5145 = vmatmul.mubr.bf16.gmra.mrb[172].mxu0 %v10038_v42  ;;  %v5730_v60 = vmax.f32 %v5396_v17, 0.0  ;;  %v13737_v1 = vld [vmem:[#allocation5_spill] sm:$0xff]  ;;  %v13738_v11 = vld [vmem:[#allocation106_spill] sm:$0xff] }
 0x3de   : > { %5152 = vmatprep.mubr.bf16.mxu0 %v10042_v63  ;;  %v4012_v54 = vadd.f32 %v13737_v1, %v13736_v33  ;;  %v12463_v63 = vpop.f32.mrb[223].mxu1 }
 0x3df   : > { %v5731_v36 = vmax.f32 %v5399_v25, 0.0  ;;  %6822 = vmatmul.mubr.bf16.vlgmr.msra.gmra.mrb[4].mxu1 %v10039_v14  ;;  %v10045_v14 = vld [vmem:[%s13603_s3 + $0x38] ss:$28 sps:$4 sm:$0xff]   ;;  %v12479_v1 = vpop.f32.mrb[224].mxu1 }
 0x3e0   : > { %v4938_v12 = vpop.f32.mrb[68].mxu0  ;;  %6829 = vmatprep.mubr.bf16.mxu1 %v10047_v28  ;;  %v10053_v28 = vld [vmem:[%s13603_s3 + $0x74] ss:$28 sps:$4 sm:$0xff]   ;;  %13741 = vst [vmem:[#allocation101_spill] sm:$0xff] %v12479_v1  ;;  %v13749_v1 = vld [vmem:[#allocation9_spill] sm:$0xff] }
 0x3e1   : > { %v12453_v8 = vpack.c.bf16 %v5731_v36, %v5730_v60  ;;  %v9000_v24 = vadd.f32 %v4938_v12, %v4009_v13  ;;  %v4940_v5 = vpop.f32.mrb[69].mxu0  ;;  %v13740_v13 = vld [vmem:[#allocation6_spill] sm:$0xff]  ;;  %v12477_v36 = vpop.permute.xlu1 %1238 }
 0x3e2   : > { %v4941_v42 = vpop.f32.mrb[70].mxu0  ;;  %v4017_v60 = vadd.f32 %v13740_v13, %v13739_v40  ;;  %v13742_v5 = vld [vmem:[#allocation71_spill] sm:$0xff] }
 0x3e3   : > { %v5404_v0 = vadd.f32 %v9000_v24, %v13738_v11  ;;  %v9002_v17 = vadd.f32 %v4941_v42, %v4012_v54  ;;  %v4943_v51 = vpop.f32.mrb[71].mxu0  ;;  %v12481_v24 = vpop.f32.mrb[225].mxu1 }
 0x3e5   : > { %v5407_v25 = vadd.f32 %v9002_v17, %v12171_v23  ;;  %5153 = vmatmul.mubr.bf16.gmra.mrb[176].mxu0 %v10044_v55  ;;  %v5732_v12 = vmax.f32 %v5404_v0, 0.0  ;;  %v13743_v23 = vld [vmem:[#allocation7_spill] sm:$0xff]  ;;  %v12490_v0 = vpop.f32.mrb[226].mxu1 }
 0x3e6   : > { %5160 = vmatprep.mubr.bf16.mxu0 %v10048_v50  ;;  %v4020_v55 = vadd.f32 %v13743_v23, %v13742_v5  ;;  %v10050_v17 = vld [vmem:[%s13601_s1 + $0x9e8] ss:$28 sps:$4 sm:$0xff]   ;;  %13744 = vst [vmem:[#allocation36_spill] sm:$0xff] %v12490_v0  ;;  %v13747_v23 = vld [vmem:[#allocation8_spill] sm:$0xff] }
 0x3e7   : > { %v5733_v33 = vmax.f32 %v5407_v25, 0.0  ;;  %6830 = vmatmul.mubr.bf16.gmra.mrb[8].mxu1 %v10045_v14  ;;  %v10054_v14 = vld [vmem:[%s13601_s1 + $0xa24] ss:$28 sps:$4 sm:$0xff]   ;;  %v13746_v5 = vld [vmem:[#allocation75_spill] sm:$0xff] }
 0x3e8   : > { %v4946_v54 = vpop.f32.mrb[72].mxu0  ;;  %6837 = vmatprep.mubr.bf16.mxu1 %v10053_v28  ;;  %v12495_v28 = vpop.f32.mrb[227].mxu1 }
 0x3e9   : > { %v12485_v42 = vpack.c.bf16 %v5733_v33, %v5732_v12  ;;  %v9004_v50 = vadd.f32 %v4946_v54, %v4017_v60  ;;  %v4948_v11 = vpop.f32.mrb[73].mxu0  ;;  %13745 = vst [vmem:[#allocation99_spill] sm:$0xff] %v12495_v28  ;;  %v10051_v60 = vld [vmem:[%s13603_s3 + $0x70] ss:$28 sps:$4 sm:$0xff]   ;;  %v1154_v54 = vpop.permute.xlu0 %1153  ;;  %v4028_v28 = vadd.f32 %v13749_v1, %v12397_v7 }
 0x3ea   : > { %v4949_v51 = vpop.f32.mrb[74].mxu0  ;;  %v10059_v12 = vld [vmem:[%s13603_s3 + $0xac] ss:$28 sps:$4 sm:$0xff]   ;;  %v4025_v11 = vadd.f32 %v13747_v23, %v13746_v5 }
 0x3eb   : > { %v9006_v25 = vadd.f32 %v4949_v51, %v4020_v55  ;;  %v5412_v40 = vadd.f32 %v9004_v50, %v12202_v61  ;;  %v4951_v13 = vpop.f32.mrb[75].mxu0  ;;  %v1159_v55 = vpop.permute.xlu1 %1158  ;;  %v10057_v23 = vld [vmem:[%s13603_s3 + $0xa8] ss:$28 sps:$4 sm:$0xff]  }
 0x3ec   : > { %v12507_v50 = vpop.f32.mrb[228].mxu1 }
 0x3ed   : > { %v5415_v33 = vadd.f32 %v9006_v25, %v12208_v48  ;;  %5161 = vmatmul.mubr.bf16.gmra.mrb[180].mxu0 %v10050_v17  ;;  %v5734_v51 = vmax.f32 %v5412_v40, 0.0  ;;  %13748 = vst [vmem:[#allocation38_spill] sm:$0xff] %v12507_v50  ;;  %v12509_v0 = vpop.f32.mrb[229].mxu1  ;;  %v10056_v25 = vld [vmem:[%s13601_s1 + $0xa20] ss:$28 sps:$4 sm:$0xff]  }
 0x3ee   : > { %5168 = vmatprep.mubr.bf16.mxu0 %v10054_v14  ;;  %v12518_v40 = vpop.f32.mrb[230].mxu1 }
 0x3ef   : > { %v5735_v61 = vmax.f32 %v5415_v33, 0.0  ;;  %6838 = vmatmul.mubr.bf16.gmra.mrb[12].mxu1 %v10051_v60  ;;  %13750 = vst [vmem:[#allocation100_spill] sm:$0xff] %v12518_v40  ;;  %v12523_v33 = vpop.f32.mrb[231].mxu1 }
 0x3f0   : > { %v4954_v13 = vpop.f32.mrb[76].mxu0  ;;  %6845 = vmatprep.mubr.bf16.mxu1 %v10059_v12  ;;  %v10060_v12 = vld [vmem:[%s13601_s1 + $0xa5c] ss:$28 sps:$4 sm:$0xff]   ;;  %13751 = vst [vmem:[#allocation40_spill] sm:$0xff] %v12523_v33 }
 0x3f1   : > { %v12513_v48 = vpack.c.bf16 %v5735_v61, %v5734_v51  ;;  %v9008_v17 = vadd.f32 %v4954_v13, %v4025_v11  ;;  %v4956_v14 = vpop.f32.mrb[77].mxu0  ;;  %v10065_v11 = vld [vmem:[%s13603_s3 + $0xe4] ss:$28 sps:$4 sm:$0xff]   ;;  %v12533_v61 = vpop.permute.xlu0 %1243 }
 0x3f2   : > { %v4957_v60 = vpop.f32.mrb[78].mxu0  ;;  %v13752_v13 = vld [vmem:[#allocation10_spill] sm:$0xff] }
 0x3f3   : > { %v5420_v5 = vadd.f32 %v9008_v17, %v12197_v19  ;;  %v9010_v7 = vadd.f32 %v4957_v60, %v4028_v28  ;;  %v4959_v1 = vpop.f32.mrb[79].mxu0  ;;  %v4033_v14 = vadd.f32 %v13752_v13, %v12441_v56  ;;  %v12537_v19 = vpop.permute.xlu1 %1248  ;;  %v10062_v56 = vld [vmem:[%s13601_s1 + $0xa58] ss:$28 sps:$4 sm:$0xff]  }
 0x3f4   : > { %v12539_v60 = vpop.f32.mrb[232].mxu1 }
 0x3f5   : > { %v5423_v51 = vadd.f32 %v9010_v7, %v12206_v2  ;;  %5169 = vmatmul.mubr.bf16.gmra.mrb[184].mxu0 %v10056_v25  ;;  %v5736_v28 = vmax.f32 %v5420_v5, 0.0  ;;  %13753 = vst [vmem:[#allocation43_spill] sm:$0xff] %v12539_v60  ;;  %v12541_v40 = vpop.f32.mrb[233].mxu1  ;;  %v13755_v2 = vld [vmem:[#allocation11_spill] sm:$0xff] }
 0x3f6   : > { %5176 = vmatprep.mubr.bf16.mxu0 %v10060_v12  ;;  %13754 = vst [vmem:[#allocation103_spill] sm:$0xff] %v12541_v40  ;;  %v4036_v25 = vadd.f32 %v13755_v2, %v12445_v38  ;;  %v12550_v5 = vpop.f32.mrb[234].mxu1  ;;  %v13758_v2 = vld [vmem:[#allocation12_spill] sm:$0xff] }
 0x3f7   : > { %v5737_v17 = vmax.f32 %v5423_v51, 0.0  ;;  %6846 = vmatmul.mubr.bf16.gmra.mrb[16].mxu1 %v10057_v23  ;;  %13756 = vst [vmem:[#allocation105_spill] sm:$0xff] %v12550_v5  ;;  %v12555_v51 = vpop.f32.mrb[235].mxu1  ;;  %v4041_v5 = vadd.f32 %v13758_v2, %v1154_v54  ;;  %v1169_v60 = vpop.permute.xlu1 %1168  ;;  %v10068_v54 = vld [vmem:[%s13601_s1 + $0xa90] ss:$28 sps:$4 sm:$0xff]  }
 0x3f8   : > { %v4962_v1 = vpop.f32.mrb[80].mxu0  ;;  %6853 = vmatprep.mubr.bf16.mxu1 %v10065_v11  ;;  %v10066_v11 = vld [vmem:[%s13601_s1 + $0xa94] ss:$28 sps:$4 sm:$0xff]   ;;  %13757 = vst [vmem:[#allocation46_spill] sm:$0xff] %v12555_v51  ;;  %v13760_v51 = vld [vmem:[#allocation13_spill] sm:$0xff] }
 0x3f9   : > { %v12545_v7 = vpack.c.bf16 %v5737_v17, %v5736_v28  ;;  %v9012_v12 = vadd.f32 %v4962_v1, %v4033_v14  ;;  %v4964_v50 = vpop.f32.mrb[81].mxu0  ;;  %v10071_v14 = vld [vmem:[%s13603_s3 + $0x11c] ss:$28 sps:$4 sm:$0xff]   ;;  %v1164_v1 = vpop.permute.xlu0 %1163  ;;  %v4044_v40 = vadd.f32 %v13760_v51, %v1159_v55 }
 0x3fa   : > { %v4965_v23 = vpop.f32.mrb[82].mxu0  ;;  %v10063_v50 = vld [vmem:[%s13603_s3 + $0xe0] ss:$28 sps:$4 sm:$0xff]  }
 0x3fb   : > { %v9014_v13 = vadd.f32 %v4965_v23, %v4036_v25  ;;  %v5428_v38 = vadd.f32 %v9012_v12, %v12234_v46  ;;  %v4967_v28 = vpop.f32.mrb[83].mxu0  ;;  %v12566_v46 = vpop.f32.mrb[236].mxu1 }
 0x3fc   : > { %13759 = vst [vmem:[#allocation102_spill] sm:$0xff] %v12566_v46  ;;  %v12568_v28 = vpop.f32.mrb[237].mxu1 }
 0x3fd   : > { %v5431_v17 = vadd.f32 %v9014_v13, %v12240_v9  ;;  %5177 = vmatmul.mubr.bf16.gmra.mrb[188].mxu0 %v10062_v56  ;;  %v5738_v25 = vmax.f32 %v5428_v38, 0.0  ;;  %v10072_v38 = vld [vmem:[%s13601_s1 + $0xacc] ss:$28 sps:$4 sm:$0xff]  }
 0x3fe   : > { %5184 = vmatprep.mubr.bf16.mxu0 %v10066_v11  ;;  %v12576_v11 = vpop.f32.mrb[238].mxu1 }
 0x3ff   : > { %v5739_v23 = vmax.f32 %v5431_v17, 0.0  ;;  %6854 = vmatmul.mubr.bf16.gmra.mrb[20].mxu1 %v10063_v50  ;;  %13761 = vst [vmem:[#allocation48_spill] sm:$0xff] %v12576_v11  ;;  %v12581_v50 = vpop.f32.mrb[239].mxu1  ;;  %v10077_v17 = vld [vmem:[%s13603_s3 + $0x154] ss:$28 sps:$4 sm:$0xff]   ;;  %v13766_v11 = vld [vmem:[#allocation15_spill] sm:$0xff] }
 0x400   : > { %v4970_v12 = vpop.f32.mrb[84].mxu0  ;;  %6861 = vmatprep.mubr.bf16.mxu1 %v10071_v14  ;;  %13762 = vst [vmem:[#allocation104_spill] sm:$0xff] %v12581_v50  ;;  %v4052_v46 = vadd.f32 %v13766_v11, %v1169_v60 }
 0x401   : > { %v12571_v33 = vpack.c.bf16 %v5739_v23, %v5738_v25  ;;  %v9016_v9 = vadd.f32 %v4970_v12, %v4041_v5  ;;  %v4972_v56 = vpop.f32.mrb[85].mxu0  ;;  %v10069_v5 = vld [vmem:[%s13603_s3 + $0x118] ss:$28 sps:$4 sm:$0xff]   ;;  %v12591_v25 = vpop.permute.xlu0 %1253  ;;  %v13763_v23 = vld [vmem:[#allocation14_spill] sm:$0xff] }
 0x402   : > { %v4973_v13 = vpop.f32.mrb[86].mxu0  ;;  %v4049_v12 = vadd.f32 %v13763_v23, %v1164_v1  ;;  %v12594_v56 = vpop.permute.xlu1 %1258  ;;  %v10074_v1 = vld [vmem:[%s13601_s1 + $0xac8] ss:$28 sps:$4 sm:$0xff]   ;;  %v10075_v23 = vld [vmem:[%s13603_s3 + $0x150] ss:$28 sps:$4 sm:$0xff]  }
 0x403   : > { %v5436_v14 = vadd.f32 %v9016_v9, %v12229_v59  ;;  %v9018_v55 = vadd.f32 %v4973_v13, %v4044_v40  ;;  %v4975_v51 = vpop.f32.mrb[87].mxu0  ;;  %v12596_v9 = vpop.f32.mrb[240].mxu1 }
 0x404   : > { %13764 = vst [vmem:[#allocation54_spill] sm:$0xff] %v12596_v9  ;;  %v12598_v51 = vpop.f32.mrb[241].mxu1  ;;  %v13771_v9 = vld [vmem:[#allocation17_spill] sm:$0xff] }
 0x405   : > { %v5439_v2 = vadd.f32 %v9018_v55, %v12238_v45  ;;  %5185 = vmatmul.mubr.bf16.gmra.mrb[192].mxu0 %v10068_v54  ;;  %v5740_v59 = vmax.f32 %v5436_v14, 0.0  ;;  %13765 = vst [vmem:[#allocation2_spill] sm:$0xff] %v12598_v51 }
 0x406   : > { %5192 = vmatprep.mubr.bf16.mxu0 %v10072_v38  ;;  %v12606_v38 = vpop.f32.mrb[242].mxu1 }
 0x407   : > { %v5741_v40 = vmax.f32 %v5439_v2, 0.0  ;;  %6862 = vmatmul.mubr.bf16.gmra.mrb[24].mxu1 %v10069_v5  ;;  %13767 = vst [vmem:[#allocation57_spill] sm:$0xff] %v12606_v38  ;;  %v10078_v5 = vld [vmem:[%s13601_s1 + $0xb04] ss:$28 sps:$4 sm:$0xff]  }
 0x408   : > { %v4978_v13 = vpop.f32.mrb[88].mxu0  ;;  %6869 = vmatprep.mubr.bf16.mxu1 %v10077_v17  ;;  %v12611_v17 = vpop.f32.mrb[243].mxu1 }
 0x409   : > { %v12601_v45 = vpack.c.bf16 %v5741_v40, %v5740_v59  ;;  %v9020_v54 = vadd.f32 %v4978_v13, %v4049_v12  ;;  %v4980_v55 = vpop.f32.mrb[89].mxu0  ;;  %13768 = vst [vmem:[#allocation3_spill] sm:$0xff] %v12611_v17  ;;  %v1174_v12 = vpop.permute.xlu0 %1173  ;;  %v10083_v59 = vld [vmem:[%s13603_s3 + $0x18c] ss:$28 sps:$4 sm:$0xff]  }
 0x40a   : > { %v4981_v14 = vpop.f32.mrb[90].mxu0  ;;  %v1179_v13 = vpop.permute.xlu1 %1178  ;;  %v13769_v55 = vld [vmem:[#allocation16_spill] sm:$0xff] }
 0x40b   : > { %v9022_v2 = vadd.f32 %v4981_v14, %v4052_v46  ;;  %v5444_v60 = vadd.f32 %v9020_v54, %v12266_v47  ;;  %v4983_v11 = vpop.f32.mrb[91].mxu0  ;;  %v4057_v38 = vadd.f32 %v13769_v55, %v1174_v12  ;;  %v12622_v47 = vpop.f32.mrb[244].mxu1  ;;  %v4060_v17 = vadd.f32 %v13771_v9, %v1179_v13 }
 0x40c   : > { %13770 = vst [vmem:[#allocation107_spill] sm:$0xff] %v12622_v47  ;;  %v12624_v11 = vpop.f32.mrb[245].mxu1  ;;  %v13777_v47 = vld [vmem:[#allocation53_spill] sm:$0xff] }
 0x40d   : > { %v5447_v40 = vadd.f32 %v9022_v2, %v12272_v58  ;;  %5193 = vmatmul.mubr.bf16.gmra.mrb[196].mxu0 %v10074_v1  ;;  %v5742_v46 = vmax.f32 %v5444_v60, 0.0  ;;  %v10080_v1 = vld [vmem:[%s13601_s1 + $0xb00] ss:$28 sps:$4 sm:$0xff]  }
 0x40e   : > { %5200 = vmatprep.mubr.bf16.mxu0 %v10078_v5  ;;  %v12632_v5 = vpop.f32.mrb[246].mxu1  ;;  %v10084_v60 = vld [vmem:[%s13601_s1 + $0xb3c] ss:$28 sps:$4 sm:$0xff]  }
 0x40f   : > { %v5743_v14 = vmax.f32 %v5447_v40, 0.0  ;;  %6870 = vmatmul.mubr.bf16.gmra.mrb[28].mxu1 %v10075_v23  ;;  %13772 = vst [vmem:[#allocation61_spill] sm:$0xff] %v12632_v5  ;;  %v12637_v23 = vpop.f32.mrb[247].mxu1  ;;  %v10089_v40 = vld [vmem:[%s13603_s3 + $0x1c4] ss:$28 sps:$4 sm:$0xff]  }
 0x410   : > { %v4986_v54 = vpop.f32.mrb[92].mxu0  ;;  %6877 = vmatprep.mubr.bf16.mxu1 %v10083_v59 }
 0x411   : > { %v12627_v51 = vpack.c.bf16 %v5743_v14, %v5742_v46  ;;  %v9024_v50 = vadd.f32 %v4986_v54, %v4057_v38  ;;  %v4988_v58 = vpop.f32.mrb[93].mxu0  ;;  %v10081_v38 = vld [vmem:[%s13603_s3 + $0x188] ss:$28 sps:$4 sm:$0xff]  }
 0x412   : > { %v4989_v2 = vpop.f32.mrb[94].mxu0  ;;  %v13773_v14 = vld [vmem:[#allocation50_spill] sm:$0xff] }
 0x413   : > { %v5452_v12 = vadd.f32 %v9024_v50, %v12261_v57  ;;  %v9026_v9 = vadd.f32 %v4989_v2, %v4060_v17  ;;  %v4991_v59 = vpop.f32.mrb[95].mxu0  ;;  %v13774_v54 = vld [vmem:[#allocation18_spill] sm:$0xff]  ;;  %v12649_v50 = vpop.f32.mrb[248].mxu1 }
 0x414   : > { %v4065_v57 = vadd.f32 %v13774_v54, %v13773_v14  ;;  %13775 = vst [vmem:[#allocation4_spill] sm:$0xff] %v12649_v50  ;;  %v12651_v58 = vpop.f32.mrb[249].mxu1  ;;  %v13783_v50 = vld [vmem:[#allocation60_spill] sm:$0xff] }
 0x415   : > { %v5455_v13 = vadd.f32 %v9026_v9, %v12270_v22  ;;  %5201 = vmatmul.mubr.bf16.gmra.mrb[200].mxu0 %v10080_v1  ;;  %v5744_v55 = vmax.f32 %v5452_v12, 0.0  ;;  %13776 = vst [vmem:[#allocation63_spill] sm:$0xff] %v12651_v58  ;;  %v13778_v22 = vld [vmem:[#allocation19_spill] sm:$0xff]  ;;  %v12660_v12 = vpop.f32.mrb[250].mxu1 }
 0x416   : > { %5208 = vmatprep.mubr.bf16.mxu0 %v10084_v60  ;;  %v4068_v1 = vadd.f32 %v13778_v22, %v13777_v47  ;;  %v10086_v60 = vld [vmem:[%s13601_s1 + $0xb38] ss:$28 sps:$4 sm:$0xff]   ;;  %13779 = vst [vmem:[#allocation5_spill] sm:$0xff] %v12660_v12  ;;  %v10087_v47 = vld [vmem:[%s13603_s3 + $0x1c0] ss:$28 sps:$4 sm:$0xff]  }
 0x417   : > { %v5745_v46 = vmax.f32 %v5455_v13, 0.0  ;;  %6878 = vmatmul.mubr.bf16.gmra.mrb[32].mxu1 %v10081_v38  ;;  %v10090_v38 = vld [vmem:[%s13601_s1 + $0xb74] ss:$28 sps:$4 sm:$0xff]  }
 0x418   : > { %v4994_v17 = vpop.f32.mrb[96].mxu0  ;;  %6885 = vmatprep.mubr.bf16.mxu1 %v10089_v40  ;;  %v12665_v40 = vpop.f32.mrb[251].mxu1  ;;  %v13782_v22 = vld [vmem:[#allocation20_spill] sm:$0xff] }
 0x419   : > { %v12653_v2 = vpack.c.bf16 %v5745_v46, %v5744_v55  ;;  %v9028_v59 = vadd.f32 %v4994_v17, %v4065_v57  ;;  %v4996_v5 = vpop.f32.mrb[97].mxu0  ;;  %13780 = vst [vmem:[#allocation106_spill] sm:$0xff] %v12665_v40  ;;  %v10095_v46 = vld [vmem:[%s13603_s3 + $0x1fc] ss:$28 sps:$4 sm:$0xff]   ;;  %v13781_v17 = vld [vmem:[#allocation58_spill] sm:$0xff] }
 0x41a   : > { %v4997_v9 = vpop.f32.mrb[98].mxu0  ;;  %v13784_v40 = vld [vmem:[#allocation21_spill] sm:$0xff] }
 0x41b   : > { %v9030_v13 = vadd.f32 %v4997_v9, %v4068_v1  ;;  %v5460_v55 = vadd.f32 %v9028_v59, %v12298_v37  ;;  %v4999_v5 = vpop.f32.mrb[99].mxu0  ;;  %v4073_v1 = vadd.f32 %v13782_v22, %v13781_v17  ;;  %v12677_v37 = vpop.f32.mrb[252].mxu1  ;;  %v4076_v58 = vadd.f32 %v13784_v40, %v13783_v50  ;;  %v10093_v50 = vld [vmem:[%s13603_s3 + $0x1f8] ss:$28 sps:$4 sm:$0xff]  }
 0x41c   : > { %v12679_v9 = vpop.f32.mrb[253].mxu1  ;;  %v10101_v40 = vld [vmem:[%s13603_s3 + $0x234] ss:$28 sps:$4 sm:$0xff]  }
 0x41d   : > { %v5463_v14 = vadd.f32 %v9030_v13, %v12304_v62  ;;  %5209 = vmatmul.mubr.bf16.gmra.mrb[204].mxu0 %v10086_v60  ;;  %v5746_v54 = vmax.f32 %v5460_v55, 0.0  ;;  %v10092_v60 = vld [vmem:[%s13601_s1 + $0xb70] ss:$28 sps:$4 sm:$0xff]  }
 0x41e   : > { %5216 = vmatprep.mubr.bf16.mxu0 %v10090_v38  ;;  %v12686_v38 = vpop.f32.mrb[254].mxu1  ;;  %v10096_v55 = vld [vmem:[%s13601_s1 + $0xbac] ss:$28 sps:$4 sm:$0xff]  }
 0x41f   : > { %v5747_v57 = vmax.f32 %v5463_v14, 0.0  ;;  %6886 = vmatmul.mubr.bf16.gmra.mrb[36].mxu1 %v10087_v47  ;;  %13785 = vst [vmem:[#allocation68_spill] sm:$0xff] %v12686_v38  ;;  %v12691_v47 = vpop.f32.mrb[255].mxu1 }
 0x420   : > { %v5002_v59 = vpop.f32.mrb[100].mxu0  ;;  %6893 = vmatprep.mubr.bf16.mxu1 %v10095_v46 }
 0x421   : > { %v9032_v5 = vadd.f32 %v5002_v59, %v4073_v1  ;;  %v5004_v12 = vpop.f32.mrb[101].mxu0  ;;  %v5830_v62 = vpack.c.bf16 %v5747_v57, %v5746_v54 }
 0x422   : > { %v5005_v13 = vpop.f32.mrb[102].mxu0  ;;  %v12704_v1 = vpop.f32.mrb[0].mxu1 }
 0x423   : > { %v5468_v46 = vadd.f32 %v9032_v5, %v12293_v18  ;;  %v9034_v12 = vadd.f32 %v5005_v13, %v4076_v58  ;;  %v5007_v14 = vpop.f32.mrb[103].mxu0  ;;  %8494 = vmatprep.subr.bf16.mxu1 %v5830_v62  ;;  %v13786_v18 = vld [vmem:[#allocation64_spill] sm:$0xff]  ;;  %v13787_v58 = vld [vmem:[#allocation22_spill] sm:$0xff]  ;;  %v12706_v5 = vpop.f32.mrb[1].mxu1  ;;  %v13788_v13 = vld [vmem:[#allocation67_spill] sm:$0xff] }
 0x424   : > { %8495 = vmatpush3.bf16.msra.mxu1 %v12453_v8  ;;  %v4081_v22 = vadd.f32 %v13787_v58, %v13786_v18  ;;  %v13789_v14 = vld [vmem:[#allocation23_spill] sm:$0xff] }
 0x425   : > { %v5471_v54 = vadd.f32 %v9034_v12, %v12302_v16  ;;  %5217 = vmatmul.mubr.bf16.gmra.mrb[208].mxu0 %v10092_v60  ;;  %v5748_v57 = vmax.f32 %v5468_v46, 0.0  ;;  %v4084_v38 = vadd.f32 %v13789_v14, %v13788_v13  ;;  %v10098_v60 = vld [vmem:[%s13601_s1 + $0xba8] ss:$28 sps:$4 sm:$0xff]   ;;  %v10099_v18 = vld [vmem:[%s13603_s3 + $0x230] ss:$28 sps:$4 sm:$0xff]  }
 0x426   : > { %5224 = vmatprep.mubr.bf16.mxu0 %v10096_v55  ;;  %v12713_v55 = vpop.f32.mrb[2].mxu1  ;;  %v13793_v14 = vld [vmem:[#allocation74_spill] sm:$0xff] }
 0x427   : > { %v5749_v17 = vmax.f32 %v5471_v54, 0.0  ;;  %6894 = vmatmul.mubr.bf16.gmra.mrb[40].mxu1 %v10093_v50  ;;  %13790 = vst [vmem:[#allocation6_spill] sm:$0xff] %v12713_v55  ;;  %v12715_v12 = vpop.f32.mrb[3].mxu1 }
 0x428   : > { %v5010_v59 = vpop.f32.mrb[104].mxu0  ;;  %6901 = vmatprep.mubr.bf16.mxu1 %v10101_v40 }
 0x429   : > { %v9036_v8 = vadd.f32 %v5010_v59, %v4081_v22  ;;  %v5012_v62 = vpop.f32.mrb[105].mxu0  ;;  %v5831_v16 = vpack.c.bf16 %v5749_v17, %v5748_v57  ;;  %v10104_v57 = vld [vmem:[%s13603_s3 + $0x26c] ss:$28 sps:$4 sm:$0xff]  }
 0x42a   : > { %v5013_v46 = vpop.f32.mrb[106].mxu0 }
 0x42b   : > { %v9038_v50 = vadd.f32 %v5013_v46, %v4084_v38  ;;  %v5476_v40 = vadd.f32 %v9036_v8, %v12327_v34  ;;  %v5015_v54 = vpop.f32.mrb[107].mxu0  ;;  %8496 = vmatprep.subr.bf16.mxu1 %v5831_v16  ;;  %v13791_v38 = vld [vmem:[#allocation72_spill] sm:$0xff]  ;;  %v13794_v16 = vld [vmem:[#allocation25_spill] sm:$0xff] }
 0x42c   : > { %8497 = vmatpush3.bf16.msra.mxu1 %v12485_v42  ;;  %v13792_v34 = vld [vmem:[#allocation24_spill] sm:$0xff]  ;;  %v4092_v42 = vadd.f32 %v13794_v16, %v13793_v14  ;;  %v12730_v54 = vpop.permute.xlu0 %1343 }
 0x42d   : > { %v5479_v17 = vadd.f32 %v9038_v50, %v12334_v41  ;;  %5225 = vmatmul.mubr.bf16.gmra.mrb[212].mxu0 %v10098_v60  ;;  %v5750_v58 = vmax.f32 %v5476_v40, 0.0  ;;  %v4089_v59 = vadd.f32 %v13792_v34, %v13791_v38  ;;  %v10102_v40 = vld [vmem:[%s13603_s3 + $0x268] ss:$28 sps:$4 sm:$0xff]  }
 0x42f   : > { %v5751_v22 = vmax.f32 %v5479_v17, 0.0  ;;  %6902 = vmatmul.mubr.bf16.gmra.mrb[44].mxu1 %v10099_v18  ;;  %v12736_v18 = vpop.permute.xlu1 %1348 }
 0x430   : > { %v5018_v8 = vpop.f32.mrb[108].mxu0  ;;  %6909 = vmatprep.mubr.bf16.mxu1 %v10104_v57  ;;  %v10107_v57 = vld [vmem:[%s13603_s3 + $0x2a4] ss:$28 sps:$4 sm:$0xff]   ;;  %v12745_v38 = vpop.permute.xlu0 %1263 }
 0x431   : > { %v9040_v62 = vadd.f32 %v5018_v8, %v4089_v59  ;;  %v5020_v13 = vpop.f32.mrb[109].mxu0  ;;  %v5832_v46 = vpack.c.bf16 %v5751_v22, %v5750_v58 }
 0x432   : > { %v5021_v55 = vpop.f32.mrb[110].mxu0 }
 0x433   : > { %v5484_v41 = vadd.f32 %v9040_v62, %v12322_v43  ;;  %v9042_v60 = vadd.f32 %v5021_v55, %v4092_v42  ;;  %v5023_v50 = vpop.f32.mrb[111].mxu0  ;;  %8498 = vmatprep.subr.bf16.mxu1 %v5832_v46  ;;  %v13795_v43 = vld [vmem:[#allocation26_spill] sm:$0xff]  ;;  %v12749_v14 = vpop.permute.xlu1 %1268 }
 0x434   : > { %8499 = vmatpush3.bf16.msra.mxu1 %v12513_v48  ;;  %v4097_v55 = vadd.f32 %v13795_v43, %v12410_v53  ;;  %v13796_v48 = vld [vmem:[#allocation27_spill] sm:$0xff]  ;;  %v10105_v53 = vld [vmem:[%s13603_s3 + $0x2a0] ss:$28 sps:$4 sm:$0xff]  }
 0x435   : > { %v5487_v17 = vadd.f32 %v9042_v60, %v12331_v10  ;;  %v5752_v58 = vmax.f32 %v5484_v41, 0.0  ;;  %v4100_v62 = vadd.f32 %v13796_v48, %v12414_v44  ;;  %v10110_v41 = vld [vmem:[%s13603_s3 + $0x2dc] ss:$28 sps:$4 sm:$0xff]   ;;  %v12760_v60 = vpop.permute.xlu0 %1353 }
 0x436   : > { %v13798_v43 = vld [vmem:[#allocation29_spill] sm:$0xff] }
 0x437   : > { %v5753_v22 = vmax.f32 %v5487_v17, 0.0  ;;  %6910 = vmatmul.mubr.bf16.gmra.mrb[48].mxu1 %v10102_v40  ;;  %v12764_v17 = vpop.permute.xlu1 %1358 }
 0x438   : > { %v5026_v34 = vpop.f32.mrb[112].mxu0  ;;  %6917 = vmatprep.mubr.bf16.mxu1 %v10107_v57 }
 0x439   : > { %v9044_v59 = vadd.f32 %v5026_v34, %v4097_v55  ;;  %v5028_v8 = vpop.f32.mrb[113].mxu0  ;;  %v5833_v13 = vpack.c.bf16 %v5753_v22, %v5752_v58  ;;  %v4108_v55 = vadd.f32 %v13798_v43, %v12477_v36 }
 0x43a   : > { %v5029_v16 = vpop.f32.mrb[114].mxu0 }
 0x43b   : > { %v9046_v10 = vadd.f32 %v5029_v16, %v4100_v62  ;;  %v5492_v42 = vadd.f32 %v9044_v59, %v12357_v39  ;;  %v5031_v46 = vpop.f32.mrb[115].mxu0  ;;  %8500 = vmatprep.subr.bf16.mxu1 %v5833_v13  ;;  %v13797_v39 = vld [vmem:[#allocation28_spill] sm:$0xff]  ;;  %v12772_v62 = vpop.permute.xlu0 %1273 }
 0x43c   : > { %8501 = vmatpush3.bf16.msra.mxu1 %v12545_v7  ;;  %v4105_v57 = vadd.f32 %v13797_v39, %v12473_v27  ;;  %v10108_v27 = vld [vmem:[%s13603_s3 + $0x2d8] ss:$28 sps:$4 sm:$0xff]   ;;  %v12779_v16 = vpop.permute.xlu1 %1278 }
 0x43d   : > { %v5495_v44 = vadd.f32 %v9046_v10, %v12364_v21  ;;  %v5754_v50 = vmax.f32 %v5492_v42, 0.0  ;;  %v10113_v13 = vld [vmem:[%s13603_s3 + $0x314] ss:$28 sps:$4 sm:$0xff]   ;;  %v13799_v42 = vld [vmem:[#allocation30_spill] sm:$0xff] }
 0x43e   : > { %v4113_v46 = vadd.f32 %v13799_v42, %v12533_v61  ;;  %v10111_v61 = vld [vmem:[%s13603_s3 + $0x310] ss:$28 sps:$4 sm:$0xff]  }
 0x43f   : > { %v5755_v40 = vmax.f32 %v5495_v44, 0.0  ;;  %6918 = vmatmul.mubr.bf16.gmra.mrb[52].mxu1 %v10105_v53  ;;  %v12785_v39 = vpop.permute.xlu0 %1363 }
 0x440   : > { %v5034_v58 = vpop.f32.mrb[116].mxu0  ;;  %6925 = vmatprep.mubr.bf16.mxu1 %v10110_v41 }
 0x441   : > { %v9048_v22 = vadd.f32 %v5034_v58, %v4105_v57  ;;  %v5036_v7 = vpop.f32.mrb[117].mxu0  ;;  %v5834_v34 = vpack.c.bf16 %v5755_v40, %v5754_v50 }
 0x442   : > { %v5037_v59 = vpop.f32.mrb[118].mxu0  ;;  %v12791_v7 = vpop.permute.xlu1 %1368 }
 0x443   : > { %v5500_v21 = vadd.f32 %v9048_v22, %v12352_v32  ;;  %v9050_v8 = vadd.f32 %v5037_v59, %v4108_v55  ;;  %v5039_v48 = vpop.f32.mrb[119].mxu0  ;;  %8502 = vmatprep.subr.bf16.mxu1 %v5834_v34 }
 0x444   : > { %8503 = vmatpush3.bf16.msra.mxu1 %v12571_v33  ;;  %v13800_v33 = vld [vmem:[#allocation31_spill] sm:$0xff] }
 0x445   : > { %v5503_v36 = vadd.f32 %v9050_v8, %v12361_v26  ;;  %v5756_v32 = vmax.f32 %v5500_v21, 0.0  ;;  %v4116_v50 = vadd.f32 %v13800_v33, %v12537_v19  ;;  %v10116_v19 = vld [vmem:[%s13603_s3 + $0x34c] ss:$28 sps:$4 sm:$0xff]   ;;  %v1284_v21 = vpop.permute.xlu0 %1283 }
 0x447   : > { %v5757_v10 = vmax.f32 %v5503_v36, 0.0  ;;  %6926 = vmatmul.mubr.bf16.gmra.mrb[56].mxu1 %v10108_v27 }
 0x448   : > { %v5042_v53 = vpop.f32.mrb[120].mxu0  ;;  %6933 = vmatprep.mubr.bf16.mxu1 %v10113_v13  ;;  %v13802_v13 = vld [vmem:[#allocation33_spill] sm:$0xff] }
 0x449   : > { %v9052_v41 = vadd.f32 %v5042_v53, %v4113_v46  ;;  %v5044_v44 = vpop.f32.mrb[121].mxu0  ;;  %v5835_v40 = vpack.c.bf16 %v5757_v10, %v5756_v32  ;;  %v1289_v32 = vpop.permute.xlu1 %1288  ;;  %v10119_v53 = vld [vmem:[%s13603_s3 + $0xc] ss:$28 sps:$4 sm:$0xff]  }
 0x44a   : > { %v5045_v57 = vpop.f32.mrb[122].mxu0  ;;  %v13803_v44 = vld [vmem:[#allocation34_spill] sm:$0xff] }
 0x44b   : > { %v9054_v26 = vadd.f32 %v5045_v57, %v4116_v50  ;;  %v5508_v58 = vadd.f32 %v9052_v41, %v12387_v3  ;;  %v5047_v22 = vpop.f32.mrb[123].mxu0  ;;  %8504 = vmatprep.subr.bf16.mxu1 %v5835_v40  ;;  %v13801_v3 = vld [vmem:[#allocation32_spill] sm:$0xff]  ;;  %v12811_v41 = vpop.permute.xlu0 %1373 }
 0x44c   : > { %8505 = vmatpush3.bf16.msra.mxu1 %v12601_v45  ;;  %v4121_v59 = vadd.f32 %v13801_v3, %v12591_v25  ;;  %v4124_v45 = vadd.f32 %v13802_v13, %v12594_v56  ;;  %v10114_v25 = vld [vmem:[%s13603_s3 + $0x348] ss:$28 sps:$4 sm:$0xff]  }
 0x44d   : > { %v5511_v43 = vadd.f32 %v9054_v26, %v12394_v6  ;;  %v5758_v55 = vmax.f32 %v5508_v58, 0.0  ;;  %v12815_v40 = vpop.permute.xlu1 %1378 }
 0x44f   : > { %v5759_v34 = vmax.f32 %v5511_v43, 0.0  ;;  %6934 = vmatmul.mubr.bf16.gmra.mrb[60].mxu1 %v10111_v61 }
 0x450   : > { %v5050_v8 = vpop.f32.mrb[124].mxu0  ;;  %6941 = vmatprep.mubr.bf16.mxu1 %v10116_v19 }
 0x451   : > { %v9056_v48 = vadd.f32 %v5050_v8, %v4121_v59  ;;  %v5052_v27 = vpop.f32.mrb[125].mxu0  ;;  %v5836_v36 = vpack.c.bf16 %v5759_v34, %v5758_v55  ;;  %v1294_v34 = vpop.permute.xlu0 %1293  ;;  %v13805_v8 = vld [vmem:[#allocation37_spill] sm:$0xff] }
 0x452   : > { %v5053_v10 = vpop.f32.mrb[126].mxu0  ;;  %v1299_v59 = vpop.permute.xlu1 %1298 }
 0x453   : > { %v5516_v42 = vadd.f32 %v9056_v48, %v12382_v35  ;;  %v9058_v6 = vadd.f32 %v5053_v10, %v4124_v45  ;;  %v5055_v46 = vpop.f32.mrb[127].mxu0  ;;  %8506 = vmatprep.subr.bf16.mxu1 %v5836_v36  ;;  %v4129_v35 = vadd.f32 %v13803_v44, %v12745_v38  ;;  %v10117_v38 = vld [vmem:[%s13603_s3 + $0x8] ss:$28 sps:$4 sm:$0xff]   ;;  %v4137_v48 = vadd.f32 %v13805_v8, %v12772_v62  ;;  %v10120_v62 = vld [vmem:[%s13603_s3 + $0x40] ss:$28 sps:$4 sm:$0xff]   ;;  %v13809_v8 = vld [vmem:[#allocation44_spill] sm:$0xff] }
 0x454   : > { %8507 = vmatpush3.bf16.msra.mxu1 %v12627_v51  ;;  %v13804_v51 = vld [vmem:[#allocation35_spill] sm:$0xff] }
 0x455   : > { %v5519_v56 = vadd.f32 %v9058_v6, %v12391_v4  ;;  %v5760_v33 = vmax.f32 %v5516_v42, 0.0  ;;  %v4132_v26 = vadd.f32 %v13804_v51, %v12749_v14  ;;  %v10122_v14 = vld [vmem:[%s13603_s3 + $0x44] ss:$28 sps:$4 sm:$0xff]   ;;  %v13806_v45 = vld [vmem:[#allocation39_spill] sm:$0xff]  ;;  %v12834_v6 = vpop.permute.xlu0 %1383 }
 0x456   : > { %v4140_v36 = vadd.f32 %v13806_v45, %v12779_v16  ;;  %v10125_v16 = vld [vmem:[%s13603_s3 + $0x7c] ss:$28 sps:$4 sm:$0xff]  }
 0x457   : > { %v5761_v50 = vmax.f32 %v5519_v56, 0.0  ;;  %6942 = vmatmul.mubr.bf16.gmra.mrb[64].mxu1 %v10114_v25  ;;  %v12840_v56 = vpop.permute.xlu1 %1388  ;;  %v13810_v45 = vld [vmem:[#allocation45_spill] sm:$0xff] }
 0x458   : > { %v5058_v57 = vpop.f32.mrb[128].mxu0  ;;  %6982 = vmatprep.mubr.bf16.mxu1 %v10119_v53 }
 0x459   : > { %v9060_v58 = vadd.f32 %v5058_v57, %v4129_v35  ;;  %v5060_v22 = vpop.f32.mrb[129].mxu0  ;;  %v5837_v61 = vpack.c.bf16 %v5761_v50, %v5760_v33  ;;  %v13807_v35 = vld [vmem:[#allocation41_spill] sm:$0xff] }
 0x45a   : > { %v5061_v19 = vpop.f32.mrb[130].mxu0  ;;  %v4145_v33 = vadd.f32 %v13807_v35, %v1284_v21  ;;  %v10123_v21 = vld [vmem:[%s13603_s3 + $0x78] ss:$28 sps:$4 sm:$0xff]   ;;  %v13811_v35 = vld [vmem:[#allocation47_spill] sm:$0xff] }
 0x45b   : > { %v9062_v4 = vadd.f32 %v5061_v19, %v4132_v26  ;;  %v5524_v43 = vadd.f32 %v9060_v58, %v12418_v52  ;;  %v5063_v55 = vpop.f32.mrb[131].mxu0  ;;  %8508 = vmatprep.subr.bf16.mxu1 %v5837_v61  ;;  %v13808_v26 = vld [vmem:[#allocation42_spill] sm:$0xff] }
 0x45c   : > { %8509 = vmatpush3.bf16.msra.mxu1 %v12653_v2  ;;  %v4148_v58 = vadd.f32 %v13808_v26, %v1289_v32 }
 0x45d   : > { %v5527_v3 = vadd.f32 %v9062_v4, %v12430_v49  ;;  %v5762_v52 = vmax.f32 %v5524_v43, 0.0  ;;  %v1309_v4 = vpop.permute.xlu1 %1308 }
 0x45f   : > { %v5763_v27 = vmax.f32 %v5527_v3, 0.0  ;;  %6983 = vmatmul.mubr.bf16.vlgmr.msra.gmra.mrb[68].mxu1 %v10117_v38 }
 0x460   : > { %v5066_v13 = vpop.f32.mrb[132].mxu0  ;;  %6990 = vmatprep.mubr.bf16.mxu1 %v10122_v14  ;;  %v10128_v14 = vld [vmem:[%s13603_s3 + $0xb4] ss:$28 sps:$4 sm:$0xff]  }
 0x461   : > { %v12832_v10 = vpack.c.bf16 %v5763_v27, %v5762_v52  ;;  %v9064_v2 = vadd.f32 %v5066_v13, %v4137_v48  ;;  %v5068_v42 = vpop.f32.mrb[133].mxu0  ;;  %v4153_v48 = vadd.f32 %v13809_v8, %v1294_v34  ;;  %v12861_v13 = vpop.permute.xlu1 %1398  ;;  %v10126_v34 = vld [vmem:[%s13603_s3 + $0xb0] ss:$28 sps:$4 sm:$0xff]  }
 0x462   : > { %v5069_v46 = vpop.f32.mrb[134].mxu0  ;;  %v13814_v8 = vld [vmem:[#allocation51_spill] sm:$0xff] }
 0x463   : > { %v5532_v49 = vadd.f32 %v9064_v2, %v12416_v15  ;;  %v9066_v25 = vadd.f32 %v5069_v46, %v4140_v36  ;;  %v5071_v53 = vpop.f32.mrb[135].mxu0  ;;  %v1304_v15 = vpop.permute.xlu0 %1303  ;;  %v4156_v36 = vadd.f32 %v13810_v45, %v1299_v59  ;;  %v13815_v45 = vld [vmem:[#allocation52_spill] sm:$0xff] }
 0x465   : > { %v5535_v44 = vadd.f32 %v9066_v25, %v12425_v30  ;;  %v5764_v50 = vmax.f32 %v5532_v49, 0.0 }
 0x467   : > { %v5765_v57 = vmax.f32 %v5535_v44, 0.0  ;;  %6991 = vmatmul.mubr.bf16.gmra.mrb[72].mxu1 %v10120_v62  ;;  %v12858_v3 = vpop.permute.xlu0 %1393  ;;  %v1319_v44 = vpop.permute.xlu1 %1318 }
 0x468   : > { %v5074_v51 = vpop.f32.mrb[136].mxu0  ;;  %6998 = vmatprep.mubr.bf16.mxu1 %v10125_v16  ;;  %v10131_v16 = vld [vmem:[%s13603_s3 + $0xec] ss:$28 sps:$4 sm:$0xff]  }
 0x469   : > { %v12848_v22 = vpack.c.bf16 %v5765_v57, %v5764_v50  ;;  %v9068_v61 = vadd.f32 %v5074_v51, %v4145_v33  ;;  %v5076_v19 = vpop.f32.mrb[137].mxu0  ;;  %v4161_v33 = vadd.f32 %v13811_v35, %v1304_v15  ;;  %v13812_v51 = vld [vmem:[#allocation49_spill] sm:$0xff]  ;;  %v10129_v15 = vld [vmem:[%s13603_s3 + $0xe8] ss:$28 sps:$4 sm:$0xff]  }
 0x46a   : > { %v5077_v43 = vpop.f32.mrb[138].mxu0  ;;  %v4164_v26 = vadd.f32 %v13812_v51, %v1309_v4  ;;  %v10134_v4 = vld [vmem:[%s13603_s3 + $0x124] ss:$28 sps:$4 sm:$0xff]   ;;  %v10137_v35 = vld [vmem:[%s13603_s3 + $0x15c] ss:$28 sps:$4 sm:$0xff]  }
 0x46b   : > { %v9070_v55 = vadd.f32 %v5077_v43, %v4148_v58  ;;  %v5540_v38 = vadd.f32 %v9068_v61, %v12449_v31  ;;  %v5079_v30 = vpop.f32.mrb[139].mxu0  ;;  %v1314_v62 = vpop.permute.xlu0 %1313 }
 0x46d   : > { %v5543_v32 = vadd.f32 %v9070_v55, %v12463_v63  ;;  %v5766_v52 = vmax.f32 %v5540_v38, 0.0 }
 0x46f   : > { %v5767_v27 = vmax.f32 %v5543_v32, 0.0  ;;  %6999 = vmatmul.mubr.bf16.gmra.mrb[76].mxu1 %v10123_v21  ;;  %v12878_v43 = vpop.permute.xlu0 %1403  ;;  %v12884_v21 = vpop.permute.xlu1 %1408 }
 0x470   : > { %v5082_v31 = vpop.f32.mrb[140].mxu0  ;;  %7006 = vmatprep.mubr.bf16.mxu1 %v10128_v14  ;;  %v13813_v14 = vld [vmem:[#allocation99_spill] sm:$0xff] }
 0x471   : > { %v12864_v2 = vpack.c.bf16 %v5767_v27, %v5766_v52  ;;  %v9072_v42 = vadd.f32 %v5082_v31, %v4153_v48  ;;  %v5084_v46 = vpop.f32.mrb[141].mxu0  ;;  %v4169_v48 = vadd.f32 %v13814_v8, %v1314_v62  ;;  %v10132_v62 = vld [vmem:[%s13603_s3 + $0x120] ss:$28 sps:$4 sm:$0xff]  }
 0x472   : > { %v5085_v49 = vpop.f32.mrb[142].mxu0 }
 0x473   : > { %v5548_v63 = vadd.f32 %v9072_v42, %v12447_v29  ;;  %v9074_v25 = vadd.f32 %v5085_v49, %v4156_v36  ;;  %v5087_v53 = vpop.f32.mrb[143].mxu0  ;;  %v1324_v31 = vpop.permute.xlu0 %1323  ;;  %v4172_v36 = vadd.f32 %v13815_v45, %v1319_v44 }
 0x474   : > { %v13816_v53 = vld [vmem:[#allocation101_spill] sm:$0xff] }
 0x475   : > { %v5551_v59 = vadd.f32 %v9074_v25, %v12458_v20  ;;  %v5768_v50 = vmax.f32 %v5548_v63, 0.0  ;;  %v1329_v63 = vpop.permute.xlu1 %1328 }
 0x477   : > { %v5769_v57 = vmax.f32 %v5551_v59, 0.0  ;;  %7007 = vmatmul.mubr.bf16.gmra.mrb[80].mxu1 %v10126_v34 }
 0x478   : > { %v5090_v29 = vpop.f32.mrb[144].mxu0  ;;  %7014 = vmatprep.mubr.bf16.mxu1 %v10131_v16 }
 0x479   : > { %v12876_v58 = vpack.c.bf16 %v5769_v57, %v5768_v50  ;;  %v9076_v61 = vadd.f32 %v5090_v29, %v4161_v33  ;;  %v5092_v19 = vpop.f32.mrb[145].mxu0  ;;  %v13817_v33 = vld [vmem:[#allocation36_spill] sm:$0xff]  ;;  %v12902_v50 = vpop.permute.xlu0 %1413  ;;  %v13818_v57 = vld [vmem:[#allocation55_spill] sm:$0xff] }
 0x47a   : > { %v5093_v55 = vpop.f32.mrb[146].mxu0  ;;  %v4177_v29 = vadd.f32 %v13818_v57, %v1324_v31  ;;  %v13820_v31 = vld [vmem:[#allocation40_spill] sm:$0xff] }
 0x47b   : > { %v9078_v38 = vadd.f32 %v5093_v55, %v4164_v26  ;;  %v5556_v20 = vadd.f32 %v9076_v61, %v12481_v24  ;;  %v5095_v30 = vpop.f32.mrb[147].mxu0  ;;  %v12905_v61 = vpop.permute.xlu1 %1418  ;;  %v13819_v55 = vld [vmem:[#allocation56_spill] sm:$0xff] }
 0x47d   : > { %v5559_v32 = vadd.f32 %v9078_v38, %v13813_v14  ;;  %v5770_v52 = vmax.f32 %v5556_v20, 0.0  ;;  %v4180_v38 = vadd.f32 %v13819_v55, %v1329_v63 }
 0x47f   : > { %v5771_v27 = vmax.f32 %v5559_v32, 0.0  ;;  %7015 = vmatmul.mubr.bf16.gmra.mrb[84].mxu1 %v10129_v15  ;;  %v1339_v45 = vpop.permute.xlu1 %1338 }
 0x480   : > { %v5098_v24 = vpop.f32.mrb[148].mxu0  ;;  %7022 = vmatprep.mubr.bf16.mxu1 %v10134_v4 }
 0x481   : > { %v12892_v42 = vpack.c.bf16 %v5771_v27, %v5770_v52  ;;  %v9080_v46 = vadd.f32 %v5098_v24, %v4169_v48  ;;  %v5100_v49 = vpop.f32.mrb[149].mxu0  ;;  %v10135_v48 = vld [vmem:[%s13603_s3 + $0x158] ss:$28 sps:$4 sm:$0xff]   ;;  %v1334_v52 = vpop.permute.xlu0 %1333 }
 0x482   : > { %v5101_v25 = vpop.f32.mrb[150].mxu0  ;;  %v10140_v27 = vld [vmem:[%s13603_s3 + $0x194] ss:$28 sps:$4 sm:$0xff]  }
 0x483   : > { %v5564_v34 = vadd.f32 %v9080_v46, %v13816_v53  ;;  %v9082_v16 = vadd.f32 %v5101_v25, %v4172_v36  ;;  %v5103_v59 = vpop.f32.mrb[151].mxu0  ;;  %v13821_v36 = vld [vmem:[#allocation59_spill] sm:$0xff] }
 0x484   : > { %v4185_v46 = vadd.f32 %v13821_v36, %v1334_v52 }
 0x485   : > { %v5567_v44 = vadd.f32 %v9082_v16, %v13817_v33  ;;  %v5772_v51 = vmax.f32 %v5564_v34, 0.0 }
 0x487   : > { %v5773_v26 = vmax.f32 %v5567_v44, 0.0  ;;  %7023 = vmatmul.mubr.bf16.gmra.mrb[88].mxu1 %v10132_v62 }
 0x488   : > { %v5106_v19 = vpop.f32.mrb[152].mxu0  ;;  %7030 = vmatprep.mubr.bf16.mxu1 %v10137_v35  ;;  %v13823_v35 = vld [vmem:[#allocation38_spill] sm:$0xff] }
 0x489   : > { %v12908_v20 = vpack.c.bf16 %v5773_v26, %v5772_v51  ;;  %v9084_v30 = vadd.f32 %v5106_v19, %v4177_v29  ;;  %v5108_v15 = vpop.f32.mrb[153].mxu0  ;;  %v10138_v29 = vld [vmem:[%s13603_s3 + $0x190] ss:$28 sps:$4 sm:$0xff]  }
 0x48a   : > { %v5109_v4 = vpop.f32.mrb[154].mxu0  ;;  %v10143_v51 = vld [vmem:[%s13603_s3 + $0x1cc] ss:$28 sps:$4 sm:$0xff]   ;;  %v13824_v26 = vld [vmem:[#allocation100_spill] sm:$0xff] }
 0x48b   : > { %v9086_v14 = vadd.f32 %v5109_v4, %v4180_v38  ;;  %v5572_v32 = vadd.f32 %v9084_v30, %v12509_v0  ;;  %v5111_v8 = vpop.f32.mrb[155].mxu0  ;;  %v13822_v0 = vld [vmem:[#allocation62_spill] sm:$0xff]  ;;  %v13825_v30 = vld [vmem:[#allocation65_spill] sm:$0xff] }
 0x48c   : > { %v4188_v53 = vadd.f32 %v13822_v0, %v1339_v45  ;;  %v4193_v15 = vadd.f32 %v13825_v30, %v12730_v54  ;;  %v10146_v54 = vld [vmem:[%s13603_s3 + $0x204] ss:$28 sps:$4 sm:$0xff]  }
 0x48d   : > { %v5575_v24 = vadd.f32 %v9086_v14, %v13820_v31  ;;  %v5774_v49 = vmax.f32 %v5572_v32, 0.0  ;;  %v13827_v31 = vld [vmem:[#allocation103_spill] sm:$0xff] }
 0x48f   : > { %v5775_v63 = vmax.f32 %v5575_v24, 0.0  ;;  %7031 = vmatmul.mubr.bf16.gmra.mrb[92].mxu1 %v10135_v48  ;;  %v13826_v48 = vld [vmem:[#allocation66_spill] sm:$0xff] }
 0x490   : > { %v5114_v25 = vpop.f32.mrb[156].mxu0  ;;  %7038 = vmatprep.mubr.bf16.mxu1 %v10140_v27  ;;  %v4196_v52 = vadd.f32 %v13826_v48, %v12736_v18  ;;  %v13829_v18 = vld [vmem:[#allocation69_spill] sm:$0xff] }
 0x491   : > { %v12920_v34 = vpack.c.bf16 %v5775_v63, %v5774_v49  ;;  %v9088_v16 = vadd.f32 %v5114_v25, %v4185_v46  ;;  %v5116_v59 = vpop.f32.mrb[157].mxu0  ;;  %v10141_v46 = vld [vmem:[%s13603_s3 + $0x1c8] ss:$28 sps:$4 sm:$0xff]  }
 0x492   : > { %v5117_v62 = vpop.f32.mrb[158].mxu0  ;;  %v13828_v49 = vld [vmem:[#allocation46_spill] sm:$0xff] }
 0x493   : > { %v5580_v33 = vadd.f32 %v9088_v16, %v13823_v35  ;;  %v9090_v44 = vadd.f32 %v5117_v62, %v4188_v53  ;;  %v5119_v57 = vpop.f32.mrb[159].mxu0  ;;  %v4201_v53 = vadd.f32 %v13829_v18, %v12760_v60  ;;  %v13830_v35 = vld [vmem:[#allocation70_spill] sm:$0xff]  ;;  %v10149_v60 = vld [vmem:[%s13603_s3 + $0x23c] ss:$28 sps:$4 sm:$0xff]  }
 0x495   : > { %v5583_v19 = vadd.f32 %v9090_v44, %v13824_v26  ;;  %v5776_v55 = vmax.f32 %v5580_v33, 0.0  ;;  %v4204_v33 = vadd.f32 %v13830_v35, %v12764_v17 }
 0x497   : > { %v5777_v38 = vmax.f32 %v5583_v19, 0.0  ;;  %7039 = vmatmul.mubr.bf16.gmra.mrb[96].mxu1 %v10138_v29  ;;  %v13831_v29 = vld [vmem:[#allocation43_spill] sm:$0xff] }
 0x498   : > { %v5122_v4 = vpop.f32.mrb[160].mxu0  ;;  %7046 = vmatprep.mubr.bf16.mxu1 %v10143_v51 }
 0x499   : > { %v12932_v14 = vpack.c.bf16 %v5777_v38, %v5776_v55  ;;  %v9092_v32 = vadd.f32 %v5122_v4, %v4193_v15  ;;  %v5124_v8 = vpop.f32.mrb[161].mxu0  ;;  %v10144_v55 = vld [vmem:[%s13603_s3 + $0x200] ss:$28 sps:$4 sm:$0xff]  }
 0x49a   : > { %v5125_v27 = vpop.f32.mrb[162].mxu0  ;;  %v13832_v38 = vld [vmem:[#allocation105_spill] sm:$0xff] }
 0x49b   : > { %v5588_v24 = vadd.f32 %v9092_v32, %v13827_v31  ;;  %v9094_v45 = vadd.f32 %v5125_v27, %v4196_v52  ;;  %v5127_v36 = vpop.f32.mrb[163].mxu0  ;;  %v13833_v4 = vld [vmem:[#allocation73_spill] sm:$0xff]  ;;  %v13834_v27 = vld [vmem:[#allocation76_spill] sm:$0xff] }
 0x49c   : > { %v4209_v32 = vadd.f32 %v13833_v4, %v12785_v39  ;;  %v4212_v31 = vadd.f32 %v13834_v27, %v12791_v7  ;;  %v10152_v39 = vld [vmem:[%s13603_s3 + $0x274] ss:$28 sps:$4 sm:$0xff]  }
 0x49d   : > { %v5591_v63 = vadd.f32 %v9094_v45, %v13828_v49  ;;  %v5778_v25 = vmax.f32 %v5588_v24, 0.0  ;;  %v13835_v49 = vld [vmem:[#allocation104_spill] sm:$0xff] }
 0x49f   : > { %v5779_v0 = vmax.f32 %v5591_v63, 0.0  ;;  %7047 = vmatmul.mubr.bf16.gmra.mrb[100].mxu1 %v10141_v46 }
 0x4a0   : > { %v5130_v16 = vpop.f32.mrb[164].mxu0  ;;  %7054 = vmatprep.mubr.bf16.mxu1 %v10146_v54  ;;  %v10147_v54 = vld [vmem:[%s13603_s3 + $0x238] ss:$28 sps:$4 sm:$0xff]  }
 0x4a1   : > { %v9096_v59 = vadd.f32 %v5130_v16, %v4201_v53  ;;  %v5132_v62 = vpop.f32.mrb[165].mxu0  ;;  %v5846_v44 = vpack.c.bf16 %v5779_v0, %v5778_v25 }
 0x4a2   : > { %v5133_v57 = vpop.f32.mrb[166].mxu0 }
 0x4a3   : > { %v5596_v51 = vadd.f32 %v9096_v59, %v13831_v29  ;;  %v9098_v26 = vadd.f32 %v5133_v57, %v4204_v33  ;;  %v5135_v19 = vpop.f32.mrb[167].mxu0  ;;  %8606 = vmatprep.subr.bf16.mxu1 %v5846_v44  ;;  %v13837_v59 = vld [vmem:[#allocation78_spill] sm:$0xff] }
 0x4a4   : > { %8607 = vmatpush3.bf16.msra.mxu1 %v12832_v10  ;;  %v4220_v62 = vadd.f32 %v13837_v59, %v12815_v40  ;;  %v13838_v44 = vld [vmem:[#allocation102_spill] sm:$0xff]  ;;  %v10155_v40 = vld [vmem:[%s13603_s3 + $0x2ac] ss:$28 sps:$4 sm:$0xff]   ;;  %v13844_v59 = vld [vmem:[#allocation81_spill] sm:$0xff] }
 0x4a5   : > { %v5599_v30 = vadd.f32 %v9098_v26, %v13832_v38  ;;  %v5780_v17 = vmax.f32 %v5596_v51, 0.0 }
 0x4a7   : > { %v5781_v15 = vmax.f32 %v5599_v30, 0.0  ;;  %7055 = vmatmul.mubr.bf16.gmra.mrb[104].mxu1 %v10144_v55 }
 0x4a8   : > { %v5138_v8 = vpop.f32.mrb[168].mxu0  ;;  %7062 = vmatprep.mubr.bf16.mxu1 %v10149_v60  ;;  %v13839_v60 = vld [vmem:[#allocation48_spill] sm:$0xff] }
 0x4a9   : > { %v9100_v48 = vadd.f32 %v5138_v8, %v4209_v32  ;;  %v5140_v52 = vpop.f32.mrb[169].mxu0  ;;  %v5847_v10 = vpack.c.bf16 %v5781_v15, %v5780_v17  ;;  %v13840_v32 = vld [vmem:[#allocation79_spill] sm:$0xff] }
 0x4aa   : > { %v5141_v24 = vpop.f32.mrb[170].mxu0  ;;  %v4225_v8 = vadd.f32 %v13840_v32, %v12834_v6  ;;  %v10153_v6 = vld [vmem:[%s13603_s3 + $0x2a8] ss:$28 sps:$4 sm:$0xff]  }
 0x4ab   : > { %v5604_v45 = vadd.f32 %v9100_v48, %v12568_v28  ;;  %v9102_v36 = vadd.f32 %v5141_v24, %v4212_v31  ;;  %v5143_v46 = vpop.f32.mrb[171].mxu0  ;;  %8608 = vmatprep.subr.bf16.mxu1 %v5847_v10  ;;  %v13836_v28 = vld [vmem:[#allocation77_spill] sm:$0xff] }
 0x4ac   : > { %8609 = vmatpush3.bf16.msra.mxu1 %v12848_v22  ;;  %v4217_v0 = vadd.f32 %v13836_v28, %v12811_v41  ;;  %v10150_v41 = vld [vmem:[%s13603_s3 + $0x270] ss:$28 sps:$4 sm:$0xff]  }
 0x4ad   : > { %v5607_v63 = vadd.f32 %v9102_v36, %v13835_v49  ;;  %v5782_v7 = vmax.f32 %v5604_v45, 0.0  ;;  %v13842_v36 = vld [vmem:[#allocation2_spill] sm:$0xff] }
 0x4af   : > { %v5783_v25 = vmax.f32 %v5607_v63, 0.0  ;;  %7063 = vmatmul.mubr.bf16.gmra.mrb[108].mxu1 %v10147_v54 }
 0x4b0   : > { %v5146_v18 = vpop.f32.mrb[172].mxu0  ;;  %7070 = vmatprep.mubr.bf16.mxu1 %v10152_v39 }
 0x4b1   : > { %v9104_v53 = vadd.f32 %v5146_v18, %v4217_v0  ;;  %v5148_v16 = vpop.f32.mrb[173].mxu0  ;;  %v5848_v22 = vpack.c.bf16 %v5783_v25, %v5782_v7  ;;  %v13843_v25 = vld [vmem:[#allocation3_spill] sm:$0xff] }
 0x4b2   : > { %v5149_v35 = vpop.f32.mrb[174].mxu0  ;;  %v8398_v33 = vpop.f32.mrb[4].mxu1 }
 0x4b3   : > { %v5612_v57 = vadd.f32 %v9104_v53, %v13838_v44  ;;  %v9106_v29 = vadd.f32 %v5149_v35, %v4220_v62  ;;  %v5151_v51 = vpop.f32.mrb[175].mxu0  ;;  %v8399_v26 = vpop.f32.mrb[5].mxu1  ;;  %8610 = vmatprep.subr.bf16.mxu1 %v5848_v22  ;;  %v4233_v62 = vadd.f32 %v13844_v59, %v12858_v3  ;;  %v10156_v3 = vld [vmem:[%s13603_s3 + $0x2e0] ss:$28 sps:$4 sm:$0xff]  }
 0x4b4   : > { %v12978_v19 = vadd.f32 %v8399_v26, %v8398_v33  ;;  %v8401_v55 = vpop.f32.mrb[6].mxu1  ;;  %8611 = vmatpush3.bf16.msra.mxu1 %v12864_v2  ;;  %v13841_v2 = vld [vmem:[#allocation80_spill] sm:$0xff]  ;;  %v13846_v26 = vld [vmem:[#allocation54_spill] sm:$0xff]  ;;  %v13850_v59 = vld [vmem:[#allocation85_spill] sm:$0xff] }
 0x4b5   : > { %v5615_v38 = vadd.f32 %v9106_v29, %v13839_v60  ;;  %v8402_v30 = vpop.f32.mrb[7].mxu1  ;;  %v5784_v15 = vmax.f32 %v5612_v57, 0.0  ;;  %v4228_v31 = vadd.f32 %v13841_v2, %v12840_v56  ;;  %v10158_v56 = vld [vmem:[%s13603_s3 + $0x2e4] ss:$28 sps:$4 sm:$0xff]  }
 0x4b6   : > { %v12985_v17 = vadd.f32 %v8402_v30, %v8401_v55 }
 0x4b7   : > { %v5785_v4 = vmax.f32 %v5615_v38, 0.0  ;;  %7071 = vmatmul.mubr.bf16.gmra.mrb[112].mxu1 %v10150_v41 }
 0x4b8   : > { %v5154_v48 = vpop.f32.mrb[176].mxu0  ;;  %7078 = vmatprep.mubr.bf16.mxu1 %v10155_v40 }
 0x4b9   : > { %v9108_v52 = vadd.f32 %v5154_v48, %v4225_v8  ;;  %v5156_v27 = vpop.f32.mrb[177].mxu0  ;;  %v5849_v10 = vpack.c.bf16 %v5785_v4, %v5784_v15  ;;  %v13847_v15 = vld [vmem:[#allocation57_spill] sm:$0xff] }
 0x4ba   : > { %v5157_v24 = vpop.f32.mrb[178].mxu0  ;;  %v8404_v45 = vpop.f32.mrb[8].mxu1  ;;  %v13848_v27 = vld [vmem:[#allocation83_spill] sm:$0xff] }
 0x4bb   : > { %v5620_v46 = vadd.f32 %v9108_v52, %v13842_v36  ;;  %v9110_v54 = vadd.f32 %v5157_v24, %v4228_v31  ;;  %v5159_v39 = vpop.f32.mrb[179].mxu0  ;;  %v8405_v49 = vpop.f32.mrb[9].mxu1  ;;  %8612 = vmatprep.subr.bf16.mxu1 %v5849_v10  ;;  %v4241_v2 = vadd.f32 %v13848_v27, %v12878_v43  ;;  %v10159_v43 = vld [vmem:[%s13603_s3 + $0x318] ss:$28 sps:$4 sm:$0xff]  }
 0x4bc   : > { %v12995_v63 = vadd.f32 %v8405_v49, %v8404_v45  ;;  %v8407_v7 = vpop.f32.mrb[10].mxu1  ;;  %8613 = vmatpush3.bf16.msra.mxu1 %v12876_v58  ;;  %v13845_v58 = vld [vmem:[#allocation82_spill] sm:$0xff] }
 0x4bd   : > { %v5623_v28 = vadd.f32 %v9110_v54, %v13843_v25  ;;  %v8408_v0 = vpop.f32.mrb[11].mxu1  ;;  %v5786_v53 = vmax.f32 %v5620_v46, 0.0  ;;  %v4236_v44 = vadd.f32 %v13845_v58, %v12861_v13  ;;  %v10161_v13 = vld [vmem:[%s13603_s3 + $0x31c] ss:$28 sps:$4 sm:$0xff]  }
 0x4be   : > { %v13002_v18 = vadd.f32 %v8408_v0, %v8407_v7 }
 0x4bf   : > { %v5787_v16 = vmax.f32 %v5623_v28, 0.0  ;;  %7079 = vmatmul.mubr.bf16.gmra.mrb[116].mxu1 %v10153_v6 }
 0x4c0   : > { %v5162_v22 = vpop.f32.mrb[180].mxu0  ;;  %7086 = vmatprep.mubr.bf16.mxu1 %v10158_v56 }
 0x4c1   : > { %v9112_v35 = vadd.f32 %v5162_v22, %v4233_v62  ;;  %v5164_v33 = vpop.f32.mrb[181].mxu0  ;;  %v5850_v57 = vpack.c.bf16 %v5787_v16, %v5786_v53  ;;  %v4249_v62 = vadd.f32 %v13850_v59, %v12902_v50  ;;  %v10162_v50 = vld [vmem:[%s13603_s3 + $0x350] ss:$28 sps:$4 sm:$0xff]  }
 0x4c2   : > { %v5165_v29 = vpop.f32.mrb[182].mxu0  ;;  %v8410_v51 = vpop.f32.mrb[12].mxu1 }
 0x4c3   : > { %v5628_v41 = vadd.f32 %v9112_v35, %v13846_v26  ;;  %v9114_v55 = vadd.f32 %v5165_v29, %v4236_v44  ;;  %v5167_v40 = vpop.f32.mrb[183].mxu0  ;;  %v8411_v60 = vpop.f32.mrb[13].mxu1  ;;  %8614 = vmatprep.subr.bf16.mxu1 %v5850_v57 }
 0x4c4   : > { %v13012_v38 = vadd.f32 %v8411_v60, %v8410_v51  ;;  %v8413_v30 = vpop.f32.mrb[14].mxu1  ;;  %8615 = vmatpush3.bf16.msra.mxu1 %v12892_v42  ;;  %v13849_v42 = vld [vmem:[#allocation84_spill] sm:$0xff] }
 0x4c5   : > { %v5631_v4 = vadd.f32 %v9114_v55, %v13847_v15  ;;  %v8414_v32 = vpop.f32.mrb[15].mxu1  ;;  %v5788_v48 = vmax.f32 %v5628_v41, 0.0  ;;  %v4244_v45 = vadd.f32 %v13849_v42, %v12884_v21  ;;  %v10164_v21 = vld [vmem:[%s13603_s3 + $0x354] ss:$28 sps:$4 sm:$0xff]   ;;  %v1424_v15 = vpop.permute.xlu0 %1423 }
 0x4c6   : > { %v13019_v8 = vadd.f32 %v8414_v32, %v8413_v30 }
 0x4c7   : > { %v5789_v52 = vmax.f32 %v5631_v4, 0.0  ;;  %7087 = vmatmul.mubr.bf16.gmra.mrb[120].mxu1 %v10156_v3  ;;  %v13853_v3 = vld [vmem:[#allocation61_spill] sm:$0xff] }
 0x4c8   : > { %v5170_v31 = vpop.f32.mrb[184].mxu0  ;;  %7094 = vmatprep.mubr.bf16.mxu1 %v10161_v13 }
 0x4c9   : > { %v9116_v10 = vadd.f32 %v5170_v31, %v4241_v2  ;;  %v5172_v24 = vpop.f32.mrb[185].mxu0  ;;  %v5851_v36 = vpack.c.bf16 %v5789_v52, %v5788_v48  ;;  %v13854_v52 = vld [vmem:[#allocation87_spill] sm:$0xff]  ;;  %v1429_v2 = vpop.permute.xlu1 %1428 }
 0x4ca   : > { %v5173_v46 = vpop.f32.mrb[186].mxu0  ;;  %v8416_v54 = vpop.f32.mrb[16].mxu1  ;;  %v4257_v27 = vadd.f32 %v13854_v52, %v1424_v15  ;;  %v13855_v24 = vld [vmem:[#allocation88_spill] sm:$0xff] }
 0x4cb   : > { %v5636_v39 = vadd.f32 %v9116_v10, %v12624_v11  ;;  %v9118_v49 = vadd.f32 %v5173_v46, %v4244_v45  ;;  %v5175_v6 = vpop.f32.mrb[187].mxu0  ;;  %v8417_v7 = vpop.f32.mrb[17].mxu1  ;;  %8616 = vmatprep.subr.bf16.mxu1 %v5851_v36  ;;  %v4260_v42 = vadd.f32 %v13855_v24, %v1429_v2  ;;  %v13862_v24 = vld [vmem:[#allocation91_spill] sm:$0xff] }
 0x4cc   : > { %v13029_v56 = vadd.f32 %v8417_v7, %v8416_v54  ;;  %v8419_v25 = vpop.f32.mrb[18].mxu1  ;;  %8617 = vmatpush3.bf16.msra.mxu1 %v12908_v20  ;;  %v13851_v20 = vld [vmem:[#allocation86_spill] sm:$0xff]  ;;  %v13856_v54 = vld [vmem:[#allocation63_spill] sm:$0xff]  ;;  %v1434_v59 = vpop.permute.xlu0 %1433 }
 0x4cd   : > { %v5639_v28 = vadd.f32 %v9118_v49, %v12637_v23  ;;  %v8420_v11 = vpop.f32.mrb[19].mxu1  ;;  %v5790_v53 = vmax.f32 %v5636_v39, 0.0  ;;  %v4252_v58 = vadd.f32 %v13851_v20, %v12905_v61  ;;  %v13852_v23 = vld [vmem:[#allocation107_spill] sm:$0xff]  ;;  %v10167_v61 = vld [vmem:[%s13603_s3 + $0x14] ss:$28 sps:$4 sm:$0xff]  }
 0x4ce   : > { %v13036_v0 = vadd.f32 %v8420_v11, %v8419_v25  ;;  %v13857_v11 = vld [vmem:[#allocation106_spill] sm:$0xff] }
 0x4cf   : > { %v5791_v16 = vmax.f32 %v5639_v28, 0.0  ;;  %7095 = vmatmul.mubr.bf16.gmra.mrb[124].mxu1 %v10159_v43  ;;  %v10165_v43 = vld [vmem:[%s13603_s3 + $0x10] ss:$28 sps:$4 sm:$0xff]  }
 0x4d0   : > { %v5178_v22 = vpop.f32.mrb[188].mxu0  ;;  %7102 = vmatprep.mubr.bf16.mxu1 %v10164_v21  ;;  %v10170_v28 = vld [vmem:[%s13603_s3 + $0x4c] ss:$28 sps:$4 sm:$0xff]   ;;  %v1444_v2 = vpop.permute.xlu0 %1443 }
 0x4d1   : > { %v9120_v35 = vadd.f32 %v5178_v22, %v4249_v62  ;;  %v5180_v33 = vpop.f32.mrb[189].mxu0  ;;  %v5852_v44 = vpack.c.bf16 %v5791_v16, %v5790_v53 }
 0x4d2   : > { %v5181_v57 = vpop.f32.mrb[190].mxu0  ;;  %v8422_v29 = vpop.f32.mrb[20].mxu1  ;;  %v13858_v33 = vld [vmem:[#allocation89_spill] sm:$0xff] }
 0x4d3   : > { %v5644_v51 = vadd.f32 %v9120_v35, %v13852_v23  ;;  %v9122_v26 = vadd.f32 %v5181_v57, %v4252_v58  ;;  %v5183_v41 = vpop.f32.mrb[191].mxu0  ;;  %v8423_v55 = vpop.f32.mrb[21].mxu1  ;;  %8618 = vmatprep.subr.bf16.mxu1 %v5852_v44  ;;  %v4265_v20 = vadd.f32 %v13858_v33, %v1434_v59 }
 0x4d4   : > { %v13046_v40 = vadd.f32 %v8423_v55, %v8422_v29  ;;  %v8425_v60 = vpop.f32.mrb[22].mxu1  ;;  %8619 = vmatpush3.bf16.msra.mxu1 %v12920_v34  ;;  %v1439_v58 = vpop.permute.xlu1 %1438  ;;  %v13859_v29 = vld [vmem:[#allocation90_spill] sm:$0xff]  ;;  %v13860_v55 = vld [vmem:[#allocation4_spill] sm:$0xff] }
 0x4d5   : > { %v5647_v30 = vadd.f32 %v9122_v26, %v13853_v3  ;;  %v8426_v13 = vpop.f32.mrb[23].mxu1  ;;  %v5792_v32 = vmax.f32 %v5644_v51, 0.0  ;;  %v4268_v23 = vadd.f32 %v13859_v29, %v1439_v58 }
 0x4d6   : > { %v13053_v4 = vadd.f32 %v8426_v13, %v8425_v60 }
 0x4d7   : > { %v5793_v48 = vmax.f32 %v5647_v30, 0.0  ;;  %7103 = vmatmul.mubr.bf16.gmra.mrb[128].mxu1 %v10162_v50  ;;  %v10168_v30 = vld [vmem:[%s13603_s3 + $0x48] ss:$28 sps:$4 sm:$0xff]  }
 0x4d8   : > { %v5186_v31 = vpop.f32.mrb[192].mxu0  ;;  %7143 = vmatprep.mubr.bf16.mxu1 %v10167_v61 }
 0x4d9   : > { %v9124_v10 = vadd.f32 %v5186_v31, %v4257_v27  ;;  %v5188_v34 = vpop.f32.mrb[193].mxu0  ;;  %v5853_v45 = vpack.c.bf16 %v5793_v48, %v5792_v32  ;;  %v10173_v32 = vld [vmem:[%s13603_s3 + $0x84] ss:$28 sps:$4 sm:$0xff]   ;;  %v13861_v48 = vld [vmem:[#allocation5_spill] sm:$0xff] }
 0x4da   : > { %v5189_v36 = vpop.f32.mrb[194].mxu0  ;;  %v8428_v46 = vpop.f32.mrb[24].mxu1 }
 0x4db   : > { %v5652_v39 = vadd.f32 %v9124_v10, %v13856_v54  ;;  %v9126_v49 = vadd.f32 %v5189_v36, %v4260_v42  ;;  %v5191_v6 = vpop.f32.mrb[195].mxu0  ;;  %v8429_v7 = vpop.f32.mrb[25].mxu1  ;;  %8620 = vmatprep.subr.bf16.mxu1 %v5853_v45  ;;  %v4273_v42 = vadd.f32 %v13862_v24, %v1444_v2  ;;  %v10179_v2 = vld [vmem:[%s13603_s3 + $0xf4] ss:$28 sps:$4 sm:$0xff]  }
 0x4dc   : > { %v13061_v25 = vadd.f32 %v8429_v7, %v8428_v46  ;;  %v8431_v21 = vpop.f32.mrb[26].mxu1  ;;  %8621 = vmatpush3.bf16.msra.mxu1 %v12932_v14  ;;  %v1449_v45 = vpop.permute.xlu1 %1448 }
 0x4dd   : > { %v5655_v53 = vadd.f32 %v9126_v49, %v13857_v11  ;;  %v8432_v16 = vpop.f32.mrb[27].mxu1  ;;  %v5794_v22 = vmax.f32 %v5652_v39, 0.0  ;;  %v13863_v39 = vld [vmem:[#allocation92_spill] sm:$0xff] }
 0x4de   : > { %v13068_v62 = vadd.f32 %v8432_v16, %v8431_v21  ;;  %v4276_v49 = vadd.f32 %v13863_v39, %v1449_v45  ;;  %v10171_v16 = vld [vmem:[%s13603_s3 + $0x80] ss:$28 sps:$4 sm:$0xff]  }
 0x4df   : > { %v5795_v35 = vmax.f32 %v5655_v53, 0.0  ;;  %7144 = vmatmul.mubr.bf16.vlgmr.msra.gmra.mrb[132].mxu1 %v10165_v43 }
 0x4e0   : > { %v5194_v44 = vpop.f32.mrb[196].mxu0  ;;  %7151 = vmatprep.mubr.bf16.mxu1 %v10170_v28 }
 0x4e1   : > { %v9128_v57 = vadd.f32 %v5194_v44, %v4265_v20  ;;  %v5196_v14 = vpop.f32.mrb[197].mxu0  ;;  %v5854_v51 = vpack.c.bf16 %v5795_v35, %v5794_v22  ;;  %v10176_v35 = vld [vmem:[%s13603_s3 + $0xbc] ss:$28 sps:$4 sm:$0xff]  }
 0x4e2   : > { %v5197_v26 = vpop.f32.mrb[198].mxu0  ;;  %v8434_v41 = vpop.f32.mrb[28].mxu1  ;;  %v13864_v14 = vld [vmem:[#allocation93_spill] sm:$0xff] }
 0x4e3   : > { %v5660_v50 = vadd.f32 %v9128_v57, %v13860_v55  ;;  %v9130_v60 = vadd.f32 %v5197_v26, %v4268_v23  ;;  %v5199_v61 = vpop.f32.mrb[199].mxu0  ;;  %v8435_v3 = vpop.f32.mrb[29].mxu1  ;;  %8895 = vmatprep.subr.bf16.mxu1 %v5854_v51  ;;  %v13865_v55 = vld [vmem:[#allocation94_spill] sm:$0xff] }
 0x4e4   : > { %v13076_v13 = vadd.f32 %v8435_v3, %v8434_v41  ;;  %v8437_v15 = vpop.f32.mrb[30].mxu1  ;;  %8896 = vmatpush3.bf16.msra.mxu1 %v5854_v51  ;;  %v1459_v23 = vpop.permute.xlu1 %1458 }
 0x4e5   : > { %v5663_v52 = vadd.f32 %v9130_v60, %v13861_v48  ;;  %v8438_v27 = vpop.f32.mrb[31].mxu1  ;;  %v5796_v10 = vmax.f32 %v5660_v50, 0.0  ;;  %v4284_v50 = vadd.f32 %v13865_v55, %v1459_v23  ;;  %v10174_v48 = vld [vmem:[%s13603_s3 + $0xb8] ss:$28 sps:$4 sm:$0xff]  }
 0x4e6   : > { %v13082_v31 = vadd.f32 %v8438_v27, %v8437_v15 }
 0x4e7   : > { %v5797_v34 = vmax.f32 %v5663_v52, 0.0  ;;  %7152 = vmatmul.mubr.bf16.gmra.mrb[136].mxu1 %v10168_v30 }
 0x4e8   : > { %v5202_v36 = vpop.f32.mrb[200].mxu0  ;;  %7159 = vmatprep.mubr.bf16.mxu1 %v10173_v32  ;;  %v1469_v39 = vpop.permute.xlu1 %1468 }
 0x4e9   : > { %v9132_v46 = vadd.f32 %v5202_v36, %v4273_v42  ;;  %v5204_v54 = vpop.f32.mrb[201].mxu0  ;;  %v5855_v6 = vpack.c.bf16 %v5797_v34, %v5796_v10  ;;  %v13866_v10 = vld [vmem:[#allocation68_spill] sm:$0xff] }
 0x4ea   : > { %v5205_v7 = vpop.f32.mrb[202].mxu0  ;;  %v8440_v43 = vpop.f32.mrb[32].mxu1 }
 0x4eb   : > { %v5668_v21 = vadd.f32 %v9132_v46, %v12679_v9  ;;  %v9134_v28 = vadd.f32 %v5205_v7, %v4276_v49  ;;  %v5207_v11 = vpop.f32.mrb[203].mxu0  ;;  %v8441_v53 = vpop.f32.mrb[33].mxu1  ;;  %8897 = vmatprep.subr.bf16.mxu1 %v5855_v6  ;;  %v13867_v46 = vld [vmem:[#allocation95_spill] sm:$0xff] }
 0x4ec   : > { %v13090_v59 = vadd.f32 %v8441_v53, %v8440_v43  ;;  %v8443_v22 = vpop.f32.mrb[34].mxu1  ;;  %8898 = vmatpush3.bf16.msra.mxu1 %v5855_v6  ;;  %v1454_v9 = vpop.permute.xlu0 %1453  ;;  %v13868_v43 = vld [vmem:[#allocation96_spill] sm:$0xff] }
 0x4ed   : > { %v5671_v33 = vadd.f32 %v9134_v28, %v12691_v47  ;;  %v8444_v20 = vpop.f32.mrb[35].mxu1  ;;  %v5798_v44 = vmax.f32 %v5668_v21, 0.0  ;;  %v4281_v29 = vadd.f32 %v13864_v14, %v1454_v9  ;;  %v4292_v21 = vadd.f32 %v13868_v43, %v1469_v39 }
 0x4ee   : > { %v13096_v58 = vadd.f32 %v8444_v20, %v8443_v22  ;;  %v10177_v20 = vld [vmem:[%s13603_s3 + $0xf0] ss:$28 sps:$4 sm:$0xff]  }
 0x4ef   : > { %v5799_v57 = vmax.f32 %v5671_v33, 0.0  ;;  %7160 = vmatmul.mubr.bf16.gmra.mrb[140].mxu1 %v10171_v16 }
 0x4f0   : > { %v5210_v51 = vpop.f32.mrb[204].mxu0  ;;  %7167 = vmatprep.mubr.bf16.mxu1 %v10176_v35 }
 0x4f1   : > { %v9136_v26 = vadd.f32 %v5210_v51, %v4281_v29  ;;  %v5212_v41 = vpop.f32.mrb[205].mxu0  ;;  %v5856_v60 = vpack.c.bf16 %v5799_v57, %v5798_v44  ;;  %v10182_v57 = vld [vmem:[%s13603_s3 + $0x12c] ss:$28 sps:$4 sm:$0xff]  }
 0x4f2   : > { %v5213_v61 = vpop.f32.mrb[206].mxu0  ;;  %v8446_v3 = vpop.f32.mrb[36].mxu1  ;;  %v13869_v41 = vld [vmem:[#allocation97_spill] sm:$0xff] }
 0x4f3   : > { %v5676_v47 = vadd.f32 %v9136_v26, %v12677_v37  ;;  %v9138_v30 = vadd.f32 %v5213_v61, %v4284_v50  ;;  %v5215_v15 = vpop.f32.mrb[207].mxu0  ;;  %v8447_v32 = vpop.f32.mrb[37].mxu1  ;;  %8899 = vmatprep.subr.bf16.mxu1 %v5856_v60 }
 0x4f4   : > { %v13104_v52 = vadd.f32 %v8447_v32, %v8446_v3  ;;  %v8449_v27 = vpop.f32.mrb[38].mxu1  ;;  %8900 = vmatpush3.bf16.msra.mxu1 %v5856_v60  ;;  %v1464_v37 = vpop.permute.xlu0 %1463 }
 0x4f5   : > { %v5679_v34 = vadd.f32 %v9138_v30, %v13866_v10  ;;  %v8450_v24 = vpop.f32.mrb[39].mxu1  ;;  %v5800_v45 = vmax.f32 %v5676_v47, 0.0  ;;  %v4289_v54 = vadd.f32 %v13867_v46, %v1464_v37  ;;  %v1479_v50 = vpop.permute.xlu1 %1478  ;;  %v13870_v47 = vld [vmem:[#allocation98_spill] sm:$0xff] }
 0x4f6   : > { %v13110_v42 = vadd.f32 %v8450_v24, %v8449_v27  ;;  %v4300_v30 = vadd.f32 %v13870_v47, %v1479_v50 }
 0x4f7   : > { %v5801_v36 = vmax.f32 %v5679_v34, 0.0  ;;  %7168 = vmatmul.mubr.bf16.gmra.mrb[144].mxu1 %v10174_v48  ;;  %v10180_v34 = vld [vmem:[%s13603_s3 + $0x128] ss:$28 sps:$4 sm:$0xff]  }
 0x4f8   : > { %v5218_v49 = vpop.f32.mrb[208].mxu0  ;;  %7175 = vmatprep.mubr.bf16.mxu1 %v10179_v2 }
 0x4f9   : > { %v9140_v6 = vadd.f32 %v5218_v49, %v4289_v54  ;;  %v5220_v7 = vpop.f32.mrb[209].mxu0  ;;  %v5857_v28 = vpack.c.bf16 %v5801_v36, %v5800_v45  ;;  %v10185_v45 = vld [vmem:[%s13603_s3 + $0x164] ss:$28 sps:$4 sm:$0xff]  }
 0x4fa   : > { %v5221_v11 = vpop.f32.mrb[210].mxu0  ;;  %v8452_v53 = vpop.f32.mrb[40].mxu1  ;;  %v13871_v36 = vld [vmem:[#allocation6_spill] sm:$0xff] }
 0x4fb   : > { %v5684_v16 = vadd.f32 %v9140_v6, %v12706_v5  ;;  %v9142_v22 = vadd.f32 %v5221_v11, %v4292_v21  ;;  %v5223_v35 = vpop.f32.mrb[211].mxu0  ;;  %v8453_v33 = vpop.f32.mrb[41].mxu1  ;;  %8901 = vmatprep.subr.bf16.mxu1 %v5857_v28  ;;  %v10183_v21 = vld [vmem:[%s13603_s3 + $0x160] ss:$28 sps:$4 sm:$0xff]  }
 0x4fc   : > { %v13118_v9 = vadd.f32 %v8453_v33, %v8452_v53  ;;  %v8455_v44 = vpop.f32.mrb[42].mxu1  ;;  %8902 = vmatpush3.bf16.msra.mxu1 %v5857_v28  ;;  %v1474_v5 = vpop.permute.xlu0 %1473  ;;  %v10188_v53 = vld [vmem:[%s13603_s3 + $0x19c] ss:$28 sps:$4 sm:$0xff]  }
 0x4fd   : > { %v5687_v14 = vadd.f32 %v9142_v22, %v12715_v12  ;;  %v8456_v29 = vpop.f32.mrb[43].mxu1  ;;  %v5802_v51 = vmax.f32 %v5684_v16, 0.0  ;;  %v4297_v55 = vadd.f32 %v13869_v41, %v1474_v5  ;;  %v10191_v5 = vld [vmem:[%s13603_s3 + $0x1d4] ss:$28 sps:$4 sm:$0xff]  }
 0x4fe   : > { %v13124_v23 = vadd.f32 %v8456_v29, %v8455_v44 }
 0x4ff   : > { %v5803_v26 = vmax.f32 %v5687_v14, 0.0  ;;  %7176 = vmatmul.mubr.bf16.gmra.mrb[148].mxu1 %v10177_v20  ;;  %v13152_v20 = vpop.permute.xlu1 %6107 }
 0x500   : > { %v5226_v60 = vpop.f32.mrb[212].mxu0  ;;  %7183 = vmatprep.mubr.bf16.mxu1 %v10182_v57  ;;  %v13150_v35 = vpop.permute.xlu0 %6102  ;;  %v10186_v57 = vld [vmem:[%s13603_s3 + $0x198] ss:$28 sps:$4 sm:$0xff]  }
 0x501   : > { %v9144_v61 = vadd.f32 %v5226_v60, %v4297_v55  ;;  %v5228_v3 = vpop.f32.mrb[213].mxu0  ;;  %v5858_v15 = vpack.c.bf16 %v5803_v26, %v5802_v51 }
 0x502   : > { %v5229_v32 = vpop.f32.mrb[214].mxu0  ;;  %v8458_v48 = vpop.f32.mrb[44].mxu1 }
 0x503   : > { %v5692_v12 = vadd.f32 %v9144_v61, %v12704_v1  ;;  %v9146_v27 = vadd.f32 %v5229_v32, %v4300_v30  ;;  %v5231_v2 = vpop.f32.mrb[215].mxu0  ;;  %v8459_v10 = vpop.f32.mrb[45].mxu1  ;;  %8903 = vmatprep.subr.bf16.mxu1 %v5858_v15  ;;  %v10189_v61 = vld [vmem:[%s13603_s3 + $0x1d0] ss:$28 sps:$4 sm:$0xff]  }
 0x504   : > { %v13132_v24 = vadd.f32 %v8459_v10, %v8458_v48  ;;  %v8461_v37 = vpop.f32.mrb[46].mxu1  ;;  %8904 = vmatpush3.bf16.msra.mxu1 %v5858_v15  ;;  %v6023_v41 = vpop.permute.xlu0 %6022  ;;  %v10194_v30 = vld [vmem:[%s13603_s3 + $0x20c] ss:$28 sps:$4 sm:$0xff]  }
 0x505   : > { %v5695_v46 = vadd.f32 %v9146_v27, %v13871_v36  ;;  %v8462_v54 = vpop.f32.mrb[47].mxu1  ;;  %v5804_v39 = vmax.f32 %v5692_v12, 0.0  ;;  %v6028_v55 = vpop.permute.xlu1 %6027  ;;  %v10197_v36 = vld [vmem:[%s13603_s3 + $0x244] ss:$28 sps:$4 sm:$0xff]  }
 0x506   : > { %v13138_v1 = vadd.f32 %v8462_v54, %v8461_v37 }
 0x507   : > { %v5805_v49 = vmax.f32 %v5695_v46, 0.0  ;;  %7184 = vmatmul.mubr.bf16.gmra.mrb[152].mxu1 %v10180_v34  ;;  %v10192_v34 = vld [vmem:[%s13603_s3 + $0x208] ss:$28 sps:$4 sm:$0xff]  }
 0x508   : > { %7191 = vmatprep.mubr.bf16.mxu1 %v10185_v45  ;;  %v13172_v15 = vpop.permute.xlu0 %6112 }
 0x509   : > { %v5859_v6 = vpack.c.bf16 %v5805_v49, %v5804_v39  ;;  %v13176_v12 = vpop.permute.xlu1 %6117 }
 0x50a   : > { %v8464_v7 = vpop.f32.mrb[48].mxu1 }
 0x50b   : > { %v8465_v43 = vpop.f32.mrb[49].mxu1  ;;  %8905 = vmatprep.subr.bf16.mxu1 %v5859_v6 }
 0x50c   : > { %v13143_v28 = vadd.f32 %v8465_v43, %v8464_v7  ;;  %v8467_v11 = vpop.f32.mrb[50].mxu1  ;;  %8906 = vmatpush3.bf16.msra.mxu1 %v5859_v6  ;;  %v6033_v2 = vpop.permute.xlu0 %6032 }
 0x50d   : > { %v8468_v16 = vpop.f32.mrb[51].mxu1  ;;  %v6038_v46 = vpop.permute.xlu1 %6037 }
 0x50e   : > { %v13148_v22 = vadd.f32 %v8468_v16, %v8467_v11  ;;  %v10200_v16 = vld [vmem:[%s13603_s3 + $0x27c] ss:$28 sps:$4 sm:$0xff]  }
 0x50f   : > { %7192 = vmatmul.mubr.bf16.gmra.mrb[156].mxu1 %v10183_v21  ;;  %v10195_v21 = vld [vmem:[%s13603_s3 + $0x240] ss:$28 sps:$4 sm:$0xff]  }
 0x510   : > { %7199 = vmatprep.mubr.bf16.mxu1 %v10188_v53  ;;  %v13188_v49 = vpop.permute.xlu0 %6122 }
 0x511   : > { %v13190_v7 = vpop.permute.xlu1 %6127 }
 0x512   : > { %v8470_v33 = vpop.f32.mrb[52].mxu1 }
 0x513   : > { %v8471_v44 = vpop.f32.mrb[53].mxu1 }
 0x514   : > { %v13157_v14 = vadd.f32 %v8471_v44, %v8470_v33  ;;  %v8473_v29 = vpop.f32.mrb[54].mxu1 }
 0x515   : > { %v8474_v51 = vpop.f32.mrb[55].mxu1 }
 0x516   : > { %v13162_v26 = vadd.f32 %v8474_v51, %v8473_v29  ;;  %v6048_v29 = vpop.permute.xlu1 %6047 }
 0x517   : > { %7200 = vmatmul.mubr.bf16.gmra.mrb[160].mxu1 %v10186_v57  ;;  %v6043_v57 = vpop.permute.xlu0 %6042 }
 0x518   : > { %7207 = vmatprep.mubr.bf16.mxu1 %v10191_v5 }
 0x51a   : > { %v8476_v50 = vpop.f32.mrb[56].mxu1 }
 0x51b   : > { %v8477_v60 = vpop.f32.mrb[57].mxu1 }
 0x51c   : > { %v13167_v3 = vadd.f32 %v8477_v60, %v8476_v50  ;;  %v8479_v47 = vpop.f32.mrb[58].mxu1  ;;  %v10198_v50 = vld [vmem:[%s13603_s3 + $0x278] ss:$28 sps:$4 sm:$0xff]   ;;  %v6824_v60 = vadd.f32 %v12978_v19, %v6023_v41 }
 0x51d   : > { %v8480_v32 = vpop.f32.mrb[59].mxu1 }
 0x51e   : > { %v13174_v48 = vadd.f32 %v8480_v32, %v8479_v47  ;;  %v13209_v32 = vpop.permute.xlu0 %6132 }
 0x51f   : > { %7208 = vmatmul.mubr.bf16.gmra.mrb[164].mxu1 %v10189_v61 }
 0x520   : > { %7215 = vmatprep.mubr.bf16.mxu1 %v10194_v30  ;;  %v10203_v30 = vld [vmem:[%s13603_s3 + $0x2b4] ss:$28 sps:$4 sm:$0xff]  }
 0x522   : > { %v8482_v27 = vpop.f32.mrb[60].mxu1  ;;  %v6053_v41 = vpop.permute.xlu0 %6052 }
 0x523   : > { %v8483_v10 = vpop.f32.mrb[61].mxu1 }
 0x524   : > { %v13181_v37 = vadd.f32 %v8483_v10, %v8482_v27  ;;  %v8485_v45 = vpop.f32.mrb[62].mxu1  ;;  %v6827_v10 = vadd.f32 %v12985_v17, %v6028_v55  ;;  %v10206_v55 = vld [vmem:[%s13603_s3 + $0x2ec] ss:$28 sps:$4 sm:$0xff]  }
 0x525   : > { %v8486_v54 = vpop.f32.mrb[63].mxu1 }
 0x526   : > { %v13186_v39 = vadd.f32 %v8486_v54, %v8485_v45 }
 0x527   : > { %7216 = vmatmul.mubr.bf16.gmra.mrb[168].mxu1 %v10192_v34 }
 0x528   : > { %7223 = vmatprep.mubr.bf16.mxu1 %v10197_v36  ;;  %v13214_v36 = vpop.permute.xlu1 %6137 }
 0x52a   : > { %v8488_v6 = vpop.f32.mrb[64].mxu1 }
 0x52b   : > { %v8489_v43 = vpop.f32.mrb[65].mxu1 }
 0x52c   : > { %v13195_v11 = vadd.f32 %v8489_v43, %v8488_v6  ;;  %v8491_v53 = vpop.f32.mrb[66].mxu1  ;;  %v10201_v43 = vld [vmem:[%s13603_s3 + $0x2b0] ss:$28 sps:$4 sm:$0xff]  }
 0x52d   : > { %v8492_v33 = vpop.f32.mrb[67].mxu1 }
 0x52e   : > { %v13200_v44 = vadd.f32 %v8492_v33, %v8491_v53 }
 0x52f   : > { %7224 = vmatmul.mubr.bf16.gmra.mrb[172].mxu1 %v10195_v21  ;;  %v6832_v21 = vadd.f32 %v12995_v63, %v6033_v2 }
 0x530   : > { %7231 = vmatprep.mubr.bf16.mxu1 %v10200_v16  ;;  %v6058_v16 = vpop.permute.xlu1 %6057 }
 0x532   : > { %v8510_v5 = vpop.f32.mrb[68].mxu1 }
 0x533   : > { %v8511_v51 = vpop.f32.mrb[69].mxu1 }
 0x534   : > { %v8512_v61 = vadd.f32 %v8511_v51, %v8510_v5  ;;  %v8513_v47 = vpop.f32.mrb[70].mxu1  ;;  %v6835_v5 = vadd.f32 %v13002_v18, %v6038_v46  ;;  %v13232_v2 = vpop.permute.xlu1 %6147 }
 0x535   : > { %v8514_v27 = vpop.f32.mrb[71].mxu1 }
 0x536   : > { %v13212_v34 = vadd.f32 %v8512_v61, %v6824_v60  ;;  %v8515_v45 = vadd.f32 %v8514_v27, %v8513_v47  ;;  %v13230_v61 = vpop.permute.xlu0 %6142  ;;  %v6840_v27 = vadd.f32 %v13012_v38, %v6043_v57  ;;  %v10207_v57 = vld [vmem:[%s13603_s3 + $0x320] ss:$28 sps:$4 sm:$0xff]  }
 0x537   : > { %7232 = vmatmul.mubr.bf16.gmra.mrb[176].mxu1 %v10198_v50 }
 0x538   : > { %v13216_v54 = vadd.f32 %v8515_v45, %v6827_v10  ;;  %7239 = vmatprep.mubr.bf16.mxu1 %v10203_v30  ;;  %v10204_v30 = vld [vmem:[%s13603_s3 + $0x2e8] ss:$28 sps:$4 sm:$0xff]  }
 0x539   : > { %v10209_v10 = vld [vmem:[%s13603_s3 + $0x324] ss:$28 sps:$4 sm:$0xff]  }
 0x53a   : > { %v8516_v19 = vpop.f32.mrb[72].mxu1 }
 0x53b   : > { %v8517_v6 = vpop.f32.mrb[73].mxu1 }
 0x53c   : > { %v8518_v53 = vadd.f32 %v8517_v6, %v8516_v19  ;;  %v8519_v17 = vpop.f32.mrb[74].mxu1  ;;  %v6843_v19 = vadd.f32 %v13019_v8, %v6048_v29  ;;  %v10212_v8 = vld [vmem:[%s13603_s3 + $0x35c] ss:$28 sps:$4 sm:$0xff]  }
 0x53d   : > { %v8520_v33 = vpop.f32.mrb[75].mxu1 }
 0x53e   : > { %v13226_v51 = vadd.f32 %v8518_v53, %v6832_v21  ;;  %v8521_v50 = vadd.f32 %v8520_v33, %v8519_v17  ;;  %v6063_v21 = vpop.permute.xlu0 %6062  ;;  %v6068_v17 = vpop.permute.xlu1 %6067  ;;  %v6848_v33 = vadd.f32 %v13029_v56, %v6053_v41 }
 0x53f   : > { %7240 = vmatmul.mubr.bf16.gmra.mrb[180].mxu1 %v10201_v43 }
 0x540   : > { %v13228_v60 = vadd.f32 %v8521_v50, %v6835_v5  ;;  %7247 = vmatprep.mubr.bf16.mxu1 %v10206_v55 }
 0x542   : > { %v8522_v63 = vpop.f32.mrb[76].mxu1  ;;  %v13253_v29 = vpop.permute.xlu0 %6152 }
 0x543   : > { %v8523_v47 = vpop.f32.mrb[77].mxu1 }
 0x544   : > { %v8524_v18 = vadd.f32 %v8523_v47, %v8522_v63  ;;  %v8525_v46 = vpop.f32.mrb[78].mxu1  ;;  %v6851_v47 = vadd.f32 %v13036_v0, %v6058_v16  ;;  %v10213_v16 = vld [vmem:[%s13603_s3 + $0x18] ss:$28 sps:$4 sm:$0xff]  }
 0x545   : > { %v8526_v45 = vpop.f32.mrb[79].mxu1 }
 0x546   : > { %v13242_v6 = vadd.f32 %v8524_v18, %v6840_v27  ;;  %v8527_v43 = vadd.f32 %v8526_v45, %v8525_v46  ;;  %v13258_v18 = vpop.permute.xlu1 %6157  ;;  %v6073_v41 = vpop.permute.xlu0 %6072  ;;  %v10210_v45 = vld [vmem:[%s13603_s3 + $0x358] ss:$28 sps:$4 sm:$0xff]  }
 0x547   : > { %7248 = vmatmul.mubr.bf16.gmra.mrb[184].mxu1 %v10204_v30 }
 0x548   : > { %v13244_v53 = vadd.f32 %v8527_v43, %v6843_v19  ;;  %7255 = vmatprep.mubr.bf16.mxu1 %v10209_v10  ;;  %v6856_v19 = vadd.f32 %v13046_v40, %v6063_v21 }
 0x54a   : > { %v8528_v55 = vpop.f32.mrb[80].mxu1  ;;  %v13275_v40 = vpop.permute.xlu0 %6162 }
 0x54b   : > { %v8529_v38 = vpop.f32.mrb[81].mxu1 }
 0x54c   : > { %v8530_v5 = vadd.f32 %v8529_v38, %v8528_v55  ;;  %v8531_v50 = vpop.f32.mrb[82].mxu1  ;;  %v6078_v55 = vpop.permute.xlu1 %6077 }
 0x54d   : > { %v8532_v63 = vpop.f32.mrb[83].mxu1 }
 0x54e   : > { %v13256_v30 = vadd.f32 %v8530_v5, %v6848_v33  ;;  %v8533_v27 = vadd.f32 %v8532_v63, %v8531_v50 }
 0x54f   : > { %7256 = vmatmul.mubr.bf16.gmra.mrb[188].mxu1 %v10207_v57  ;;  %v6859_v57 = vadd.f32 %v13053_v4, %v6068_v17  ;;  %v6864_v4 = vadd.f32 %v13061_v25, %v6073_v41 }
 0x550   : > { %v13260_v46 = vadd.f32 %v8533_v27, %v6851_v47  ;;  %7263 = vmatprep.mubr.bf16.mxu1 %v10212_v8  ;;  %v13277_v8 = vpop.permute.xlu1 %6167  ;;  %v10214_v47 = vld [vmem:[%s13603_s3 + $0x50] ss:$28 sps:$4 sm:$0xff]  }
 0x552   : > { %v8534_v56 = vpop.f32.mrb[84].mxu1 }
 0x553   : > { %v8535_v10 = vpop.f32.mrb[85].mxu1 }
 0x554   : > { %v8536_v43 = vadd.f32 %v8535_v10, %v8534_v56  ;;  %v8537_v0 = vpop.f32.mrb[86].mxu1  ;;  %v10215_v56 = vld [vmem:[%s13603_s3 + $0x88] ss:$28 sps:$4 sm:$0xff]   ;;  %v6088_v25 = vpop.permute.xlu1 %6087 }
 0x555   : > { %v8538_v38 = vpop.f32.mrb[87].mxu1 }
 0x556   : > { %v13270_v33 = vadd.f32 %v8536_v43, %v6856_v19  ;;  %v8539_v5 = vadd.f32 %v8538_v38, %v8537_v0  ;;  %v6083_v0 = vpop.permute.xlu0 %6082 }
 0x557   : > { %7264 = vmatmul.mubr.bf16.gmra.mrb[192].mxu1 %v10210_v45  ;;  %v6867_v45 = vadd.f32 %v13068_v62, %v6078_v55 }
 0x558   : > { %v13272_v50 = vadd.f32 %v8539_v5, %v6859_v57  ;;  %8907 = vmatprep.mubr.msk.bf16.mxu1 %vm6740_vm1, %v10213_v16  ;;  %v10216_v57 = vld [vmem:[%s13603_s3 + $0xc0] ss:$28 sps:$4 sm:$0xff]   ;;  %v6872_v5 = vadd.f32 %v13076_v13, %v6083_v0  ;;  %v10218_v0 = vld [vmem:[%s13603_s3 + $0x130] ss:$28 sps:$4 sm:$0xff]  }
 0x55a   : > { %v8540_v21 = vpop.f32.mrb[88].mxu1 }
 0x55b   : > { %v8541_v63 = vpop.f32.mrb[89].mxu1 }
 0x55c   : > { %v8542_v17 = vadd.f32 %v8541_v63, %v8540_v21  ;;  %v8543_v27 = vpop.f32.mrb[90].mxu1  ;;  %v10217_v21 = vld [vmem:[%s13603_s3 + $0xf8] ss:$28 sps:$4 sm:$0xff]   ;;  %v13300_v63 = vpop.permute.xlu0 %6172 }
 0x55d   : > { %v8544_v10 = vpop.f32.mrb[91].mxu1 }
 0x55e   : > { %v13287_v19 = vadd.f32 %v8542_v17, %v6864_v4  ;;  %v8545_v43 = vadd.f32 %v8544_v10, %v8543_v27  ;;  %v6875_v4 = vadd.f32 %v13082_v31, %v6088_v25 }
 0x55f   : > { %8908 = vmatmul.mubr.msk.bf16.vlgmr.msra.gmra.mrb[196].mxu1 %vm6740_vm1, %v10214_v47 }
 0x560   : > { %v13290_v16 = vadd.f32 %v8545_v43, %v6867_v45  ;;  %8911 = vmatprep.mubr.msk.bf16.mxu1 %vm6740_vm1, %v10215_v56  ;;  %v13305_v56 = vpop.permute.xlu1 %6177  ;;  %v6093_v45 = vpop.permute.xlu0 %6092 }
 0x561   : > { %v6880_v31 = vadd.f32 %v13090_v59, %v6093_v45 }
 0x562   : > { %v8546_v41 = vpop.f32.mrb[92].mxu1 }
 0x563   : > { %v8547_v38 = vpop.f32.mrb[93].mxu1 }
 0x564   : > { %v8548_v62 = vadd.f32 %v8547_v38, %v8546_v41  ;;  %v8549_v55 = vpop.f32.mrb[94].mxu1  ;;  %v10219_v38 = vld [vmem:[%s13603_s3 + $0x168] ss:$28 sps:$4 sm:$0xff]  }
 0x565   : > { %v8550_v47 = vpop.f32.mrb[95].mxu1 }
 0x566   : > { %v13303_v17 = vadd.f32 %v8548_v62, %v6872_v5  ;;  %v8551_v27 = vadd.f32 %v8550_v47, %v8549_v55 }
 0x567   : > { %8912 = vmatmul.mubr.msk.bf16.gmra.mrb[200].mxu1 %vm6740_vm1, %v10216_v57  ;;  %v6098_v57 = vpop.permute.xlu1 %6097 }
 0x568   : > { %v13308_v10 = vadd.f32 %v8551_v27, %v6875_v4  ;;  %8915 = vmatprep.mubr.msk.bf16.mxu1 %vm6740_vm1, %v10217_v21  ;;  %v6883_v62 = vadd.f32 %v13096_v58, %v6098_v57  ;;  %v10220_v27 = vld [vmem:[%s13603_s3 + $0x1a0] ss:$28 sps:$4 sm:$0xff]   ;;  %v10222_v57 = vld [vmem:[%s13603_s3 + $0x210] ss:$28 sps:$4 sm:$0xff]  }
 0x56a   : > { %v8552_v13 = vpop.f32.mrb[96].mxu1 }
 0x56b   : > { %v8553_v43 = vpop.f32.mrb[97].mxu1 }
 0x56c   : > { %v8554_v25 = vadd.f32 %v8553_v43, %v8552_v13  ;;  %v8555_v41 = vpop.f32.mrb[98].mxu1  ;;  %v6888_v13 = vadd.f32 %v13104_v52, %v13150_v35  ;;  %v10221_v43 = vld [vmem:[%s13603_s3 + $0x1d8] ss:$28 sps:$4 sm:$0xff]  }
 0x56d   : > { %v8556_v5 = vpop.f32.mrb[99].mxu1 }
 0x56e   : > { %v13319_v55 = vadd.f32 %v8554_v25, %v6880_v31  ;;  %v8557_v21 = vadd.f32 %v8556_v5, %v8555_v41  ;;  %v6891_v31 = vadd.f32 %v13110_v42, %v13152_v20  ;;  %v6896_v5 = vadd.f32 %v13118_v9, %v13172_v15  ;;  %v10223_v20 = vld [vmem:[%s13603_s3 + $0x248] ss:$28 sps:$4 sm:$0xff]  }
 0x56f   : > { %8916 = vmatmul.mubr.msk.bf16.gmra.mrb[204].mxu1 %vm6740_vm1, %v10218_v0 }
 0x570   : > { %v13322_v47 = vadd.f32 %v8557_v21, %v6883_v62  ;;  %8919 = vmatprep.mubr.msk.bf16.mxu1 %vm6740_vm1, %v10219_v38 }
 0x572   : > { %v8558_v59 = vpop.f32.mrb[100].mxu1 }
 0x573   : > { %v8559_v4 = vpop.f32.mrb[101].mxu1 }
 0x574   : > { %v8560_v45 = vadd.f32 %v8559_v4, %v8558_v59  ;;  %v8561_v58 = vpop.f32.mrb[102].mxu1  ;;  %v6899_v59 = vadd.f32 %v13124_v23, %v13176_v12  ;;  %v10225_v12 = vld [vmem:[%s13603_s3 + $0x2b8] ss:$28 sps:$4 sm:$0xff]  }
 0x575   : > { %v8562_v0 = vpop.f32.mrb[103].mxu1 }
 0x576   : > { %v13335_v25 = vadd.f32 %v8560_v45, %v6888_v13  ;;  %v8563_v41 = vadd.f32 %v8562_v0, %v8561_v58  ;;  %v10224_v45 = vld [vmem:[%s13603_s3 + $0x280] ss:$28 sps:$4 sm:$0xff]   ;;  %v6904_v58 = vadd.f32 %v13132_v24, %v13188_v49 }
 0x577   : > { %8920 = vmatmul.mubr.msk.bf16.gmra.mrb[208].mxu1 %vm6740_vm1, %v10220_v27 }
 0x578   : > { %v13338_v38 = vadd.f32 %v8563_v41, %v6891_v31  ;;  %8923 = vmatprep.mubr.msk.bf16.mxu1 %vm6740_vm1, %v10221_v43  ;;  %v6907_v31 = vadd.f32 %v13138_v1, %v13190_v7  ;;  %v10227_v7 = vld [vmem:[%s13603_s3 + $0x328] ss:$28 sps:$4 sm:$0xff]  }
 0x57a   : > { %v8564_v52 = vpop.f32.mrb[104].mxu1 }
 0x57b   : > { %v8565_v35 = vpop.f32.mrb[105].mxu1 }
 0x57c   : > { %v8566_v62 = vadd.f32 %v8565_v35, %v8564_v52  ;;  %v8567_v42 = vpop.f32.mrb[106].mxu1 }
 0x57d   : > { %v8568_v21 = vpop.f32.mrb[107].mxu1 }
 0x57e   : > { %v13351_v4 = vadd.f32 %v8566_v62, %v6896_v5  ;;  %v8569_v27 = vadd.f32 %v8568_v21, %v8567_v42  ;;  %v6912_v5 = vadd.f32 %v13143_v28, %v13209_v32 }
 0x57f   : > { %8924 = vmatmul.mubr.msk.bf16.gmra.mrb[212].mxu1 %vm6740_vm1, %v10222_v57  ;;  %v10226_v57 = vld [vmem:[%s13603_s3 + $0x2f0] ss:$28 sps:$4 sm:$0xff]  }
 0x580   : > { %v13354_v13 = vadd.f32 %v8569_v27, %v6899_v59  ;;  %8927 = vmatprep.mubr.msk.bf16.mxu1 %vm6740_vm1, %v10223_v20  ;;  %v6915_v20 = vadd.f32 %v13148_v22, %v13214_v36 }
 0x582   : > { %v8570_v9 = vpop.f32.mrb[108].mxu1 }
 0x583   : > { %v8571_v15 = vpop.f32.mrb[109].mxu1 }
 0x584   : > { %v8572_v43 = vadd.f32 %v8571_v15, %v8570_v9  ;;  %v8573_v23 = vpop.f32.mrb[110].mxu1  ;;  %v10228_v9 = vld [vmem:[%s13603_s3 + $0x360] ss:$28 sps:$4 sm:$0xff]   ;;  %v6920_v15 = vadd.f32 %v13157_v14, %v13230_v61 }
 0x585   : > { %v8574_v0 = vpop.f32.mrb[111].mxu1 }
 0x586   : > { %v13367_v41 = vadd.f32 %v8572_v43, %v6904_v58  ;;  %v8575_v52 = vadd.f32 %v8574_v0, %v8573_v23  ;;  %v6923_v58 = vadd.f32 %v13162_v26, %v13232_v2 }
 0x587   : > { %8928 = vmatmul.mubr.msk.bf16.gmra.mrb[216].mxu1 %vm6740_vm1, %v10224_v45 }
 0x588   : > { %v13370_v35 = vadd.f32 %v8575_v52, %v6907_v31  ;;  %8931 = vmatprep.mubr.msk.bf16.mxu1 %vm6740_vm1, %v10225_v12  ;;  %v6928_v52 = vadd.f32 %v13167_v3, %v13253_v29  ;;  %v6939_v3 = vadd.f32 %v13186_v39, %v13277_v8 }
 0x58a   : > { %v8576_v24 = vpop.f32.mrb[112].mxu1 }
 0x58b   : > { %v8577_v49 = vpop.f32.mrb[113].mxu1 }
 0x58c   : > { %v8578_v62 = vadd.f32 %v8577_v49, %v8576_v24  ;;  %v8579_v1 = vpop.f32.mrb[114].mxu1  ;;  %v6931_v49 = vadd.f32 %v13174_v48, %v13258_v18 }
 0x58d   : > { %v8580_v42 = vpop.f32.mrb[115].mxu1 }
 0x58e   : > { %v13383_v21 = vadd.f32 %v8578_v62, %v6912_v5  ;;  %v8581_v59 = vadd.f32 %v8580_v42, %v8579_v1  ;;  %v6936_v1 = vadd.f32 %v13181_v37, %v13275_v40  ;;  %v6947_v37 = vadd.f32 %v13200_v44, %v13305_v56 }
 0x58f   : > { %8932 = vmatmul.mubr.msk.bf16.gmra.mrb[220].mxu1 %vm6740_vm1, %v10226_v57 }
 0x590   : > { %v13386_v27 = vadd.f32 %v8581_v59, %v6915_v20  ;;  %8935 = vmatprep.mubr.msk.bf16.mxu1 %vm6740_vm1, %v10227_v7 }
 0x592   : > { %v8582_v28 = vpop.f32.mrb[116].mxu1 }
 0x593   : > { %v8583_v32 = vpop.f32.mrb[117].mxu1 }
 0x594   : > { %v8584_v45 = vadd.f32 %v8583_v32, %v8582_v28  ;;  %v8585_v22 = vpop.f32.mrb[118].mxu1  ;;  %v6944_v32 = vadd.f32 %v13195_v11, %v13300_v63 }
 0x595   : > { %v8586_v36 = vpop.f32.mrb[119].mxu1 }
 0x596   : > { %v13396_v43 = vadd.f32 %v8584_v45, %v6920_v15  ;;  %v8587_v23 = vadd.f32 %v8586_v36, %v8585_v22 }
 0x597   : > { %8936 = vmatmul.mubr.msk.bf16.gmra.mrb[224].mxu1 %vm6740_vm1, %v10228_v9 }
 0x598   : > { %v13399_v12 = vadd.f32 %v8587_v23, %v6923_v58 }
 0x59a   : > { %v8588_v0 = vpop.f32.mrb[120].mxu1 }
 0x59b   : > { %v8589_v31 = vpop.f32.mrb[121].mxu1 }
 0x59c   : > { %v8590_v24 = vadd.f32 %v8589_v31, %v8588_v0  ;;  %v8591_v14 = vpop.f32.mrb[122].mxu1 }
 0x59d   : > { %v8592_v61 = vpop.f32.mrb[123].mxu1 }
 0x59e   : > { %v13405_v57 = vadd.f32 %v8590_v24, %v6928_v52  ;;  %v8593_v26 = vadd.f32 %v8592_v61, %v8591_v14 }
 0x5a0   : > { %v13407_v2 = vadd.f32 %v8593_v26, %v6931_v49 }
 0x5a2   : > { %v8594_v5 = vpop.f32.mrb[124].mxu1 }
 0x5a3   : > { %v8595_v62 = vpop.f32.mrb[125].mxu1 }
 0x5a4   : > { %v8596_v7 = vadd.f32 %v8595_v62, %v8594_v5  ;;  %v8597_v42 = vpop.f32.mrb[126].mxu1 }
 0x5a5   : > { %v8598_v20 = vpop.f32.mrb[127].mxu1 }
 0x5a6   : > { %v13413_v29 = vadd.f32 %v8596_v7, %v6936_v1  ;;  %v8599_v59 = vadd.f32 %v8598_v20, %v8597_v42 }
 0x5a8   : > { %v13415_v48 = vadd.f32 %v8599_v59, %v6939_v3 }
 0x5aa   : > { %v8600_v18 = vpop.f32.mrb[128].mxu1 }
 0x5ab   : > { %v8601_v28 = vpop.f32.mrb[129].mxu1 }
 0x5ac   : > { %v8602_v9 = vadd.f32 %v8601_v28, %v8600_v18  ;;  %v8603_v15 = vpop.f32.mrb[130].mxu1 }
 0x5ad   : > { %v8604_v45 = vpop.f32.mrb[131].mxu1 }
 0x5ae   : > { %v13421_v40 = vadd.f32 %v8602_v9, %v6944_v32  ;;  %v8605_v22 = vadd.f32 %v8604_v45, %v8603_v15 }
 0x5b0   : > { %v13423_v39 = vadd.f32 %v8605_v22, %v6947_v37 }
 0x5b2   : > { %v8622_v8 = vpop.f32.mrb[132].mxu1 }
 0x5b3   : > { %v8623_v36 = vpop.f32.mrb[133].mxu1 }
 0x5b4   : > { %v8624_v58 = vadd.f32 %v8623_v36, %v8622_v8  ;;  %v8625_v23 = vpop.f32.mrb[134].mxu1 }
 0x5b5   : > { %v8626_v0 = vpop.f32.mrb[135].mxu1 }
 0x5b6   : > { %v8627_v31 = vadd.f32 %v8626_v0, %v8625_v23  ;;  %v13426_v52 = vadd.f32 %v8624_v58, %v13212_v34 }
 0x5b8   : > { %v13429_v11 = vadd.f32 %v8627_v31, %v13216_v54 }
 0x5ba   : > { %v8628_v63 = vpop.f32.mrb[136].mxu1 }
 0x5bb   : > { %v8629_v24 = vpop.f32.mrb[137].mxu1 }
 0x5bc   : > { %v8630_v44 = vadd.f32 %v8629_v24, %v8628_v63  ;;  %v8631_v56 = vpop.f32.mrb[138].mxu1 }
 0x5bd   : > { %v8632_v14 = vpop.f32.mrb[139].mxu1 }
 0x5be   : > { %v8633_v61 = vadd.f32 %v8632_v14, %v8631_v56  ;;  %v13432_v49 = vadd.f32 %v8630_v44, %v13226_v51 }
 0x5c0   : > { %v13435_v26 = vadd.f32 %v8633_v61, %v13228_v60 }
 0x5c2   : > { %v8634_v5 = vpop.f32.mrb[140].mxu1 }
 0x5c3   : > { %v8635_v62 = vpop.f32.mrb[141].mxu1 }
 0x5c4   : > { %v8636_v1 = vadd.f32 %v8635_v62, %v8634_v5  ;;  %v8637_v34 = vpop.f32.mrb[142].mxu1 }
 0x5c5   : > { %v8638_v7 = vpop.f32.mrb[143].mxu1 }
 0x5c6   : > { %v8639_v42 = vadd.f32 %v8638_v7, %v8637_v34  ;;  %v13438_v54 = vadd.f32 %v8636_v1, %v13242_v6 }
 0x5c8   : > { %v13441_v20 = vadd.f32 %v8639_v42, %v13244_v53 }
 0x5ca   : > { %v8640_v3 = vpop.f32.mrb[144].mxu1 }
 0x5cb   : > { %v8641_v59 = vpop.f32.mrb[145].mxu1 }
 0x5cc   : > { %v8642_v18 = vadd.f32 %v8641_v59, %v8640_v3  ;;  %v8643_v51 = vpop.f32.mrb[146].mxu1 }
 0x5cd   : > { %v8644_v28 = vpop.f32.mrb[147].mxu1 }
 0x5ce   : > { %v8645_v32 = vadd.f32 %v8644_v28, %v8643_v51  ;;  %v13444_v60 = vadd.f32 %v8642_v18, %v13256_v30 }
 0x5d0   : > { %v13447_v9 = vadd.f32 %v8645_v32, %v13260_v46 }
 0x5d2   : > { %v8646_v15 = vpop.f32.mrb[148].mxu1 }
 0x5d3   : > { %v8647_v45 = vpop.f32.mrb[149].mxu1 }
 0x5d4   : > { %v8648_v37 = vadd.f32 %v8647_v45, %v8646_v15  ;;  %v8649_v6 = vpop.f32.mrb[150].mxu1 }
 0x5d5   : > { %v8650_v22 = vpop.f32.mrb[151].mxu1 }
 0x5d6   : > { %v8651_v8 = vadd.f32 %v8650_v22, %v8649_v6  ;;  %v13450_v53 = vadd.f32 %v8648_v37, %v13270_v33 }
 0x5d8   : > { %v13453_v36 = vadd.f32 %v8651_v8, %v13272_v50 }
 0x5da   : > { %v8652_v58 = vpop.f32.mrb[152].mxu1 }
 0x5db   : > { %v8653_v23 = vpop.f32.mrb[153].mxu1 }
 0x5dc   : > { %v8654_v0 = vadd.f32 %v8653_v23, %v8652_v58  ;;  %v8655_v30 = vpop.f32.mrb[154].mxu1 }
 0x5dd   : > { %v8656_v31 = vpop.f32.mrb[155].mxu1 }
 0x5de   : > { %v8657_v63 = vadd.f32 %v8656_v31, %v8655_v30  ;;  %v13456_v46 = vadd.f32 %v8654_v0, %v13287_v19 }
 0x5e0   : > { %v13459_v24 = vadd.f32 %v8657_v63, %v13290_v16 }
 0x5e2   : > { %v8658_v44 = vpop.f32.mrb[156].mxu1 }
 0x5e3   : > { %v8659_v56 = vpop.f32.mrb[157].mxu1 }
 0x5e4   : > { %v8660_v14 = vadd.f32 %v8659_v56, %v8658_v44  ;;  %v8661_v33 = vpop.f32.mrb[158].mxu1 }
 0x5e5   : > { %v8662_v61 = vpop.f32.mrb[159].mxu1 }
 0x5e6   : > { %v8663_v5 = vadd.f32 %v8662_v61, %v8661_v33  ;;  %v13462_v50 = vadd.f32 %v8660_v14, %v13303_v17 }
 0x5e8   : > { %v13465_v62 = vadd.f32 %v8663_v5, %v13308_v10 }
 0x5ea   : > { %v8664_v1 = vpop.f32.mrb[160].mxu1 }
 0x5eb   : > { %v8665_v34 = vpop.f32.mrb[161].mxu1 }
 0x5ec   : > { %v8666_v7 = vadd.f32 %v8665_v34, %v8664_v1  ;;  %v8667_v19 = vpop.f32.mrb[162].mxu1 }
 0x5ed   : > { %v8668_v42 = vpop.f32.mrb[163].mxu1 }
 0x5ee   : > { %v8669_v3 = vadd.f32 %v8668_v42, %v8667_v19  ;;  %v13468_v16 = vadd.f32 %v8666_v7, %v13319_v55  ;;  %v10231_v55 = vld [vmem:[%s13605_s5 + $0x4] ss:$8 sps:$4 sm:$0xff]  }
 0x5ef   : > { %7561 = vmatprep.mubr.bf16.mxu1 %v10231_v55 }
 0x5f0   : > { %v13471_v59 = vadd.f32 %v8669_v3, %v13322_v47 }
 0x5f2   : > { %v8670_v18 = vpop.f32.mrb[164].mxu1 }
 0x5f3   : > { %v8671_v51 = vpop.f32.mrb[165].mxu1 }
 0x5f4   : > { %v8672_v28 = vadd.f32 %v8671_v51, %v8670_v18  ;;  %v8673_v17 = vpop.f32.mrb[166].mxu1 }
 0x5f5   : > { %v8674_v32 = vpop.f32.mrb[167].mxu1 }
 0x5f6   : > { %v8675_v15 = vadd.f32 %v8674_v32, %v8673_v17  ;;  %v13474_v10 = vadd.f32 %v8672_v28, %v13335_v25 }
 0x5f8   : > { %v13477_v45 = vadd.f32 %v8675_v15, %v13338_v38 }
 0x5fa   : > { %v8676_v37 = vpop.f32.mrb[168].mxu1 }
 0x5fb   : > { %v8677_v6 = vpop.f32.mrb[169].mxu1 }
 0x5fc   : > { %v8678_v47 = vadd.f32 %v8677_v6, %v8676_v37  ;;  %v8679_v22 = vpop.f32.mrb[170].mxu1 }
 0x5fd   : > { %v8680_v8 = vpop.f32.mrb[171].mxu1 }
 0x5fe   : > { %v8681_v58 = vadd.f32 %v8680_v8, %v8679_v22  ;;  %v13483_v23 = vadd.f32 %v8678_v47, %v13351_v4 }
 0x600   : > { %v13486_v25 = vadd.f32 %v8681_v58, %v13354_v13 }
 0x602   : > { %v8682_v0 = vpop.f32.mrb[172].mxu1 }
 0x603   : > { %v8683_v38 = vpop.f32.mrb[173].mxu1 }
 0x604   : > { %v8684_v30 = vadd.f32 %v8683_v38, %v8682_v0  ;;  %v8685_v31 = vpop.f32.mrb[174].mxu1 }
 0x605   : > { %v8686_v63 = vpop.f32.mrb[175].mxu1 }
 0x606   : > { %v8687_v44 = vadd.f32 %v8686_v63, %v8685_v31  ;;  %v13489_v56 = vadd.f32 %v8684_v30, %v13367_v41 }
 0x608   : > { %v13492_v14 = vadd.f32 %v8687_v44, %v13370_v35 }
 0x60a   : > { %v8688_v33 = vpop.f32.mrb[176].mxu1 }
 0x60b   : > { %v8689_v61 = vpop.f32.mrb[177].mxu1 }
 0x60c   : > { %v8690_v5 = vadd.f32 %v8689_v61, %v8688_v33  ;;  %v8691_v4 = vpop.f32.mrb[178].mxu1 }
 0x60d   : > { %v8692_v1 = vpop.f32.mrb[179].mxu1 }
 0x60e   : > { %v8693_v34 = vadd.f32 %v8692_v1, %v8691_v4  ;;  %v13495_v13 = vadd.f32 %v8690_v5, %v13383_v21 }
 0x610   : > { %v13498_v7 = vadd.f32 %v8693_v34, %v13386_v27 }
 0x612   : > { %v8694_v19 = vpop.f32.mrb[180].mxu1 }
 0x613   : > { %v8695_v42 = vpop.f32.mrb[181].mxu1 }
 0x614   : > { %v8696_v3 = vadd.f32 %v8695_v42, %v8694_v19  ;;  %v8697_v41 = vpop.f32.mrb[182].mxu1 }
 0x615   : > { %v8698_v18 = vpop.f32.mrb[183].mxu1 }
 0x616   : > { %v8699_v51 = vadd.f32 %v8698_v18, %v8697_v41  ;;  %v13501_v35 = vadd.f32 %v8696_v3, %v13396_v43 }
 0x618   : > { %v13504_v28 = vadd.f32 %v8699_v51, %v13399_v12 }
 0x61a   : > { %v8700_v17 = vpop.f32.mrb[184].mxu1 }
 0x61b   : > { %v8701_v32 = vpop.f32.mrb[185].mxu1 }
 0x61c   : > { %v8702_v15 = vadd.f32 %v8701_v32, %v8700_v17  ;;  %v8703_v21 = vpop.f32.mrb[186].mxu1 }
 0x61d   : > { %v8704_v55 = vpop.f32.mrb[187].mxu1 }
 0x61e   : > { %v8705_v37 = vadd.f32 %v8704_v55, %v8703_v21  ;;  %v13507_v27 = vadd.f32 %v8702_v15, %v13405_v57 }
 0x620   : > { %v13510_v6 = vadd.f32 %v8705_v37, %v13407_v2 }
 0x622   : > { %v8706_v47 = vpop.f32.mrb[188].mxu1 }
 0x623   : > { %v8707_v22 = vpop.f32.mrb[189].mxu1 }
 0x624   : > { %v8708_v8 = vadd.f32 %v8707_v22, %v8706_v47  ;;  %v8709_v43 = vpop.f32.mrb[190].mxu1 }
 0x625   : > { %v8710_v58 = vpop.f32.mrb[191].mxu1 }
 0x626   : > { %v8711_v0 = vadd.f32 %v8710_v58, %v8709_v43  ;;  %v13513_v12 = vadd.f32 %v8708_v8, %v13413_v29 }
 0x628   : > { %v13516_v38 = vadd.f32 %v8711_v0, %v13415_v48 }
 0x62a   : > { %v8712_v30 = vpop.f32.mrb[192].mxu1 }
 0x62b   : > { %v8713_v31 = vpop.f32.mrb[193].mxu1 }
 0x62c   : > { %v8714_v63 = vadd.f32 %v8713_v31, %v8712_v30  ;;  %v8715_v57 = vpop.f32.mrb[194].mxu1 }
 0x62d   : > { %v8716_v44 = vpop.f32.mrb[195].mxu1 }
 0x62e   : > { %v8717_v33 = vadd.f32 %v8716_v44, %v8715_v57  ;;  %v13519_v2 = vadd.f32 %v8714_v63, %v13421_v40 }
 0x630   : > { %v13522_v61 = vadd.f32 %v8717_v33, %v13423_v39 }
 0x632   : > { %v8909_v5 = vpop.f32.mrb[196].mxu1 }
 0x633   : > { %v7315_v4 = vadd.f32 %v8909_v5, %v13432_v49  ;;  %v7306_v29 = vpop.f32.mrb[197].mxu1 }
 0x634   : > { %v7307_v1 = vadd.f32 %v7306_v29, %v13426_v52  ;;  %v8910_v48 = vpop.f32.mrb[198].mxu1 }
 0x635   : > { %v7318_v34 = vadd.f32 %v8910_v48, %v13435_v26  ;;  %v7309_v19 = vpop.f32.mrb[199].mxu1  ;;  %v7435_v3 = vmax.f32 %v7315_v4, 0.0 }
 0x636   : > { %v7310_v42 = vadd.f32 %v7309_v19, %v13429_v11  ;;  %v7433_v18 = vmax.f32 %v7307_v1, 0.0 }
 0x637   : > { %v7436_v41 = vmax.f32 %v7318_v34, 0.0 }
 0x638   : > { %v7434_v40 = vmax.f32 %v7310_v42, 0.0 }
 0x639   : > { %v13528_v51 = vpack.c.bf16 %v7436_v41, %v7435_v3 }
 0x63a   : > { %v13530_v39 = vpack.c.bf16 %v7434_v40, %v7433_v18  ;;  %v8913_v17 = vpop.f32.mrb[200].mxu1 }
 0x63b   : > { %v7331_v49 = vadd.f32 %v8913_v17, %v13444_v60  ;;  %v7322_v32 = vpop.f32.mrb[201].mxu1 }
 0x63c   : > { %v7323_v52 = vadd.f32 %v7322_v32, %v13438_v54  ;;  %v8914_v15 = vpop.f32.mrb[202].mxu1 }
 0x63d   : > { %v7334_v26 = vadd.f32 %v8914_v15, %v13447_v9  ;;  %v7325_v21 = vpop.f32.mrb[203].mxu1  ;;  %v7439_v55 = vmax.f32 %v7331_v49, 0.0 }
 0x63e   : > { %v7326_v11 = vadd.f32 %v7325_v21, %v13441_v20  ;;  %v7437_v47 = vmax.f32 %v7323_v52, 0.0 }
 0x63f   : > { %v7440_v37 = vmax.f32 %v7334_v26, 0.0 }
 0x640   : > { %v7438_v22 = vmax.f32 %v7326_v11, 0.0 }
 0x641   : > { %v13536_v8 = vpack.c.bf16 %v7440_v37, %v7439_v55 }
 0x642   : > { %v13538_v43 = vpack.c.bf16 %v7438_v22, %v7437_v47  ;;  %v8917_v58 = vpop.f32.mrb[204].mxu1 }
 0x643   : > { %v7347_v60 = vadd.f32 %v8917_v58, %v13456_v46  ;;  %v7338_v0 = vpop.f32.mrb[205].mxu1 }
 0x644   : > { %v7339_v54 = vadd.f32 %v7338_v0, %v13450_v53  ;;  %v8918_v30 = vpop.f32.mrb[206].mxu1 }
 0x645   : > { %v7350_v9 = vadd.f32 %v8918_v30, %v13459_v24  ;;  %v7341_v31 = vpop.f32.mrb[207].mxu1  ;;  %v7443_v63 = vmax.f32 %v7347_v60, 0.0 }
 0x646   : > { %v7342_v20 = vadd.f32 %v7341_v31, %v13453_v36  ;;  %v7441_v44 = vmax.f32 %v7339_v54, 0.0 }
 0x647   : > { %v7444_v57 = vmax.f32 %v7350_v9, 0.0 }
 0x648   : > { %v7442_v33 = vmax.f32 %v7342_v20, 0.0 }
 0x649   : > { %v13544_v5 = vpack.c.bf16 %v7444_v57, %v7443_v63 }
 0x64a   : > { %v13546_v4 = vpack.c.bf16 %v7442_v33, %v7441_v44  ;;  %v8921_v29 = vpop.f32.mrb[208].mxu1 }
 0x64b   : > { %v7363_v46 = vadd.f32 %v8921_v29, %v13468_v16  ;;  %v7354_v1 = vpop.f32.mrb[209].mxu1 }
 0x64c   : > { %v7355_v53 = vadd.f32 %v7354_v1, %v13462_v50  ;;  %v8922_v48 = vpop.f32.mrb[210].mxu1 }
 0x64d   : > { %v7366_v24 = vadd.f32 %v8922_v48, %v13471_v59  ;;  %v7357_v34 = vpop.f32.mrb[211].mxu1  ;;  %v7447_v19 = vmax.f32 %v7363_v46, 0.0 }
 0x64e   : > { %v7358_v36 = vadd.f32 %v7357_v34, %v13465_v62  ;;  %v7445_v3 = vmax.f32 %v7355_v53, 0.0 }
 0x64f   : > { %v7448_v42 = vmax.f32 %v7366_v24, 0.0 }
 0x650   : > { %v7446_v41 = vmax.f32 %v7358_v36, 0.0 }
 0x651   : > { %v13552_v18 = vpack.c.bf16 %v7448_v42, %v7447_v19 }
 0x652   : > { %v13554_v40 = vpack.c.bf16 %v7446_v41, %v7445_v3  ;;  %v8925_v17 = vpop.f32.mrb[212].mxu1 }
 0x653   : > { %v7379_v16 = vadd.f32 %v8925_v17, %v13483_v23  ;;  %v7370_v49 = vpop.f32.mrb[213].mxu1 }
 0x654   : > { %v7371_v50 = vadd.f32 %v7370_v49, %v13474_v10  ;;  %v8926_v32 = vpop.f32.mrb[214].mxu1 }
 0x655   : > { %v7382_v59 = vadd.f32 %v8926_v32, %v13486_v25  ;;  %v7373_v52 = vpop.f32.mrb[215].mxu1  ;;  %v7451_v15 = vmax.f32 %v7379_v16, 0.0  ;;  %v7497_v32 = vpop.permute.xlu1 %7496 }
 0x656   : > { %v7374_v62 = vadd.f32 %v7373_v52, %v13477_v45  ;;  %v7449_v21 = vmax.f32 %v7371_v50, 0.0 }
 0x657   : > { %v7452_v26 = vmax.f32 %v7382_v59, 0.0 }
 0x658   : > { %v7450_v11 = vmax.f32 %v7374_v62, 0.0 }
 0x659   : > { %v7474_v55 = vpack.c.bf16 %v7452_v26, %v7451_v15 }
 0x65a   : > { %v7473_v37 = vpack.c.bf16 %v7450_v11, %v7449_v21  ;;  %v8929_v47 = vpop.f32.mrb[216].mxu1 }
 0x65b   : > { %v7395_v22 = vadd.f32 %v8929_v47, %v13495_v13  ;;  %v7386_v58 = vpop.f32.mrb[217].mxu1 }
 0x65c   : > { %v7387_v23 = vadd.f32 %v7386_v58, %v13489_v56  ;;  %v8930_v60 = vpop.f32.mrb[218].mxu1  ;;  %8740 = vmatprep.subr.bf16.mxu1 %v7473_v37 }
 0x65d   : > { %v7398_v10 = vadd.f32 %v8930_v60, %v13498_v7  ;;  %v7389_v25 = vpop.f32.mrb[219].mxu1  ;;  %8741 = vmatpush3.bf16.msra.mxu1 %v13530_v39  ;;  %v7455_v0 = vmax.f32 %v7395_v22, 0.0 }
 0x65e   : > { %v7390_v45 = vadd.f32 %v7389_v25, %v13492_v14  ;;  %8742 = vmatprep.subr.bf16.mxu1 %v7474_v55  ;;  %v7453_v30 = vmax.f32 %v7387_v23, 0.0  ;;  %v7507_v23 = vpop.permute.xlu1 %7506 }
 0x65f   : > { %v7456_v54 = vmax.f32 %v7398_v10, 0.0 }
 0x660   : > { %v7454_v9 = vmax.f32 %v7390_v45, 0.0 }
 0x661   : > { %v7476_v31 = vpack.c.bf16 %v7456_v54, %v7455_v0  ;;  %8743 = vmatpush3.bf16.msra.mxu1 %v13528_v51  ;;  %v7584_v0 = vld [vmem:[%s13607_s7] sm:$0xf] }
 0x662   : > { %v7475_v13 = vpack.c.bf16 %v7454_v9, %v7453_v30  ;;  %v8933_v20 = vpop.f32.mrb[220].mxu1 }
 0x663   : > { %v7411_v56 = vadd.f32 %v8933_v20, %v13507_v27  ;;  %v7402_v63 = vpop.f32.mrb[221].mxu1 }
 0x664   : > { %v7403_v7 = vadd.f32 %v7402_v63, %v13501_v35  ;;  %v8934_v57 = vpop.f32.mrb[222].mxu1  ;;  %8744 = vmatprep.subr.bf16.mxu1 %v7475_v13 }
 0x665   : > { %v7414_v39 = vadd.f32 %v8934_v57, %v13510_v6  ;;  %v7405_v14 = vpop.f32.mrb[223].mxu1  ;;  %8745 = vmatpush3.bf16.msra.mxu1 %v13538_v43  ;;  %v7459_v33 = vmax.f32 %v7411_v56, 0.0 }
 0x666   : > { %v7406_v44 = vadd.f32 %v7405_v14, %v13504_v28  ;;  %8746 = vmatprep.subr.bf16.mxu1 %v7476_v31  ;;  %v7457_v51 = vmax.f32 %v7403_v7, 0.0 }
 0x667   : > { %v7460_v29 = vmax.f32 %v7414_v39, 0.0 }
 0x668   : > { %v7458_v46 = vmax.f32 %v7406_v44, 0.0 }
 0x669   : > { %v7478_v1 = vpack.c.bf16 %v7460_v29, %v7459_v33  ;;  %8747 = vmatpush3.bf16.msra.mxu1 %v13536_v8 }
 0x66a   : > { %v7477_v27 = vpack.c.bf16 %v7458_v46, %v7457_v51  ;;  %v8937_v53 = vpop.f32.mrb[224].mxu1 }
 0x66b   : > { %v7427_v35 = vadd.f32 %v8937_v53, %v13519_v2  ;;  %v7418_v48 = vpop.f32.mrb[225].mxu1 }
 0x66c   : > { %v7419_v6 = vadd.f32 %v7418_v48, %v13513_v12  ;;  %v8938_v24 = vpop.f32.mrb[226].mxu1  ;;  %8748 = vmatprep.subr.bf16.mxu1 %v7477_v27  ;;  %v10229_v12 = vld [vmem:[%s13605_s5] ss:$8 sps:$4 sm:$0xff]  }
 0x66d   : > { %v7430_v43 = vadd.f32 %v8938_v24, %v13522_v61  ;;  %v7421_v28 = vpop.f32.mrb[227].mxu1  ;;  %8749 = vmatpush3.bf16.msra.mxu1 %v13546_v4  ;;  %v7463_v36 = vmax.f32 %v7427_v35, 0.0  ;;  %v10232_v61 = vld [vmem:[%s13605_s5 + $0x10] ss:$8 sps:$4 sm:$0xff]  }
 0x66e   : > { %v7422_v34 = vadd.f32 %v7421_v28, %v13516_v38  ;;  %8750 = vmatprep.subr.bf16.mxu1 %v7478_v1  ;;  %v7461_v8 = vmax.f32 %v7419_v6, 0.0  ;;  %v10234_v38 = vld [vmem:[%s13605_s5 + $0x14] ss:$8 sps:$4 sm:$0xff]  }
 0x66f   : > { %v7464_v19 = vmax.f32 %v7430_v43, 0.0 }
 0x670   : > { %v7462_v42 = vmax.f32 %v7422_v34, 0.0 }
 0x671   : > { %v7480_v3 = vpack.c.bf16 %v7464_v19, %v7463_v36  ;;  %8751 = vmatpush3.bf16.msra.mxu1 %v13544_v5  ;;  %v10244_v5 = vmov 0.0  }
 0x672   : > { %v7479_v2 = vpack.c.bf16 %v7462_v42, %v7461_v8 }
 0x674   : > { %8752 = vmatprep.subr.bf16.mxu1 %v7479_v2 }
 0x675   : > { %8753 = vmatpush3.bf16.msra.mxu1 %v13554_v40 }
 0x676   : > { %8754 = vmatprep.subr.bf16.mxu1 %v7480_v3 }
 0x679   : > { %8755 = vmatpush3.bf16.msra.mxu1 %v13552_v18  ;;  %v7492_v18 = vpop.permute.xlu0 %7491 }
 0x67a   : > { %8939 = vmatprep.subr.bf16.mxu1 %v10244_v5 }
 0x67c   : > { %7562 = vmatmul.mubr.bf16.vlgmr.msra.gmra.mrb[228].mxu1 %v10229_v12 }
 0x67d   : > { %7569 = vmatprep.mubr.bf16.mxu1 %v10234_v38  ;;  %v7502_v37 = vpop.permute.xlu0 %7501 }
 0x681   : > { %v7589_v54 = vpop.permute.xlu0 %7588 }
 0x684   : > { %7570 = vmatmul.mubr.bf16.gmra.mrb[232].mxu1 %v10232_v61 }
 0x685   : > { %8943 = vmatprep.mubr.msk.bf16.mxu1 %vm10245_vm2, %v10244_v5 }
 0x74f   : > { %v8756_v4 = vpop.f32.mrb[228].mxu1 }
 0x750   : > { %v8757_v41 = vpop.f32.mrb[229].mxu1 }
 0x751   : > { %v8758_v40 = vadd.f32 %v8757_v41, %v8756_v4  ;;  %v8759_v17 = vpop.f32.mrb[230].mxu1 }
 0x752   : > { %v8760_v16 = vpop.f32.mrb[231].mxu1 }
 0x753   : > { %v7564_v49 = vadd.f32 %v8758_v40, %v7492_v18  ;;  %v8761_v50 = vadd.f32 %v8760_v16, %v8759_v17 }
 0x755   : > { %v7567_v59 = vadd.f32 %v8761_v50, %v7497_v32  ;;  %v7578_v52 = vmax.f32 %v7564_v49, 0.0 }
 0x757   : > { %v7579_v62 = vmax.f32 %v7567_v59, 0.0  ;;  %v8762_v15 = vpop.f32.mrb[232].mxu1 }
 0x758   : > { %v8763_v26 = vpop.f32.mrb[233].mxu1 }
 0x759   : > { %v7582_v21 = vpack.c.bf16 %v7579_v62, %v7578_v52  ;;  %v8764_v11 = vadd.f32 %v8763_v26, %v8762_v15  ;;  %v8765_v55 = vpop.f32.mrb[234].mxu1 }
 0x75a   : > { %v8766_v47 = vpop.f32.mrb[235].mxu1 }
 0x75b   : > { %v7572_v22 = vadd.f32 %v8764_v11, %v7502_v37  ;;  %v8767_v58 = vadd.f32 %v8766_v47, %v8765_v55  ;;  %8940 = vmatpush3.bf16.msra.mxu1 %v7582_v21 }
 0x75c   : > { %8941 = vmatprep.subr.bf16.mxu1 %v10244_v5 }
 0x75d   : > { %v7575_v60 = vadd.f32 %v8767_v58, %v7507_v23  ;;  %v7580_v10 = vmax.f32 %v7572_v22, 0.0 }
 0x75f   : > { %v7581_v25 = vmax.f32 %v7575_v60, 0.0 }
 0x761   : > { %v7583_v45 = vpack.c.bf16 %v7581_v25, %v7580_v10 }
 0x763   : > { %8942 = vmatpush3.bf16.msra.mxu1 %v7583_v45 }
 0x766   : > { %8944 = vmatmul.mubr.msk.bf16.vlgmr.msra.gmra.mrb[236].mxu1 %vm7591_vm3, %v7584_v0 }
 0x839   : > { %v7629_v30 = vpop.f32.mrb[236].mxu1 }
 0x83a   : > { %v7630_v9 = vadd.f32 %v7629_v30, %v7589_v54  ;;  %v8945_v31 = vpop.f32.mrb[237].mxu1 }
 0x83b   : > { %v7632_v13 = vpop.f32.mrb[238].mxu1 }
 0x83c   : > { %7635 = vst [vmem:[%s335_s18] sm:$0xff] %v7630_v9  ;;  %v8946_v20 = vpop.f32.mrb[239].mxu1 }
 0x83d PF: > { %s19_s30 = sadd.s32 1, %s10241_s30  }
 0x83e   : > { %p16_p5 = scmp.ge.s32.totalorder %s19_s30, 4  }
 0x840   :  { %18 = sbr.rel (!%p16_p5) target bundleno = 1 (0x1), region = 86 }

</bundles_post_ra>
